<compile_context>
chip_gen: v7x
topology: tpu7x:2x2x1
jax: 0.10.0
libtpu: 0.0.40
codegen_flags: <defaults>
</compile_context>

<pallas_src>
import functools

import jax
import jax.numpy as jnp
from jax.experimental import pallas as pl
from jax.experimental.pallas import tpu as pltpu


# ----------------------------------------------------------------------------
# The single fused kernel: one batch element per grid step.
#   inputs  (per modality): (1, HW, C) activation block
#   params  (stacked, index 0=rgb, 1=depth, 2=thermal):
#     SE:   w1 (3,C,Cr)  b1 (3,1,Cr)  w2 (3,Cr,C)  b2 (3,1,C)       [f32]
#     conv: w  (3,9C,128) im2col layout [bf16], scale/bias (3,1,128) [f32]
#   CBR:    w (256,C) [bf16], scale/bias (1,C) [f32]
#   output: (1, HW, C)
# ----------------------------------------------------------------------------
def _fuse_kernel(H, W, C,
                 rgb_ref, depth_ref, thermal_ref,
                 w1_ref, b1_ref, w2_ref, b2_ref,
                 cw_ref, cs_ref, cb_ref,
                 wcbr_ref, cbrs_ref, cbrb_ref,
                 o_ref):
    HW = H * W

    def se_conv_branch(x_ref, m):
        # --- SqueezeAndExcitation: GAP -> 1x1 fc -> ReLU -> 1x1 fc -> sigmoid
        x = x_ref[0].astype(jnp.float32)                       # (HW, C)
        pooled = jnp.mean(x, axis=0, keepdims=True)            # (1, C)
        h = jnp.maximum(
            jnp.dot(pooled, w1_ref[m], preferred_element_type=jnp.float32)
            + b1_ref[m], 0.0)                                  # (1, Cr)
        gate = jax.nn.sigmoid(
            jnp.dot(h, w2_ref[m], preferred_element_type=jnp.float32)
            + b2_ref[m])                                       # (1, C)
        xs = (x * gate).reshape(H, W, C)                       # (H, W, C) f32

        # --- in-kernel zero padding (conv3x3, pad=1) — no HBM round trip.
        zc = jnp.zeros((H, 1, C), jnp.float32)
        zr = jnp.zeros((1, W + 2, C), jnp.float32)
        xp = jnp.concatenate([zc, xs, zc], axis=1)             # (H, W+2, C)
        xp = jnp.concatenate([zr, xp, zr], axis=0)             # (H+2, W+2, C)

        # --- im2col: one (HW, 9C) x (9C, 128) bf16 MXU matmul (K = 9*Cin).
        cols = [xp[dy:dy + H, dx:dx + W, :].reshape(HW, C)
                for dy in range(3) for dx in range(3)]
        patches = jnp.concatenate(cols, axis=1).astype(jnp.bfloat16)  # (HW, 9C)
        acc = jnp.dot(patches, cw_ref[m],
                      preferred_element_type=jnp.float32)      # (HW, 128) f32

        # --- folded BatchNorm (eval) + ReLU, in f32.
        return jnp.maximum(acc * cs_ref[m] + cb_ref[m], 0.0)   # (HW, 128)

    rgb_ = se_conv_branch(rgb_ref, 0)       # conv_r(se_rgb(rgb))
    depth_ = se_conv_branch(depth_ref, 1)   # conv_d(se_depth(depth))
    thermal_ = se_conv_branch(thermal_ref, 2)  # conv_t(se_thermal(thermal))

    # Elementwise fusion (matches the PyTorch module exactly):
    #   d_rgb = rgb_*depth_   + rgb_
    #   t_rgb = rgb_*thermal_ + thermal_
    d_rgb = rgb_ * depth_ + rgb_
    t_rgb = rgb_ * thermal_ + thermal_

    # CBR: concat order (t_rgb, d_rgb) along channels, single K=256 matmul.
    cat = jnp.concatenate([t_rgb, d_rgb], axis=1).astype(jnp.bfloat16)   # (HW, 256)
    y = jnp.dot(cat, wcbr_ref[...], preferred_element_type=jnp.float32)  # (HW, C)
    y = jnp.maximum(y * cbrs_ref[...] + cbrb_ref[...], 0.0)
    o_ref[0] = y.astype(o_ref.dtype)


@jax.jit
def fuse_module_forward(rgb_nhwc, thermal_nhwc, depth_nhwc, params):
    N, H, W, C = rgb_nhwc.shape
    Cr = params["se_w1"].shape[-1]
    HW = H * W

    r2 = rgb_nhwc.reshape(N, HW, C)
    d2 = depth_nhwc.reshape(N, HW, C)
    t2 = thermal_nhwc.reshape(N, HW, C)

    kernel = functools.partial(_fuse_kernel, H, W, C)
    full = lambda n: (0, 0, 0)
    full2 = lambda n: (0, 0)
    per_batch = lambda n: (n, 0, 0)

    out = pl.pallas_call(
        kernel,
        out_shape=jax.ShapeDtypeStruct((N, HW, C), rgb_nhwc.dtype),
        grid=(N,),
        in_specs=[
            pl.BlockSpec((1, HW, C), per_batch),        # rgb
            pl.BlockSpec((1, HW, C), per_batch),        # depth
            pl.BlockSpec((1, HW, C), per_batch),        # thermal
            pl.BlockSpec((3, C, Cr), full),             # SE w1
            pl.BlockSpec((3, 1, Cr), full),             # SE b1
            pl.BlockSpec((3, Cr, C), full),             # SE w2
            pl.BlockSpec((3, 1, C), full),              # SE b2
            pl.BlockSpec((3, 9 * C, 128), full),        # conv3x3 weights (im2col, bf16)
            pl.BlockSpec((3, 1, 128), full),            # conv BN scale
            pl.BlockSpec((3, 1, 128), full),            # conv BN bias
            pl.BlockSpec((256, C), full2),              # CBR weight (bf16)
            pl.BlockSpec((1, C), full2),                # CBR BN scale
            pl.BlockSpec((1, C), full2),                # CBR BN bias
        ],
        out_specs=pl.BlockSpec((1, HW, C), per_batch),
        compiler_params=pltpu.CompilerParams(
            dimension_semantics=("parallel",)),
    )(r2, d2, t2,
      params["se_w1"], params["se_b1"], params["se_w2"], params["se_b2"],
      params["conv_w"], params["conv_scale"], params["conv_bias"],
      params["cbr_w"], params["cbr_scale"], params["cbr_bias"])
    return out.reshape(N, H, W, C)


# ----------------------------------------------------------------------------
# Parameter construction (deterministic, synthetic), pre-packed for the kernel.
# Stacking order along the leading axis: 0 = rgb/conv_r, 1 = depth/conv_d,
# 2 = thermal/conv_t.
# ----------------------------------------------------------------------------
def _fold_bn(key, c, eps=1e-5):
    k1, k2, k3, k4 = jax.random.split(key, 4)
    gamma = 1.0 + 0.1 * jax.random.normal(k1, (c,), jnp.float32)
    beta = 0.1 * jax.random.normal(k2, (c,), jnp.float32)
    mean = 0.1 * jax.random.normal(k3, (c,), jnp.float32)
    var = jax.random.uniform(k4, (c,), jnp.float32, 0.5, 1.5)
    scale = gamma / jnp.sqrt(var + eps)
    bias = beta - mean * scale
    return scale[None, :], bias[None, :]


def init_params(key, channels_in, reduction=16):
    cr = max(channels_in // reduction, 1)
    keys = jax.random.split(key, 16)

    se_w1, se_b1, se_w2, se_b2 = [], [], [], []
    for i in range(3):                                  # 0=rgb, 1=depth, 2=thermal
        k = jax.random.split(keys[i], 4)
        se_w1.append(0.1 * jax.random.normal(k[0], (channels_in, cr), jnp.float32))
        se_b1.append(0.1 * jax.random.normal(k[1], (1, cr), jnp.float32))
        se_w2.append(0.1 * jax.random.normal(k[2], (cr, channels_in), jnp.float32))
        se_b2.append(0.1 * jax.random.normal(k[3], (1, channels_in), jnp.float32))

    conv_w, conv_s, conv_b = [], [], []
    for i in range(3):                                  # 0=conv_r, 1=conv_d, 2=conv_t
        k = jax.random.split(keys[4 + i], 2)
        # HWIO (kh, kw, Cin, 128) (== PyTorch OIHW weight permuted (2,3,1,0)),
        # flattened to the im2col layout (9*Cin, 128), bf16 for the MXU.
        w = 0.05 * jax.random.normal(k[0], (3, 3, channels_in, 128), jnp.float32)
        conv_w.append(w.reshape(9 * channels_in, 128).astype(jnp.bfloat16))
        s, b = _fold_bn(k[1], 128)
        conv_s.append(s)
        conv_b.append(b)

    k = jax.random.split(keys[8], 2)
    # 1x1 conv weight as (256, Cout): rows [0:128] act on t_rgb, [128:256] on
    # d_rgb (matches torch.concat((t_rgb, d_rgb), dim=1)).
    cbr_w = 0.05 * jax.random.normal(k[0], (256, channels_in), jnp.float32)
    cbr_s, cbr_b = _fold_bn(k[1], channels_in)

    return dict(
        se_w1=jnp.stack(se_w1), se_b1=jnp.stack(se_b1),
        se_w2=jnp.stack(se_w2), se_b2=jnp.stack(se_b2),
        conv_w=jnp.stack(conv_w),
        conv_scale=jnp.stack(conv_s), conv_bias=jnp.stack(conv_b),
        cbr_w=cbr_w.astype(jnp.bfloat16),
        cbr_scale=cbr_s, cbr_bias=cbr_b,
    )


if __name__ == "__main__":
    N, C, H, W = 2, 64, 8, 8   # small NCHW shapes consistent with the module
    key = jax.random.PRNGKey(0)
    k_rgb, k_th, k_dp, k_par = jax.random.split(key, 4)
    rgb = jax.random.normal(k_rgb, (N, C, H, W), jnp.float32)       # NCHW
    thermal = jax.random.normal(k_th, (N, C, H, W), jnp.float32)
    depth = jax.random.normal(k_dp, (N, C, H, W), jnp.float32)
    params = init_params(k_par, C)

    # NCHW -> NHWC (channels-last) for the kernel, back to NCHW afterwards.
    to_nhwc = lambda x: jnp.transpose(x, (0, 2, 3, 1))
    out_nhwc = fuse_module_forward(to_nhwc(rgb), to_nhwc(thermal),
                                   to_nhwc(depth), params)
    out = jnp.transpose(out_nhwc, (0, 3, 1, 2))                      # NCHW
    jax.block_until_ready(out)
    assert out.shape == (N, C, H, W)
    assert bool(jnp.all(jnp.isfinite(out)))
    print("KERNEL_OK")
</pallas_src>

<mosaic_0001>
module attributes {stable_mosaic.version = 11 : i64} {
  func.func @_fuse_kernel(%arg0: i32, %arg1: memref<1x64x64xf32, #tpu.memory_space<vmem>>, %arg2: memref<1x64x64xf32, #tpu.memory_space<vmem>>, %arg3: memref<1x64x64xf32, #tpu.memory_space<vmem>>, %arg4: memref<3x64x4xf32, #tpu.memory_space<vmem>>, %arg5: memref<3x1x4xf32, #tpu.memory_space<vmem>>, %arg6: memref<3x4x64xf32, #tpu.memory_space<vmem>>, %arg7: memref<3x1x64xf32, #tpu.memory_space<vmem>>, %arg8: memref<3x576x128xbf16, #tpu.memory_space<vmem>>, %arg9: memref<3x1x128xf32, #tpu.memory_space<vmem>>, %arg10: memref<3x1x128xf32, #tpu.memory_space<vmem>>, %arg11: memref<256x64xbf16, #tpu.memory_space<vmem>>, %arg12: memref<1x64xf32, #tpu.memory_space<vmem>>, %arg13: memref<1x64xf32, #tpu.memory_space<vmem>>, %arg14: memref<1x64x64xf32, #tpu.memory_space<vmem>>) attributes {dimension_semantics = [#tpu.dimension_semantics<parallel>], iteration_bounds = array<i64: 2>, scalar_prefetch = 0 : i64, scratch_operands = 0 : i64, tpu.core_type = #tpu.core_type<tc>, window_params = [{transform_indices = @transform_0, window_bounds = array<i64: 1, 64, 64>}, {transform_indices = @transform_1, window_bounds = array<i64: 1, 64, 64>}, {transform_indices = @transform_2, window_bounds = array<i64: 1, 64, 64>}, {pipeline_mode = #tpu.pipeline_mode<synchronous>, transform_indices = @transform_3, window_bounds = array<i64: 3, 64, 4>}, {pipeline_mode = #tpu.pipeline_mode<synchronous>, transform_indices = @transform_4, window_bounds = array<i64: 3, 1, 4>}, {pipeline_mode = #tpu.pipeline_mode<synchronous>, transform_indices = @transform_5, window_bounds = array<i64: 3, 4, 64>}, {pipeline_mode = #tpu.pipeline_mode<synchronous>, transform_indices = @transform_6, window_bounds = array<i64: 3, 1, 64>}, {pipeline_mode = #tpu.pipeline_mode<synchronous>, transform_indices = @transform_7, window_bounds = array<i64: 3, 576, 128>}, {pipeline_mode = #tpu.pipeline_mode<synchronous>, transform_indices = @transform_8, window_bounds = array<i64: 3, 1, 128>}, {pipeline_mode = #tpu.pipeline_mode<synchronous>, transform_indices = @transform_9, window_bounds = array<i64: 3, 1, 128>}, {pipeline_mode = #tpu.pipeline_mode<synchronous>, transform_indices = @transform_10, window_bounds = array<i64: 256, 64>}, {pipeline_mode = #tpu.pipeline_mode<synchronous>, transform_indices = @transform_11, window_bounds = array<i64: 1, 64>}, {pipeline_mode = #tpu.pipeline_mode<synchronous>, transform_indices = @transform_12, window_bounds = array<i64: 1, 64>}, {transform_indices = @transform_13, window_bounds = array<i64: 1, 64, 64>}]} {
    %c0 = arith.constant 0 : index
    %c0_0 = arith.constant 0 : index
    %c0_1 = arith.constant 0 : index
    %0 = vector.load %arg1[%c0, %c0_0, %c0_1] : memref<1x64x64xf32, #tpu.memory_space<vmem>>, vector<1x64x64xf32>
    %1 = vector.shape_cast %0 : vector<1x64x64xf32> to vector<64x64xf32>
    %cst = arith.constant dense<0.000000e+00> : vector<64xf32>
    %2 = vector.multi_reduction <add>, %1, %cst [0] : vector<64x64xf32> to vector<64xf32>
    %3 = vector.shape_cast %2 : vector<64xf32> to vector<1x64xf32>
    %cst_2 = arith.constant 6.400000e+01 : f32
    %4 = vector.broadcast %cst_2 : f32 to vector<1x64xf32>
    %5 = arith.divf %3, %4 : vector<1x64xf32>
    %c0_3 = arith.constant 0 : index
    %c0_4 = arith.constant 0 : index
    %c0_5 = arith.constant 0 : index
    %6 = vector.load %arg4[%c0_3, %c0_4, %c0_5] : memref<3x64x4xf32, #tpu.memory_space<vmem>>, vector<1x64x4xf32>
    %7 = vector.shape_cast %6 : vector<1x64x4xf32> to vector<64x4xf32>
    %cst_6 = arith.constant dense<0.000000e+00> : vector<1x4xf32>
    %8 = tpu.matmul %5, %7, %cst_6 {dimension_numbers = #tpu.dot_dimension_numbers<[1], [0], [0], [1], [0, 0, 1, 1], [], []>} : vector<1x64xf32>, vector<64x4xf32>, vector<1x4xf32> -> vector<1x4xf32>
    %c0_7 = arith.constant 0 : index
    %c0_8 = arith.constant 0 : index
    %c0_9 = arith.constant 0 : index
    %9 = vector.load %arg5[%c0_7, %c0_8, %c0_9] : memref<3x1x4xf32, #tpu.memory_space<vmem>>, vector<1x1x4xf32>
    %10 = vector.shape_cast %9 : vector<1x1x4xf32> to vector<1x4xf32>
    %11 = arith.addf %8, %10 : vector<1x4xf32>
    %cst_10 = arith.constant 0.000000e+00 : f32
    %12 = vector.broadcast %cst_10 : f32 to vector<1x4xf32>
    %13 = arith.maximumf %11, %12 : vector<1x4xf32>
    %c0_11 = arith.constant 0 : index
    %c0_12 = arith.constant 0 : index
    %c0_13 = arith.constant 0 : index
    %14 = vector.load %arg6[%c0_11, %c0_12, %c0_13] : memref<3x4x64xf32, #tpu.memory_space<vmem>>, vector<1x4x64xf32>
    %15 = vector.shape_cast %14 : vector<1x4x64xf32> to vector<4x64xf32>
    %cst_14 = arith.constant dense<0.000000e+00> : vector<1x64xf32>
    %16 = tpu.matmul %13, %15, %cst_14 {dimension_numbers = #tpu.dot_dimension_numbers<[1], [0], [0], [1], [0, 0, 1, 1], [], []>} : vector<1x4xf32>, vector<4x64xf32>, vector<1x64xf32> -> vector<1x64xf32>
    %c0_15 = arith.constant 0 : index
    %c0_16 = arith.constant 0 : index
    %c0_17 = arith.constant 0 : index
    %17 = vector.load %arg7[%c0_15, %c0_16, %c0_17] : memref<3x1x64xf32, #tpu.memory_space<vmem>>, vector<1x1x64xf32>
    %18 = vector.shape_cast %17 : vector<1x1x64xf32> to vector<1x64xf32>
    %19 = arith.addf %16, %18 : vector<1x64xf32>
    %20 = arith.negf %19 : vector<1x64xf32>
    %21 = math.exp %20 : vector<1x64xf32>
    %cst_18 = arith.constant 1.000000e+00 : f32
    %22 = vector.broadcast %cst_18 : f32 to vector<1x64xf32>
    %23 = arith.addf %22, %21 : vector<1x64xf32>
    %24 = arith.divf %22, %23 : vector<1x64xf32>
    %25 = vector.broadcast %24 : vector<1x64xf32> to vector<64x64xf32>
    %26 = arith.mulf %1, %25 : vector<64x64xf32>
    %27 = vector.shape_cast %26 : vector<64x64xf32> to vector<8x8x64xf32>
    %cst_19 = arith.constant 0.000000e+00 : f32
    %28 = vector.broadcast %cst_19 : f32 to vector<8x1x64xf32>
    %cst_20 = arith.constant 0.000000e+00 : f32
    %29 = vector.broadcast %cst_20 : f32 to vector<1x10x64xf32>
    %30 = tpu.concatenate %28, %27, %28 in 1 : vector<8x1x64xf32>, vector<8x8x64xf32>, vector<8x1x64xf32> -> vector<8x10x64xf32>
    %31 = tpu.concatenate %29, %30, %29 in 0 : vector<1x10x64xf32>, vector<8x10x64xf32>, vector<1x10x64xf32> -> vector<10x10x64xf32>
    %32 = vector.extract_strided_slice %31 {offsets = [0, 0, 0], sizes = [8, 8, 64], strides = [1, 1, 1]} : vector<10x10x64xf32> to vector<8x8x64xf32>
    %33 = vector.shape_cast %32 : vector<8x8x64xf32> to vector<64x64xf32>
    %34 = vector.extract_strided_slice %31 {offsets = [0, 1, 0], sizes = [8, 8, 64], strides = [1, 1, 1]} : vector<10x10x64xf32> to vector<8x8x64xf32>
    %35 = vector.shape_cast %34 : vector<8x8x64xf32> to vector<64x64xf32>
    %36 = vector.extract_strided_slice %31 {offsets = [0, 2, 0], sizes = [8, 8, 64], strides = [1, 1, 1]} : vector<10x10x64xf32> to vector<8x8x64xf32>
    %37 = vector.shape_cast %36 : vector<8x8x64xf32> to vector<64x64xf32>
    %38 = vector.extract_strided_slice %31 {offsets = [1, 0, 0], sizes = [8, 8, 64], strides = [1, 1, 1]} : vector<10x10x64xf32> to vector<8x8x64xf32>
    %39 = vector.shape_cast %38 : vector<8x8x64xf32> to vector<64x64xf32>
    %40 = vector.extract_strided_slice %31 {offsets = [1, 1, 0], sizes = [8, 8, 64], strides = [1, 1, 1]} : vector<10x10x64xf32> to vector<8x8x64xf32>
    %41 = vector.shape_cast %40 : vector<8x8x64xf32> to vector<64x64xf32>
    %42 = vector.extract_strided_slice %31 {offsets = [1, 2, 0], sizes = [8, 8, 64], strides = [1, 1, 1]} : vector<10x10x64xf32> to vector<8x8x64xf32>
    %43 = vector.shape_cast %42 : vector<8x8x64xf32> to vector<64x64xf32>
    %44 = vector.extract_strided_slice %31 {offsets = [2, 0, 0], sizes = [8, 8, 64], strides = [1, 1, 1]} : vector<10x10x64xf32> to vector<8x8x64xf32>
    %45 = vector.shape_cast %44 : vector<8x8x64xf32> to vector<64x64xf32>
    %46 = vector.extract_strided_slice %31 {offsets = [2, 1, 0], sizes = [8, 8, 64], strides = [1, 1, 1]} : vector<10x10x64xf32> to vector<8x8x64xf32>
    %47 = vector.shape_cast %46 : vector<8x8x64xf32> to vector<64x64xf32>
    %48 = vector.extract_strided_slice %31 {offsets = [2, 2, 0], sizes = [8, 8, 64], strides = [1, 1, 1]} : vector<10x10x64xf32> to vector<8x8x64xf32>
    %49 = vector.shape_cast %48 : vector<8x8x64xf32> to vector<64x64xf32>
    %50 = tpu.concatenate %33, %35, %37, %39, %41, %43, %45, %47, %49 in 1 : vector<64x64xf32>, vector<64x64xf32>, vector<64x64xf32>, vector<64x64xf32>, vector<64x64xf32>, vector<64x64xf32>, vector<64x64xf32>, vector<64x64xf32>, vector<64x64xf32> -> vector<64x576xf32>
    %51 = arith.truncf %50 : vector<64x576xf32> to vector<64x576xbf16>
    %c0_21 = arith.constant 0 : index
    %c0_22 = arith.constant 0 : index
    %c0_23 = arith.constant 0 : index
    %52 = vector.load %arg8[%c0_21, %c0_22, %c0_23] : memref<3x576x128xbf16, #tpu.memory_space<vmem>>, vector<1x576x128xbf16>
    %53 = vector.shape_cast %52 : vector<1x576x128xbf16> to vector<576x128xbf16>
    %cst_24 = arith.constant dense<0.000000e+00> : vector<64x128xf32>
    %54 = tpu.matmul %51, %53, %cst_24 {dimension_numbers = #tpu.dot_dimension_numbers<[1], [0], [0], [1], [0, 0, 1, 1], [], []>} : vector<64x576xbf16>, vector<576x128xbf16>, vector<64x128xf32> -> vector<64x128xf32>
    %c0_25 = arith.constant 0 : index
    %c0_26 = arith.constant 0 : index
    %c0_27 = arith.constant 0 : index
    %55 = vector.load %arg9[%c0_25, %c0_26, %c0_27] : memref<3x1x128xf32, #tpu.memory_space<vmem>>, vector<1x1x128xf32>
    %56 = vector.shape_cast %55 : vector<1x1x128xf32> to vector<1x128xf32>
    %57 = vector.broadcast %56 : vector<1x128xf32> to vector<64x128xf32>
    %58 = arith.mulf %54, %57 : vector<64x128xf32>
    %c0_28 = arith.constant 0 : index
    %c0_29 = arith.constant 0 : index
    %c0_30 = arith.constant 0 : index
    %59 = vector.load %arg10[%c0_28, %c0_29, %c0_30] : memref<3x1x128xf32, #tpu.memory_space<vmem>>, vector<1x1x128xf32>
    %60 = vector.shape_cast %59 : vector<1x1x128xf32> to vector<1x128xf32>
    %61 = vector.broadcast %60 : vector<1x128xf32> to vector<64x128xf32>
    %62 = arith.addf %58, %61 : vector<64x128xf32>
    %cst_31 = arith.constant 0.000000e+00 : f32
    %63 = vector.broadcast %cst_31 : f32 to vector<64x128xf32>
    %64 = arith.maximumf %62, %63 : vector<64x128xf32>
    %c0_32 = arith.constant 0 : index
    %c0_33 = arith.constant 0 : index
    %c0_34 = arith.constant 0 : index
    %65 = vector.load %arg2[%c0_32, %c0_33, %c0_34] : memref<1x64x64xf32, #tpu.memory_space<vmem>>, vector<1x64x64xf32>
    %66 = vector.shape_cast %65 : vector<1x64x64xf32> to vector<64x64xf32>
    %cst_35 = arith.constant dense<0.000000e+00> : vector<64xf32>
    %67 = vector.multi_reduction <add>, %66, %cst_35 [0] : vector<64x64xf32> to vector<64xf32>
    %68 = vector.shape_cast %67 : vector<64xf32> to vector<1x64xf32>
    %cst_36 = arith.constant 6.400000e+01 : f32
    %69 = vector.broadcast %cst_36 : f32 to vector<1x64xf32>
    %70 = arith.divf %68, %69 : vector<1x64xf32>
    %c1 = arith.constant 1 : index
    %c0_37 = arith.constant 0 : index
    %c0_38 = arith.constant 0 : index
    %71 = vector.load %arg4[%c1, %c0_37, %c0_38] : memref<3x64x4xf32, #tpu.memory_space<vmem>>, vector<1x64x4xf32>
    %72 = vector.shape_cast %71 : vector<1x64x4xf32> to vector<64x4xf32>
    %cst_39 = arith.constant dense<0.000000e+00> : vector<1x4xf32>
    %73 = tpu.matmul %70, %72, %cst_39 {dimension_numbers = #tpu.dot_dimension_numbers<[1], [0], [0], [1], [0, 0, 1, 1], [], []>} : vector<1x64xf32>, vector<64x4xf32>, vector<1x4xf32> -> vector<1x4xf32>
    %c1_40 = arith.constant 1 : index
    %c0_41 = arith.constant 0 : index
    %c0_42 = arith.constant 0 : index
    %74 = vector.load %arg5[%c1_40, %c0_41, %c0_42] : memref<3x1x4xf32, #tpu.memory_space<vmem>>, vector<1x1x4xf32>
    %75 = vector.shape_cast %74 : vector<1x1x4xf32> to vector<1x4xf32>
    %76 = arith.addf %73, %75 : vector<1x4xf32>
    %cst_43 = arith.constant 0.000000e+00 : f32
    %77 = vector.broadcast %cst_43 : f32 to vector<1x4xf32>
    %78 = arith.maximumf %76, %77 : vector<1x4xf32>
    %c1_44 = arith.constant 1 : index
    %c0_45 = arith.constant 0 : index
    %c0_46 = arith.constant 0 : index
    %79 = vector.load %arg6[%c1_44, %c0_45, %c0_46] : memref<3x4x64xf32, #tpu.memory_space<vmem>>, vector<1x4x64xf32>
    %80 = vector.shape_cast %79 : vector<1x4x64xf32> to vector<4x64xf32>
    %cst_47 = arith.constant dense<0.000000e+00> : vector<1x64xf32>
    %81 = tpu.matmul %78, %80, %cst_47 {dimension_numbers = #tpu.dot_dimension_numbers<[1], [0], [0], [1], [0, 0, 1, 1], [], []>} : vector<1x4xf32>, vector<4x64xf32>, vector<1x64xf32> -> vector<1x64xf32>
    %c1_48 = arith.constant 1 : index
    %c0_49 = arith.constant 0 : index
    %c0_50 = arith.constant 0 : index
    %82 = vector.load %arg7[%c1_48, %c0_49, %c0_50] : memref<3x1x64xf32, #tpu.memory_space<vmem>>, vector<1x1x64xf32>
    %83 = vector.shape_cast %82 : vector<1x1x64xf32> to vector<1x64xf32>
    %84 = arith.addf %81, %83 : vector<1x64xf32>
    %85 = arith.negf %84 : vector<1x64xf32>
    %86 = math.exp %85 : vector<1x64xf32>
    %cst_51 = arith.constant 1.000000e+00 : f32
    %87 = vector.broadcast %cst_51 : f32 to vector<1x64xf32>
    %88 = arith.addf %87, %86 : vector<1x64xf32>
    %89 = arith.divf %87, %88 : vector<1x64xf32>
    %90 = vector.broadcast %89 : vector<1x64xf32> to vector<64x64xf32>
    %91 = arith.mulf %66, %90 : vector<64x64xf32>
    %92 = vector.shape_cast %91 : vector<64x64xf32> to vector<8x8x64xf32>
    %cst_52 = arith.constant 0.000000e+00 : f32
    %93 = vector.broadcast %cst_52 : f32 to vector<8x1x64xf32>
    %cst_53 = arith.constant 0.000000e+00 : f32
    %94 = vector.broadcast %cst_53 : f32 to vector<1x10x64xf32>
    %95 = tpu.concatenate %93, %92, %93 in 1 : vector<8x1x64xf32>, vector<8x8x64xf32>, vector<8x1x64xf32> -> vector<8x10x64xf32>
    %96 = tpu.concatenate %94, %95, %94 in 0 : vector<1x10x64xf32>, vector<8x10x64xf32>, vector<1x10x64xf32> -> vector<10x10x64xf32>
    %97 = vector.extract_strided_slice %96 {offsets = [0, 0, 0], sizes = [8, 8, 64], strides = [1, 1, 1]} : vector<10x10x64xf32> to vector<8x8x64xf32>
    %98 = vector.shape_cast %97 : vector<8x8x64xf32> to vector<64x64xf32>
    %99 = vector.extract_strided_slice %96 {offsets = [0, 1, 0], sizes = [8, 8, 64], strides = [1, 1, 1]} : vector<10x10x64xf32> to vector<8x8x64xf32>
    %100 = vector.shape_cast %99 : vector<8x8x64xf32> to vector<64x64xf32>
    %101 = vector.extract_strided_slice %96 {offsets = [0, 2, 0], sizes = [8, 8, 64], strides = [1, 1, 1]} : vector<10x10x64xf32> to vector<8x8x64xf32>
    %102 = vector.shape_cast %101 : vector<8x8x64xf32> to vector<64x64xf32>
    %103 = vector.extract_strided_slice %96 {offsets = [1, 0, 0], sizes = [8, 8, 64], strides = [1, 1, 1]} : vector<10x10x64xf32> to vector<8x8x64xf32>
    %104 = vector.shape_cast %103 : vector<8x8x64xf32> to vector<64x64xf32>
    %105 = vector.extract_strided_slice %96 {offsets = [1, 1, 0], sizes = [8, 8, 64], strides = [1, 1, 1]} : vector<10x10x64xf32> to vector<8x8x64xf32>
    %106 = vector.shape_cast %105 : vector<8x8x64xf32> to vector<64x64xf32>
    %107 = vector.extract_strided_slice %96 {offsets = [1, 2, 0], sizes = [8, 8, 64], strides = [1, 1, 1]} : vector<10x10x64xf32> to vector<8x8x64xf32>
    %108 = vector.shape_cast %107 : vector<8x8x64xf32> to vector<64x64xf32>
    %109 = vector.extract_strided_slice %96 {offsets = [2, 0, 0], sizes = [8, 8, 64], strides = [1, 1, 1]} : vector<10x10x64xf32> to vector<8x8x64xf32>
    %110 = vector.shape_cast %109 : vector<8x8x64xf32> to vector<64x64xf32>
    %111 = vector.extract_strided_slice %96 {offsets = [2, 1, 0], sizes = [8, 8, 64], strides = [1, 1, 1]} : vector<10x10x64xf32> to vector<8x8x64xf32>
    %112 = vector.shape_cast %111 : vector<8x8x64xf32> to vector<64x64xf32>
    %113 = vector.extract_strided_slice %96 {offsets = [2, 2, 0], sizes = [8, 8, 64], strides = [1, 1, 1]} : vector<10x10x64xf32> to vector<8x8x64xf32>
    %114 = vector.shape_cast %113 : vector<8x8x64xf32> to vector<64x64xf32>
    %115 = tpu.concatenate %98, %100, %102, %104, %106, %108, %110, %112, %114 in 1 : vector<64x64xf32>, vector<64x64xf32>, vector<64x64xf32>, vector<64x64xf32>, vector<64x64xf32>, vector<64x64xf32>, vector<64x64xf32>, vector<64x64xf32>, vector<64x64xf32> -> vector<64x576xf32>
    %116 = arith.truncf %115 : vector<64x576xf32> to vector<64x576xbf16>
    %c1_54 = arith.constant 1 : index
    %c0_55 = arith.constant 0 : index
    %c0_56 = arith.constant 0 : index
    %117 = vector.load %arg8[%c1_54, %c0_55, %c0_56] : memref<3x576x128xbf16, #tpu.memory_space<vmem>>, vector<1x576x128xbf16>
    %118 = vector.shape_cast %117 : vector<1x576x128xbf16> to vector<576x128xbf16>
    %cst_57 = arith.constant dense<0.000000e+00> : vector<64x128xf32>
    %119 = tpu.matmul %116, %118, %cst_57 {dimension_numbers = #tpu.dot_dimension_numbers<[1], [0], [0], [1], [0, 0, 1, 1], [], []>} : vector<64x576xbf16>, vector<576x128xbf16>, vector<64x128xf32> -> vector<64x128xf32>
    %c1_58 = arith.constant 1 : index
    %c0_59 = arith.constant 0 : index
    %c0_60 = arith.constant 0 : index
    %120 = vector.load %arg9[%c1_58, %c0_59, %c0_60] : memref<3x1x128xf32, #tpu.memory_space<vmem>>, vector<1x1x128xf32>
    %121 = vector.shape_cast %120 : vector<1x1x128xf32> to vector<1x128xf32>
    %122 = vector.broadcast %121 : vector<1x128xf32> to vector<64x128xf32>
    %123 = arith.mulf %119, %122 : vector<64x128xf32>
    %c1_61 = arith.constant 1 : index
    %c0_62 = arith.constant 0 : index
    %c0_63 = arith.constant 0 : index
    %124 = vector.load %arg10[%c1_61, %c0_62, %c0_63] : memref<3x1x128xf32, #tpu.memory_space<vmem>>, vector<1x1x128xf32>
    %125 = vector.shape_cast %124 : vector<1x1x128xf32> to vector<1x128xf32>
    %126 = vector.broadcast %125 : vector<1x128xf32> to vector<64x128xf32>
    %127 = arith.addf %123, %126 : vector<64x128xf32>
    %cst_64 = arith.constant 0.000000e+00 : f32
    %128 = vector.broadcast %cst_64 : f32 to vector<64x128xf32>
    %129 = arith.maximumf %127, %128 : vector<64x128xf32>
    %c0_65 = arith.constant 0 : index
    %c0_66 = arith.constant 0 : index
    %c0_67 = arith.constant 0 : index
    %130 = vector.load %arg3[%c0_65, %c0_66, %c0_67] : memref<1x64x64xf32, #tpu.memory_space<vmem>>, vector<1x64x64xf32>
    %131 = vector.shape_cast %130 : vector<1x64x64xf32> to vector<64x64xf32>
    %cst_68 = arith.constant dense<0.000000e+00> : vector<64xf32>
    %132 = vector.multi_reduction <add>, %131, %cst_68 [0] : vector<64x64xf32> to vector<64xf32>
    %133 = vector.shape_cast %132 : vector<64xf32> to vector<1x64xf32>
    %cst_69 = arith.constant 6.400000e+01 : f32
    %134 = vector.broadcast %cst_69 : f32 to vector<1x64xf32>
    %135 = arith.divf %133, %134 : vector<1x64xf32>
    %c2 = arith.constant 2 : index
    %c0_70 = arith.constant 0 : index
    %c0_71 = arith.constant 0 : index
    %136 = vector.load %arg4[%c2, %c0_70, %c0_71] : memref<3x64x4xf32, #tpu.memory_space<vmem>>, vector<1x64x4xf32>
    %137 = vector.shape_cast %136 : vector<1x64x4xf32> to vector<64x4xf32>
    %cst_72 = arith.constant dense<0.000000e+00> : vector<1x4xf32>
    %138 = tpu.matmul %135, %137, %cst_72 {dimension_numbers = #tpu.dot_dimension_numbers<[1], [0], [0], [1], [0, 0, 1, 1], [], []>} : vector<1x64xf32>, vector<64x4xf32>, vector<1x4xf32> -> vector<1x4xf32>
    %c2_73 = arith.constant 2 : index
    %c0_74 = arith.constant 0 : index
    %c0_75 = arith.constant 0 : index
    %139 = vector.load %arg5[%c2_73, %c0_74, %c0_75] : memref<3x1x4xf32, #tpu.memory_space<vmem>>, vector<1x1x4xf32>
    %140 = vector.shape_cast %139 : vector<1x1x4xf32> to vector<1x4xf32>
    %141 = arith.addf %138, %140 : vector<1x4xf32>
    %cst_76 = arith.constant 0.000000e+00 : f32
    %142 = vector.broadcast %cst_76 : f32 to vector<1x4xf32>
    %143 = arith.maximumf %141, %142 : vector<1x4xf32>
    %c2_77 = arith.constant 2 : index
    %c0_78 = arith.constant 0 : index
    %c0_79 = arith.constant 0 : index
    %144 = vector.load %arg6[%c2_77, %c0_78, %c0_79] : memref<3x4x64xf32, #tpu.memory_space<vmem>>, vector<1x4x64xf32>
    %145 = vector.shape_cast %144 : vector<1x4x64xf32> to vector<4x64xf32>
    %cst_80 = arith.constant dense<0.000000e+00> : vector<1x64xf32>
    %146 = tpu.matmul %143, %145, %cst_80 {dimension_numbers = #tpu.dot_dimension_numbers<[1], [0], [0], [1], [0, 0, 1, 1], [], []>} : vector<1x4xf32>, vector<4x64xf32>, vector<1x64xf32> -> vector<1x64xf32>
    %c2_81 = arith.constant 2 : index
    %c0_82 = arith.constant 0 : index
    %c0_83 = arith.constant 0 : index
    %147 = vector.load %arg7[%c2_81, %c0_82, %c0_83] : memref<3x1x64xf32, #tpu.memory_space<vmem>>, vector<1x1x64xf32>
    %148 = vector.shape_cast %147 : vector<1x1x64xf32> to vector<1x64xf32>
    %149 = arith.addf %146, %148 : vector<1x64xf32>
    %150 = arith.negf %149 : vector<1x64xf32>
    %151 = math.exp %150 : vector<1x64xf32>
    %cst_84 = arith.constant 1.000000e+00 : f32
    %152 = vector.broadcast %cst_84 : f32 to vector<1x64xf32>
    %153 = arith.addf %152, %151 : vector<1x64xf32>
    %154 = arith.divf %152, %153 : vector<1x64xf32>
    %155 = vector.broadcast %154 : vector<1x64xf32> to vector<64x64xf32>
    %156 = arith.mulf %131, %155 : vector<64x64xf32>
    %157 = vector.shape_cast %156 : vector<64x64xf32> to vector<8x8x64xf32>
    %cst_85 = arith.constant 0.000000e+00 : f32
    %158 = vector.broadcast %cst_85 : f32 to vector<8x1x64xf32>
    %cst_86 = arith.constant 0.000000e+00 : f32
    %159 = vector.broadcast %cst_86 : f32 to vector<1x10x64xf32>
    %160 = tpu.concatenate %158, %157, %158 in 1 : vector<8x1x64xf32>, vector<8x8x64xf32>, vector<8x1x64xf32> -> vector<8x10x64xf32>
    %161 = tpu.concatenate %159, %160, %159 in 0 : vector<1x10x64xf32>, vector<8x10x64xf32>, vector<1x10x64xf32> -> vector<10x10x64xf32>
    %162 = vector.extract_strided_slice %161 {offsets = [0, 0, 0], sizes = [8, 8, 64], strides = [1, 1, 1]} : vector<10x10x64xf32> to vector<8x8x64xf32>
    %163 = vector.shape_cast %162 : vector<8x8x64xf32> to vector<64x64xf32>
    %164 = vector.extract_strided_slice %161 {offsets = [0, 1, 0], sizes = [8, 8, 64], strides = [1, 1, 1]} : vector<10x10x64xf32> to vector<8x8x64xf32>
    %165 = vector.shape_cast %164 : vector<8x8x64xf32> to vector<64x64xf32>
    %166 = vector.extract_strided_slice %161 {offsets = [0, 2, 0], sizes = [8, 8, 64], strides = [1, 1, 1]} : vector<10x10x64xf32> to vector<8x8x64xf32>
    %167 = vector.shape_cast %166 : vector<8x8x64xf32> to vector<64x64xf32>
    %168 = vector.extract_strided_slice %161 {offsets = [1, 0, 0], sizes = [8, 8, 64], strides = [1, 1, 1]} : vector<10x10x64xf32> to vector<8x8x64xf32>
    %169 = vector.shape_cast %168 : vector<8x8x64xf32> to vector<64x64xf32>
    %170 = vector.extract_strided_slice %161 {offsets = [1, 1, 0], sizes = [8, 8, 64], strides = [1, 1, 1]} : vector<10x10x64xf32> to vector<8x8x64xf32>
    %171 = vector.shape_cast %170 : vector<8x8x64xf32> to vector<64x64xf32>
    %172 = vector.extract_strided_slice %161 {offsets = [1, 2, 0], sizes = [8, 8, 64], strides = [1, 1, 1]} : vector<10x10x64xf32> to vector<8x8x64xf32>
    %173 = vector.shape_cast %172 : vector<8x8x64xf32> to vector<64x64xf32>
    %174 = vector.extract_strided_slice %161 {offsets = [2, 0, 0], sizes = [8, 8, 64], strides = [1, 1, 1]} : vector<10x10x64xf32> to vector<8x8x64xf32>
    %175 = vector.shape_cast %174 : vector<8x8x64xf32> to vector<64x64xf32>
    %176 = vector.extract_strided_slice %161 {offsets = [2, 1, 0], sizes = [8, 8, 64], strides = [1, 1, 1]} : vector<10x10x64xf32> to vector<8x8x64xf32>
    %177 = vector.shape_cast %176 : vector<8x8x64xf32> to vector<64x64xf32>
    %178 = vector.extract_strided_slice %161 {offsets = [2, 2, 0], sizes = [8, 8, 64], strides = [1, 1, 1]} : vector<10x10x64xf32> to vector<8x8x64xf32>
    %179 = vector.shape_cast %178 : vector<8x8x64xf32> to vector<64x64xf32>
    %180 = tpu.concatenate %163, %165, %167, %169, %171, %173, %175, %177, %179 in 1 : vector<64x64xf32>, vector<64x64xf32>, vector<64x64xf32>, vector<64x64xf32>, vector<64x64xf32>, vector<64x64xf32>, vector<64x64xf32>, vector<64x64xf32>, vector<64x64xf32> -> vector<64x576xf32>
    %181 = arith.truncf %180 : vector<64x576xf32> to vector<64x576xbf16>
    %c2_87 = arith.constant 2 : index
    %c0_88 = arith.constant 0 : index
    %c0_89 = arith.constant 0 : index
    %182 = vector.load %arg8[%c2_87, %c0_88, %c0_89] : memref<3x576x128xbf16, #tpu.memory_space<vmem>>, vector<1x576x128xbf16>
    %183 = vector.shape_cast %182 : vector<1x576x128xbf16> to vector<576x128xbf16>
    %cst_90 = arith.constant dense<0.000000e+00> : vector<64x128xf32>
    %184 = tpu.matmul %181, %183, %cst_90 {dimension_numbers = #tpu.dot_dimension_numbers<[1], [0], [0], [1], [0, 0, 1, 1], [], []>} : vector<64x576xbf16>, vector<576x128xbf16>, vector<64x128xf32> -> vector<64x128xf32>
    %c2_91 = arith.constant 2 : index
    %c0_92 = arith.constant 0 : index
    %c0_93 = arith.constant 0 : index
    %185 = vector.load %arg9[%c2_91, %c0_92, %c0_93] : memref<3x1x128xf32, #tpu.memory_space<vmem>>, vector<1x1x128xf32>
    %186 = vector.shape_cast %185 : vector<1x1x128xf32> to vector<1x128xf32>
    %187 = vector.broadcast %186 : vector<1x128xf32> to vector<64x128xf32>
    %188 = arith.mulf %184, %187 : vector<64x128xf32>
    %c2_94 = arith.constant 2 : index
    %c0_95 = arith.constant 0 : index
    %c0_96 = arith.constant 0 : index
    %189 = vector.load %arg10[%c2_94, %c0_95, %c0_96] : memref<3x1x128xf32, #tpu.memory_space<vmem>>, vector<1x1x128xf32>
    %190 = vector.shape_cast %189 : vector<1x1x128xf32> to vector<1x128xf32>
    %191 = vector.broadcast %190 : vector<1x128xf32> to vector<64x128xf32>
    %192 = arith.addf %188, %191 : vector<64x128xf32>
    %cst_97 = arith.constant 0.000000e+00 : f32
    %193 = vector.broadcast %cst_97 : f32 to vector<64x128xf32>
    %194 = arith.maximumf %192, %193 : vector<64x128xf32>
    %195 = arith.mulf %64, %129 : vector<64x128xf32>
    %196 = arith.addf %195, %64 : vector<64x128xf32>
    %197 = arith.mulf %64, %194 : vector<64x128xf32>
    %198 = arith.addf %197, %194 : vector<64x128xf32>
    %199 = tpu.concatenate %198, %196 in 1 : vector<64x128xf32>, vector<64x128xf32> -> vector<64x256xf32>
    %200 = arith.truncf %199 : vector<64x256xf32> to vector<64x256xbf16>
    %c0_98 = arith.constant 0 : index
    %c0_99 = arith.constant 0 : index
    %201 = vector.load %arg11[%c0_98, %c0_99] : memref<256x64xbf16, #tpu.memory_space<vmem>>, vector<256x64xbf16>
    %cst_100 = arith.constant dense<0.000000e+00> : vector<64x64xf32>
    %202 = tpu.matmul %200, %201, %cst_100 {dimension_numbers = #tpu.dot_dimension_numbers<[1], [0], [0], [1], [0, 0, 1, 1], [], []>} : vector<64x256xbf16>, vector<256x64xbf16>, vector<64x64xf32> -> vector<64x64xf32>
    %c0_101 = arith.constant 0 : index
    %c0_102 = arith.constant 0 : index
    %203 = vector.load %arg12[%c0_101, %c0_102] : memref<1x64xf32, #tpu.memory_space<vmem>>, vector<1x64xf32>
    %204 = vector.broadcast %203 : vector<1x64xf32> to vector<64x64xf32>
    %205 = arith.mulf %202, %204 : vector<64x64xf32>
    %c0_103 = arith.constant 0 : index
    %c0_104 = arith.constant 0 : index
    %206 = vector.load %arg13[%c0_103, %c0_104] : memref<1x64xf32, #tpu.memory_space<vmem>>, vector<1x64xf32>
    %207 = vector.broadcast %206 : vector<1x64xf32> to vector<64x64xf32>
    %208 = arith.addf %205, %207 : vector<64x64xf32>
    %cst_105 = arith.constant 0.000000e+00 : f32
    %209 = vector.broadcast %cst_105 : f32 to vector<64x64xf32>
    %210 = arith.maximumf %208, %209 : vector<64x64xf32>
    %c0_106 = arith.constant 0 : index
    %c0_107 = arith.constant 0 : index
    %c0_108 = arith.constant 0 : index
    %211 = vector.load %arg14[%c0_106, %c0_107, %c0_108] : memref<1x64x64xf32, #tpu.memory_space<vmem>>, vector<1x64x64xf32>
    %212 = vector.shape_cast %211 : vector<1x64x64xf32> to vector<64x64xf32>
    %213 = vector.shape_cast %210 : vector<64x64xf32> to vector<1x64x64xf32>
    tpu.vector_store %arg14[%c0_106, %c0_107, %c0_108], %213 {strides = array<i32>} : memref<1x64x64xf32, #tpu.memory_space<vmem>>, vector<1x64x64xf32>,
    return
  }
  func.func @transform_0(%arg0: i32) -> (i32, i32, i32) {
    %c0_i32 = arith.constant 0 : i32
    %c0_i32_0 = arith.constant 0 : i32
    %c0_i32_1 = arith.constant 0 : i32
    return %arg0, %c0_i32, %c0_i32_0 : i32, i32, i32
  }
  func.func @transform_1(%arg0: i32) -> (i32, i32, i32) {
    %c0_i32 = arith.constant 0 : i32
    %c0_i32_0 = arith.constant 0 : i32
    %c0_i32_1 = arith.constant 0 : i32
    return %arg0, %c0_i32, %c0_i32_0 : i32, i32, i32
  }
  func.func @transform_2(%arg0: i32) -> (i32, i32, i32) {
    %c0_i32 = arith.constant 0 : i32
    %c0_i32_0 = arith.constant 0 : i32
    %c0_i32_1 = arith.constant 0 : i32
    return %arg0, %c0_i32, %c0_i32_0 : i32, i32, i32
  }
  func.func @transform_3(%arg0: i32) -> (i32, i32, i32) {
    %c0_i32 = arith.constant 0 : i32
    %c0_i32_0 = arith.constant 0 : i32
    %c0_i32_1 = arith.constant 0 : i32
    %c0_i32_2 = arith.constant 0 : i32
    return %c0_i32, %c0_i32_0, %c0_i32_1 : i32, i32, i32
  }
  func.func @transform_4(%arg0: i32) -> (i32, i32, i32) {
    %c0_i32 = arith.constant 0 : i32
    %c0_i32_0 = arith.constant 0 : i32
    %c0_i32_1 = arith.constant 0 : i32
    %c0_i32_2 = arith.constant 0 : i32
    return %c0_i32, %c0_i32_0, %c0_i32_1 : i32, i32, i32
  }
  func.func @transform_5(%arg0: i32) -> (i32, i32, i32) {
    %c0_i32 = arith.constant 0 : i32
    %c0_i32_0 = arith.constant 0 : i32
    %c0_i32_1 = arith.constant 0 : i32
    %c0_i32_2 = arith.constant 0 : i32
    return %c0_i32, %c0_i32_0, %c0_i32_1 : i32, i32, i32
  }
  func.func @transform_6(%arg0: i32) -> (i32, i32, i32) {
    %c0_i32 = arith.constant 0 : i32
    %c0_i32_0 = arith.constant 0 : i32
    %c0_i32_1 = arith.constant 0 : i32
    %c0_i32_2 = arith.constant 0 : i32
    return %c0_i32, %c0_i32_0, %c0_i32_1 : i32, i32, i32
  }
  func.func @transform_7(%arg0: i32) -> (i32, i32, i32) {
    %c0_i32 = arith.constant 0 : i32
    %c0_i32_0 = arith.constant 0 : i32
    %c0_i32_1 = arith.constant 0 : i32
    %c0_i32_2 = arith.constant 0 : i32
    return %c0_i32, %c0_i32_0, %c0_i32_1 : i32, i32, i32
  }
  func.func @transform_8(%arg0: i32) -> (i32, i32, i32) {
    %c0_i32 = arith.constant 0 : i32
    %c0_i32_0 = arith.constant 0 : i32
    %c0_i32_1 = arith.constant 0 : i32
    %c0_i32_2 = arith.constant 0 : i32
    return %c0_i32, %c0_i32_0, %c0_i32_1 : i32, i32, i32
  }
  func.func @transform_9(%arg0: i32) -> (i32, i32, i32) {
    %c0_i32 = arith.constant 0 : i32
    %c0_i32_0 = arith.constant 0 : i32
    %c0_i32_1 = arith.constant 0 : i32
    %c0_i32_2 = arith.constant 0 : i32
    return %c0_i32, %c0_i32_0, %c0_i32_1 : i32, i32, i32
  }
  func.func @transform_10(%arg0: i32) -> (i32, i32) {
    %c0_i32 = arith.constant 0 : i32
    %c0_i32_0 = arith.constant 0 : i32
    %c0_i32_1 = arith.constant 0 : i32
    return %c0_i32, %c0_i32_0 : i32, i32
  }
  func.func @transform_11(%arg0: i32) -> (i32, i32) {
    %c0_i32 = arith.constant 0 : i32
    %c0_i32_0 = arith.constant 0 : i32
    %c0_i32_1 = arith.constant 0 : i32
    return %c0_i32, %c0_i32_0 : i32, i32
  }
  func.func @transform_12(%arg0: i32) -> (i32, i32) {
    %c0_i32 = arith.constant 0 : i32
    %c0_i32_0 = arith.constant 0 : i32
    %c0_i32_1 = arith.constant 0 : i32
    return %c0_i32, %c0_i32_0 : i32, i32
  }
  func.func @transform_13(%arg0: i32) -> (i32, i32, i32) {
    %c0_i32 = arith.constant 0 : i32
    %c0_i32_0 = arith.constant 0 : i32
    %c0_i32_1 = arith.constant 0 : i32
    return %arg0, %c0_i32, %c0_i32_0 : i32, i32, i32
  }
}

</mosaic_0001>

<bundles_post_ra>
// kernel: fuse_module_forward.1
= control target key start
LH: loop header
LB: loop body
LE: loop exit
PB: predicated region body
PF: predicated region fallthrough
CT: control target
= control target key end

     0   :  { %s6545_s0 = inlined_call_operand.vmem [shape: f32[2,64,64], index: 0, kind: input, shape index: {}]   ;;  %s6546_s1 = inlined_call_operand.vmem [shape: f32[2,64,64], index: 1, kind: input, shape index: {}]   ;;  %s6547_s2 = inlined_call_operand.vmem [shape: f32[2,64,64], index: 2, kind: input, shape index: {}]   ;;  %s6548_s3 = inlined_call_operand.vmem [shape: f32[3,64,4], index: 3, kind: input, shape index: {}]   ;;  %s6549_s4 = inlined_call_operand.vmem [shape: f32[3,1,4], index: 4, kind: input, shape index: {}]   ;;  %s6550_s5 = inlined_call_operand.vmem [shape: f32[3,4,64], index: 5, kind: input, shape index: {}]   ;;  %s6551_s6 = inlined_call_operand.vmem [shape: f32[3,1,64], index: 6, kind: input, shape index: {}]   ;;  %s6552_s7 = inlined_call_operand.hbm [shape: bf16[3,576,128], index: 7, kind: input, shape index: {}]   ;;  %s6553_s8 = inlined_call_operand.vmem [shape: f32[3,1,128], index: 8, kind: input, shape index: {}]   ;;  %s6554_s9 = inlined_call_operand.vmem [shape: f32[3,1,128], index: 9, kind: input, shape index: {}]   ;;  %s6555_s10 = inlined_call_operand.vmem [shape: bf16[256,64], index: 10, kind: input, shape index: {}]   ;;  %s6556_s11 = inlined_call_operand.vmem [shape: f32[1,64], index: 11, kind: input, shape index: {}]   ;;  %s6557_s12 = inlined_call_operand.hbm [shape: f32[1,64], index: 12, kind: input, shape index: {}]   ;;  %s6558_s13 = inlined_call_operand.hbm [shape: f32[2,64,64], index: 13, kind: output, shape index: {}]  }
   0x1   :  { %6577 = sst [smem:[#allocation21_spill]] %s6558_s13 }
   0x2   :  { %18 = vsyncpa [#allocation3], 0 }
   0x3   :  { %19 = vsyncpa [#allocation6], 0 }
   0x4   :  { %20 = vsyncpa [#allocation4], 0 }
   0x5   :  { %22 = vsyncpa [#allocation4 + $0x1], 0  ;;  %s5173_s25 = smov 0   ;;  %s5175_s26 = smov 0  }
   0x6   :  { %s5177_s27 = smov 0   ;;  %s5179_s28 = smov 0  }
   0x7 LB: > { %6578 = sst [smem:[#allocation11_spill]] %s5077_s25  ;;  %s5194_s29 = sadd.s32 4294967295, %s5089_s28   ;;  %s5089_s28 = sphi %s5179_s28, %s6615_s28   ;;  %s5085_s27 = sphi %s5177_s27, %s6617_s27   ;;  %s5081_s26 = sphi %s5175_s26, %s6619_s26   ;;  %s5077_s25 = sphi %s5173_s25, %s6618_s25  }
   0x8   : > { %6579 = sst [smem:[#allocation12_spill]] %s5085_s27  ;;  %s3865_s30 = sadd.s32 4294967294, %s5089_s28  }
   0x9   : > { %6580 = sst [smem:[#allocation13_spill]] %s5089_s28  ;;  %s5198_s14 = sadd.s32 1, %s5089_s28  }
   0xa   : > { %6581 = sst [smem:[#allocation14_spill]] %s5198_s14  ;;  %s323_s15 = sadd.s32 1, %s5085_s27 }
   0xb   : > { %s320_s16 = ssub.s32 %s5089_s28, %s5198_s14  ;;  %p333_p0 = scmp.ne.s32.totalorder %s5085_s27, %s5081_s26 }
   0xc   : > { %p321_p1 = scmp.eq.s32.totalorder %s320_s16, 0  ;;  %p334_p2 = scmp.eq.s32.totalorder %s5194_s29, 1 }
   0xd   : > { %p339_p3 = scmp.ne.s32.totalorder %s5081_s26, %s5077_s25  ;;  %p340_p4 = scmp.eq.s32.totalorder %s3865_s30, 1 }
   0xe   : > { %s5209_s17 = scalar_select %p321_p1, %s5085_s27, %s323_s15  }
   0xf   : > { %p5211_p5 = por %p334_p2, %p333_p0  ;;  %p5215_p6 = por %p340_p4, %p339_p3 }
  0x10   : > { %6582 = sst [smem:[#allocation15_spill]] %s5209_s17  ;;  %p3866_p7 = scmp.ge.s32.totalorder %s5089_s28, 1 }
  0x11   : > { %s6583_s18 = scalar_select %p5211_p5, 1, 0 }
  0x12   : > { %s6584_s19 = scalar_select %p5215_p6, 1, 0 }
  0x13   : > { %p347_p8 = scmp.lt.s32.totalorder %s5089_s28, 3  ;;  %p6563_p9 = scmp.eq.s32.totalorder %s5194_s29, 0 }
  0x14   : > { %6585 = sst [smem:[#allocation16_spill]] %s6584_s19  ;;  %s5091_s21 = smov [#allocation2]  }
  0x15   : > { %p5222_p10 = pnand %p3866_p7, %p347_p8  ;;  %s371_s22 = sshll.u32 %s5091_s21, 4  ;;  %s372_s22 = int_to_ptr.vmem [resolvable:$true] %s371_s22 }
  0x16   : > { %s5092_s24 = smov [#allocation5]   ;;  %s4963_s17 = scalar_lea.hbm %s6552_s7, 13824 }
  0x17   : > { %s6586_s20 = scalar_select %p5222_p10, 1, 0 }
  0x18   : > { %p4598_p11 = pneg %p5222_p10  ;;  %s397_s30 = sshll.u32 %s5092_s24, 4  ;;  %s5234_s30 = int_to_ptr.vmem [resolvable:$true] %s397_s30 }
  0x19   : > { %p4964_p13 = scmp.ne.s32.totalorder %s6552_s7, %s4963_s17  ;;  %p4970_p3 = scmp.lt.u32.totalorder %s4963_s17, %s6552_s7 }
  0x1a   : > { %p5230_p12 = pnand %p6563_p9, %p4598_p11 }
  0x1c   : > { %p4965_p0 = pneg %p5230_p12 }
  0x1e   : > { %p4966_p1 = pnand %p4965_p0, %p4964_p13 }
  0x20   : > { %p4967_p2 = pneg %p4966_p1 }
  0x22   : > { %p4972_p4 = pnand %p4970_p3, %p4967_p2 }
  0x24   : > { %4975 = shalt.err (!%p4972_p4)
}
  0x25   : > { %s4976_s24 = scalar_lea.vmem %s372_s22, 13824  ;;  %p4984_p9 = scmp.lt.s32.totalorder %s372_s22, %s372_s22 }
  0x26   : > { %p4977_p7 = scmp.ne.s32.totalorder %s372_s22, %s4976_s24  ;;  %p4985_p6 = scmp.lt.s32.totalorder %s4976_s24, %s4976_s24 }
  0x28   : > { %p4979_p8 = pnand %p4977_p7, %p4965_p0  ;;  %p4986_p5 = por %p4985_p6, %p4984_p9 }
  0x2a   : > { %p4980_p11 = pneg %p4979_p8 }
  0x2c   : > { %p4987_p10 = pnand %p4986_p5, %p4980_p11 }
  0x2e   : > { %4990 = shalt.err (!%p4987_p10)
}
  0x2f   : > { %s5093_s27 = smov 64   ;;  %s5094_s15 = smov 4  }
  0x30   : > { %4601 = dma.hbm_to_vmem [thread:$0]  (!%p5230_p12), %s6552_s7, 13824, %s372_s22, [#allocation3], %s5093_s27, %s5093_s27, %s5094_s15  }
  0x31   : > { %s4991_s21 = scalar_lea.hbm %s6557_s12, 16 }
  0x32   : > { %p4992_p13 = scmp.ne.s32.totalorder %s6557_s12, %s4991_s21  ;;  %p4998_p9 = scmp.lt.u32.totalorder %s4991_s21, %s6557_s12 }
  0x34   : > { %p4994_p5 = pnand %p4992_p13, %p4965_p0 }
  0x36   : > { %p4995_p6 = pneg %p4994_p5 }
  0x38   : > { %p5000_p10 = pnand %p4998_p9, %p4995_p6 }
  0x3a   : > { %5003 = shalt.err (!%p5000_p10)
}
  0x3b   : > { %s5004_s22 = scalar_lea.vmem %s5234_s30, 16  ;;  %s5011_s25 = scalar_lea.vmem %s5234_s30, 32 }
  0x3c   : > { %p5005_p1 = scmp.ne.s32.totalorder %s5234_s30, %s5004_s22  ;;  %p5012_p4 = scmp.lt.s32.totalorder %s5234_s30, %s5234_s30 }
  0x3d   : > { %p5013_p7 = scmp.lt.s32.totalorder %s5011_s25, %s5004_s22 }
  0x3e   : > { %p5007_p2 = pnand %p5005_p1, %p4965_p0 }
  0x3f   : > { %p5014_p8 = por %p5013_p7, %p5012_p4 }
  0x40   : > { %p5008_p3 = pneg %p5007_p2 }
  0x42   : > { %p5015_p11 = pnand %p5014_p8, %p5008_p3 }
  0x44   : > { %5018 = shalt.err (!%p5015_p11)
}
  0x45   : > { %4604 = dma.hbm_to_vmem [thread:$0]  (!%p5230_p12), %s6557_s12, 16, %s5234_s30, [#allocation6]  }
  0x46   : > { %p6588_p13 = scmp.ne.s32.totalorder %s6586_s20, 0 }
  0x48   : > { %434 = sbr.rel (%p6588_p13) target bundleno = 2480 (0x9b0), region = 72 }
  0x4f   : > { %p6589_p0 = scmp.eq.s32.totalorder %s5194_s29, 0 }
  0x51   : > { %5064 = dma.done.wait (%p6589_p0), [#allocation3], 13824   ;;  %p6590_p5 = pmov %p6589_p0 }
  0x52   : > { %p6591_p6 = pmov %p6589_p0 }
  0x53   : > { %5066 = vsyncadd (%p6590_p5), [#allocation3], 4294953472 }
  0x54   : > { %5068 = dma.done.wait (%p6591_p6), [#allocation6], 16   ;;  %p6592_p9 = pmov %p6589_p0 }
  0x55   : > { %p492_p10 = scmp.lt.s32.totalorder %s5194_s29, 1  ;;  %v6571_v0 = vmov 0.0|0.0   ;;  %vm5096_vm0 = vmmov 0   ;;  %v6569_v1 = vmov 0.0   ;;  %v540_v2 = vld [vmem:[%s6548_s3] sm:$0xff]  ;;  %v541_v3 = vld [vmem:[%s6548_s3 + $0x8] sm:$0xff] }
  0x56   : > { %5070 = vsyncadd (%p6592_p9), [#allocation6], 4294967280  ;;  %4552 = vmatprep.subr.bf16.mxu0 %v6571_v0  ;;  %4448 = vmatprep.mubr.msk.f32.mxu0 %vm5096_vm0, %v6569_v1  ;;  %v542_v4 = vld [vmem:[%s6548_s3 + $0x10] sm:$0xff]  ;;  %vm516_vm1 = vcmask 523264   ;;  %v4553_v5 = vpack.c.bf16 %v541_v3, %v540_v2  ;;  %v543_v6 = vld [vmem:[%s6548_s3 + $0x18] sm:$0xff]  ;;  %vm629_vm2 = vcmask 1043456  }
  0x57   : > { %s493_s20 = scalar_select %p492_p10, %s5194_s29, 1  ;;  %4451 = vmatprep.subr.mxu1 %v6569_v1  ;;  %4453 = vmatprep.mubr.msk.f32.mxu1 %vm5096_vm0, %v6569_v1  ;;  %v544_v7 = vld [vmem:[%s6548_s3 + $0x20] sm:$0xff]  ;;  %v545_v8 = vld [vmem:[%s6548_s3 + $0x28] sm:$0xff]  ;;  %v4556_v10 = vpack.c.bf16 %v543_v6, %v542_v4  ;;  %v546_v25 = vld [vmem:[%s6548_s3 + $0x30] sm:$0xff]  ;;  %vm625_vm3 = vcmask 31744   ;;  %vm745_vm4 = vcmask 1040384  }
  0x58   : > { %4554 = vmatpush3.bf16.msra.mxu0 %v4553_v5  ;;  %v547_v26 = vld [vmem:[%s6548_s3 + $0x38] sm:$0xff]  ;;  %v4559_v29 = vpack.c.bf16 %v545_v8, %v544_v7  ;;  %v623_v44 = vld [vmem:[%s6550_s5] sm:$0xf]  ;;  %v4829_v52 = vld [vmem:[#allocation2 + $0xc8] sm:$0xff]   ;;  %vm777_vm5 = vcmask 1046528   ;;  %vm801_vm6 = vcmask 1045504  }
  0x59   : > { %s5302_s23 = sshll.u32 %s493_s20, 6  ;;  %4555 = vmatprep.subr.bf16.mxu0 %v6571_v0  ;;  %v4562_v32 = vpack.c.bf16 %v547_v26, %v546_v25  ;;  %4452 = vmatpush3.msk.msra.mxu1 %vm629_vm2, %v623_v44  ;;  %v548_v45 = vld [vmem:[%s6549_s4] sm:$0x1]  ;;  %v4830_v54 = vld [vmem:[#allocation2 + $0x88] sm:$0xff]   ;;  %v4831_v56 = vld [vmem:[#allocation2 + $0xd0] sm:$0xff]   ;;  %s5098_s13 = smov 64  }
  0x5a   : > { %s496_s15 = scalar_lea.vmem %s6545_s0, %s5302_s23  ;;  %v4827_v50 = vld [vmem:[#allocation2 + $0xc0] sm:$0xff]   ;;  %v4839_v57 = vld [vmem:[#allocation2 + $0x48] sm:$0xff]   ;;  %v4843_v59 = vld [vmem:[#allocation2 + $0x50] sm:$0xff]   ;;  %s5550_s30 = scalar_lea.vmem %s6546_s1, %s5302_s23  ;;  %vm5099_vm8 = vmmov 1  }
  0x5b   : > { %v5326_v9 = vld [vmem:[%s496_s15] sm:$0xff]  ;;  %v5328_v11 = vld [vmem:[%s496_s15 + $0x8] sm:$0xff]  ;;  %v5330_v12 = vld [vmem:[%s496_s15 + $0x10] sm:$0xff]  ;;  %s506_s17 = scalar_lea.vmem %s6547_s2, %s5302_s23  ;;  %s489_s16 = sand.u32 1, %s5081_s26  }
  0x5c   : > { %v5332_v13 = vld [vmem:[%s496_s15 + $0x18] sm:$0xff]  ;;  %v517_v14 = vsel %vm516_vm1, %v5326_v9, 0.0  ;;  %v5337_v15 = vld [vmem:[%s496_s15 + $0x20] sm:$0xff]  ;;  %v5339_v16 = vld [vmem:[%s496_s15 + $0x28] sm:$0xff]  ;;  %v518_v18 = vsel %vm516_vm1, %v5328_v11, 0.0  ;;  %v520_v19 = vsel %vm516_vm1, %v5330_v12, 0.0  ;;  %4557 = vmatpush3.bf16.msra.mxu0 %v4556_v10 }
  0x5d   : > { %v5341_v17 = vld [vmem:[%s496_s15 + $0x30] sm:$0xff]  ;;  %v5347_v20 = vld [vmem:[%s496_s15 + $0x38] sm:$0xff]  ;;  %v519_v21 = vadd.f32 %v518_v18, %v517_v14  ;;  %v522_v22 = vsel %vm516_vm1, %v5332_v13, 0.0  ;;  %v524_v23 = vsel %vm516_vm1, %v5337_v15, 0.0  ;;  %v526_v24 = vsel %vm516_vm1, %v5339_v16, 0.0  ;;  %4558 = vmatprep.subr.bf16.mxu0 %v6571_v0  ;;  %v4828_v51 = vld [vmem:[#allocation2 + $0x80] sm:$0xff]  }
  0x5e   : > { %v528_v27 = vsel %vm516_vm1, %v5341_v17, 0.0  ;;  %v530_v28 = vsel %vm516_vm1, %v5347_v20, 0.0  ;;  %v4835_v53 = vld [vmem:[#allocation2 + $0x40] sm:$0xff]   ;;  %v4840_v58 = vld [vmem:[#allocation2 + $0x8] sm:$0xff]   ;;  %v4832_v60 = vld [vmem:[#allocation2 + $0x90] sm:$0xff]   ;;  %s3873_s22 = sshll.u32 %s489_s16, 6 }
  0x5f   : > { %v521_v30 = vadd.f32 %v520_v19, %v519_v21  ;;  %v4836_v55 = vld [vmem:[#allocation2] sm:$0xff]   ;;  %4106 = vmatprep.subr.bf16.mxu1 %v4835_v53  ;;  %v4833_v61 = vld [vmem:[#allocation2 + $0xd8] sm:$0xff]   ;;  %v4844_v62 = vld [vmem:[#allocation2 + $0x10] sm:$0xff]   ;;  %v709_v21 = vlaneseq  ;;  %s6475_s25 = scalar_lea.vmem [#allocation7], %s3873_s22  ;;  %s4094_s28 = sshll.u32 %s5194_s29, 10 }
  0x60   : > { %4560 = vmatpush3.bf16.msra.mxu0 %v4559_v29  ;;  %v4834_v63 = vld [vmem:[#allocation2 + $0x98] sm:$0xff]   ;;  %v4837_v2 = vld [vmem:[#allocation2 + $0xe0] sm:$0xff]   ;;  %v4841_v4 = vld [vmem:[#allocation2 + $0xe8] sm:$0xff]   ;;  %s3757_s20 = sshll.u32 %s6475_s25, 4  ;;  %s6504_s29 = scalar_lea.sflag [#allocation4], %s489_s16  ;;  %s6496_s20 = int_to_ptr.vmem [resolvable:$true] %s3757_s20 }
  0x61   : > { %v523_v31 = vadd.f32 %v522_v22, %v521_v30  ;;  %4561 = vmatprep.subr.bf16.mxu0 %v6571_v0  ;;  %v4838_v3 = vld [vmem:[#allocation2 + $0xa0] sm:$0xff]   ;;  %v4842_v5 = vld [vmem:[#allocation2 + $0xa8] sm:$0xff]   ;;  %v710_v22 = vshrl.u32 %v709_v21, 7  ;;  %vm5655_vm7 = vmneg %vm516_vm1  ;;  %p6610_p1 = scmp.ne.s32.totalorder %s6583_s18, 0  ;;  %s5100_s23 = smov [#allocation7]  }
  0x62   : > { %v624_v6 = vld [vmem:[%s6551_s6] sm:$0x1]  ;;  %vm5671_vm9 = vmpackc.low %vm5099_vm8, %vm5655_vm7  ;;  %s5023_s19 = sshll.u32 %s5100_s23, 4  ;;  %s5024_s19 = int_to_ptr.vmem [resolvable:$false] %s5023_s19 }
  0x63   : > { %v525_v33 = vadd.f32 %v524_v23, %v523_v31  ;;  %v5379_v23 = vsub.s32 0, %v710_v22  ;;  %vm5692_vm10 = vmpackc.low %vm5655_vm7, %vm5099_vm8  ;;  %s5025_s15 = scalar_lea.vmem %s5024_s19, 2048  ;;  %p5026_p4 = scmp.lt.s32.totalorder %s6496_s20, %s5024_s19 }
  0x64   : > { %4563 = vmatpush3.bf16.msra.mxu0 %v4562_v32 }
  0x65   : > { %v527_v34 = vadd.f32 %v526_v24, %v525_v33  ;;  %4146 = vmatprep.subr.bf16.mxu0 %v4827_v50 }
  0x67   : > { %v529_v35 = vadd.f32 %v528_v27, %v527_v34  ;;  %v4845_v34 = vld [vmem:[#allocation2 + $0xf0] sm:$0xff]  }
  0x69   : > { %v531_v36 = vadd.f32 %v530_v28, %v529_v35  ;;  %v4847_v35 = vld [vmem:[#allocation2 + $0x58] sm:$0xff]  }
  0x6b   : > { %v532_v37 = vrot.slane %v531_v36, 4 }
  0x6d   : > { %v533_v38 = vadd.f32 %v532_v37, %v531_v36 }
  0x6f   : > { %v534_v39 = vrot.slane %v533_v38, 2 }
  0x71   : > { %v535_v40 = vadd.f32 %v534_v39, %v533_v38 }
  0x73   : > { %v536_v41 = vrot.slane %v535_v40, 1 }
  0x75   : > { %v537_v42 = vadd.f32 %v536_v41, %v535_v40 }
  0x77   : > { %v539_v43 = vmul.f32 0.015625, %v537_v42 }
  0x79   : > { %4449 = vmatmul.mubr.msk.f32.vlgmr.msra.gmra.mrb[0].mxu0 %vm516_vm1, %v539_v43 }
  0x7a   : > { %4147 = vmatpush3.bf16.msra.mxu0 %v4828_v51 }
  0x7b   : > { %4148 = vmatprep.subr.bf16.mxu0 %v4829_v52 }
  0x7e   : > { %4149 = vmatpush3.bf16.msra.mxu0 %v4830_v54 }
  0x7f   : > { %4150 = vmatprep.subr.bf16.mxu0 %v4831_v56 }
  0x82   : > { %4151 = vmatpush3.bf16.msra.mxu0 %v4832_v60  ;;  %v4851_v60 = vld [vmem:[#allocation2 + $0x60] sm:$0xff]  }
  0x83   : > { %4152 = vmatprep.subr.bf16.mxu0 %v4833_v61 }
  0x86   : > { %4153 = vmatpush3.bf16.msra.mxu0 %v4834_v63 }
  0x87   : > { %4154 = vmatprep.subr.bf16.mxu0 %v4837_v2 }
  0x8a   : > { %4155 = vmatpush3.bf16.msra.mxu0 %v4838_v3  ;;  %v4852_v3 = vld [vmem:[#allocation2 + $0x20] sm:$0xff]  }
  0x8b   : > { %4156 = vmatprep.subr.bf16.mxu0 %v4841_v4 }
  0x8e   : > { %4157 = vmatpush3.bf16.msra.mxu0 %v4842_v5 }
  0x8f   : > { %4158 = vmatprep.subr.bf16.mxu0 %v4845_v34 }
 0x14c   : > { %v618_v46 = vpop.f32.mrb[0].mxu0 }
 0x14d   : > { %v619_v47 = vadd.f32 %v618_v46, %v548_v45  ;;  %v4450_v48 = vpop.f32.mrb[1].mxu0 }
 0x14f   : > { %v622_v49 = vmax.f32 %v619_v47, 0.0 }
 0x151   : > { %4454 = vmatmul.mubr.msk.f32.vlgmr.msra.gmra.mrb[0].mxu1 %vm625_vm3, %v622_v49 }
 0x152   : > { %4107 = vmatpush3.bf16.msra.mxu1 %v4836_v55 }
 0x153   : > { %4108 = vmatprep.subr.bf16.mxu1 %v4839_v57 }
 0x156   : > { %4109 = vmatpush3.bf16.msra.mxu1 %v4840_v58  ;;  %v4849_v58 = vld [vmem:[#allocation2 + $0xf8] sm:$0xff]  }
 0x157   : > { %4110 = vmatprep.subr.bf16.mxu1 %v4843_v59  ;;  %v4850_v59 = vld [vmem:[#allocation2 + $0xb8] sm:$0xff]  }
 0x15a   : > { %4111 = vmatpush3.bf16.msra.mxu1 %v4844_v62 }
 0x15b   : > { %4112 = vmatprep.subr.bf16.mxu1 %v4847_v35 }
 0x224   : > { %v699_v7 = vpop.f32.mrb[0].mxu1 }
 0x225   : > { %v700_v8 = vadd.f32 %v699_v7, %v624_v6  ;;  %v4455_v10 = vpop.f32.mrb[1].mxu1 }
 0x227   : > { %v3883_v14 = vmul.f32 -1.442695, %v700_v8 }
 0x229   : > { %4951 = vpow2.f32 %v3883_v14 }
 0x233   : > { %v4952_v18 = vpop.eup %4951 }
 0x234   : > { %v706_v19 = vadd.f32 1.0, %v4952_v18 }
 0x236   : > { %4953 = vrcp.f32 %v706_v19  ;;  %v4853_v19 = vld [vmem:[#allocation2 + $0x68] sm:$0xff]  }
 0x240   : > { %v4954_v24 = vpop.eup %4953 }
 0x241   : > { %v712_v25 = vrot.slane %v4954_v24, %v5379_v23 }
 0x243   : > { %v716_v26 = vmul.f32 %v712_v25, %v5332_v13  ;;  %v717_v27 = vmul.f32 %v712_v25, %v5337_v15  ;;  %v714_v28 = vmul.f32 %v712_v25, %v5328_v11  ;;  %v715_v29 = vmul.f32 %v712_v25, %v5330_v12  ;;  %v4846_v13 = vld [vmem:[#allocation2 + $0xb0] sm:$0xff]   ;;  %v4848_v12 = vld [vmem:[#allocation2 + $0x18] sm:$0xff]  }
 0x244   : > { %v713_v30 = vmul.f32 %v712_v25, %v5326_v9  ;;  %v5388_v31 = vmul.f32 %v712_v25, %v5339_v16  ;;  %v5391_v32 = vmul.f32 %v712_v25, %v5341_v17  ;;  %v5394_v33 = vmul.f32 %v712_v25, %v5347_v20  ;;  %4159 = vmatpush3.bf16.msra.mxu0 %v4846_v13 }
 0x245   : > { %v732_v15 = vrot.slane %v716_v26, 7  ;;  %v733_v36 = vrot.slane %v717_v27, 7  ;;  %v730_v11 = vrot.slane %v714_v28, 7  ;;  %v731_v37 = vrot.slane %v715_v29, 7  ;;  %4113 = vmatpush3.bf16.msra.mxu1 %v4848_v12  ;;  %4160 = vmatprep.subr.bf16.mxu0 %v4849_v58  ;;  %v4854_v26 = vld [vmem:[#allocation2 + $0x28] sm:$0xff]   ;;  %v4858_v58 = vld [vmem:[#allocation2 + $0x38] sm:$0xff]  }
 0x246   : > { %v729_v38 = vrot.slane %v713_v30, 7  ;;  %v734_v9 = vrot.slane %v5388_v31, 7  ;;  %v735_v16 = vrot.slane %v5391_v32, 7  ;;  %v736_v39 = vrot.slane %v5394_v33, 7  ;;  %4114 = vmatprep.subr.bf16.mxu1 %v4851_v60 }
 0x247   : > { %v5400_v17 = vsel %vm745_vm4, 0.0, %v732_v15  ;;  %v5403_v20 = vsel %vm745_vm4, 0.0, %v733_v36  ;;  %v757_v40 = vsel %vm745_vm4, %v732_v15, 0.0  ;;  %v758_v41 = vsel %vm745_vm4, %v733_v36, 0.0 }
 0x248   : > { %v789_v42 = vrot.slane %v5400_v17, 1  ;;  %v790_v43 = vrot.slane %v757_v40, 1  ;;  %v792_v44 = vrot.slane %v5403_v20, 1  ;;  %v793_v45 = vrot.slane %v758_v41, 1  ;;  %4161 = vmatpush3.bf16.msra.mxu0 %v4850_v59 }
 0x249   : > { %v814_v46 = vrot.slane %v757_v40, 2  ;;  %v817_v47 = vrot.slane %v758_v41, 2  ;;  %v5410_v48 = vsel %vm745_vm4, 0.0, %v730_v11  ;;  %v5413_v49 = vsel %vm745_vm4, 0.0, %v731_v37  ;;  %4115 = vmatpush3.bf16.msra.mxu1 %v4852_v3  ;;  %4564 = vmatprep.subr.bf16.mxu0 %v6571_v0  ;;  %v4855_v40 = vld [vmem:[#allocation2 + $0x70] sm:$0xff]  }
 0x24a   : > { %v5416_v50 = vsel %vm777_vm5, %v789_v42, %v790_v43  ;;  %v5419_v51 = vsel %vm777_vm5, %v792_v44, %v793_v45  ;;  %v755_v52 = vsel %vm745_vm4, %v730_v11, 0.0  ;;  %v756_v53 = vsel %vm745_vm4, %v731_v37, 0.0  ;;  %4116 = vmatprep.subr.bf16.mxu1 %v4853_v19  ;;  %v4856_v41 = vld [vmem:[#allocation2 + $0x30] sm:$0xff]   ;;  %v5543_v19 = vld [vmem:[#allocation2 + $0x100] sm:$0xff]  }
 0x24b   : > { %v4667_v54 = vpack.i.bf16 %v5419_v51, %v5416_v50  ;;  %v783_v55 = vrot.slane %v5410_v48, 1  ;;  %v784_v56 = vrot.slane %v755_v52, 1  ;;  %v786_v57 = vrot.slane %v5413_v49, 1 }
 0x24c   : > { %v787_v61 = vrot.slane %v756_v53, 1  ;;  %v808_v62 = vrot.slane %v755_v52, 2  ;;  %v811_v63 = vrot.slane %v756_v53, 2  ;;  %v810_v2 = vrot.slane %v5413_v49, 2  ;;  %v4857_v52 = vld [vmem:[#allocation2 + $0x78] sm:$0xff]  }
 0x24d   : > { %4668 = vrot.lane.b32.xlu1 %v4667_v54, %s5098_s13  ;;  %v5430_v4 = vsel %vm777_vm5, %v783_v55, %v784_v56  ;;  %v813_v5 = vrot.slane %v5400_v17, 2  ;;  %v5434_v6 = vsel %vm745_vm4, 0.0, %v729_v38  ;;  %v5437_v7 = vsel %vm745_vm4, %v729_v38, 0.0  ;;  %4117 = vmatpush3.bf16.msra.mxu1 %v4854_v26 }
 0x24e   : > { %v5440_v8 = vsel %vm777_vm5, %v786_v57, %v787_v61  ;;  %v5443_v10 = vsel %vm801_vm6, %v810_v2, %v811_v63  ;;  %v804_v14 = vrot.slane %v5434_v6, 2  ;;  %v805_v18 = vrot.slane %v5437_v7, 2  ;;  %4118 = vmatprep.subr.bf16.mxu1 %v4855_v40 }
 0x24f   : > { %v4657_v21 = vpack.i.bf16 %v5440_v8, %v5430_v4  ;;  %v5450_v22 = vsel %vm801_vm6, %v813_v5, %v814_v46  ;;  %v807_v24 = vrot.slane %v5410_v48, 2  ;;  %v5454_v25 = vsel %vm745_vm4, 0.0, %v734_v9 }
 0x250   : > { %v4672_v27 = vpack.i.bf16 %v5450_v22, %v5443_v10  ;;  %v5460_v28 = vsel %vm801_vm6, %v804_v14, %v805_v18  ;;  %v759_v29 = vsel %vm745_vm4, %v734_v9, 0.0  ;;  %v816_v30 = vrot.slane %v5403_v20, 2 }
 0x251   : > { %4658 = vrot.lane.b32.xlu0 %v4657_v21, %s5098_s13  ;;  %v5466_v31 = vsel %vm801_vm6, %v807_v24, %v808_v62  ;;  %v819_v34 = vrot.slane %v5454_v25, 2  ;;  %v820_v13 = vrot.slane %v759_v29, 2  ;;  %v5472_v35 = vsel %vm745_vm4, 0.0, %v735_v16  ;;  %4119 = vmatpush3.bf16.msra.mxu1 %v4856_v41  ;;  %v5553_v21 = vld [vmem:[%s5550_s30] sm:$0xff]  ;;  %v5556_v24 = vld [vmem:[%s5550_s30 + $0x8] sm:$0xff] }
 0x252   : > { %4673 = vrot.lane.b32.xlu1 %v4672_v27, %s5098_s13  ;;  %v5476_v15 = vsel %vm801_vm6, %v816_v30, %v817_v47  ;;  %v760_v36 = vsel %vm745_vm4, %v735_v16, 0.0  ;;  %v795_v11 = vrot.slane %v5454_v25, 1  ;;  %v4662_v37 = vpack.i.bf16 %v5466_v31, %v5460_v28  ;;  %4120 = vmatprep.subr.bf16.mxu1 %v4857_v52  ;;  %v5578_v41 = vld [vmem:[%s5550_s30 + $0x28] sm:$0xff] }
 0x253   : > { %v5485_v12 = vsel %vm801_vm6, %v819_v34, %v820_v13  ;;  %v796_v38 = vrot.slane %v759_v29, 1  ;;  %v798_v9 = vrot.slane %v5472_v35, 1  ;;  %v799_v32 = vrot.slane %v760_v36, 1  ;;  %v5563_v29 = vld [vmem:[%s5550_s30 + $0x10] sm:$0xff]  ;;  %v5568_v13 = vld [vmem:[%s5550_s30 + $0x18] sm:$0xff] }
 0x254   : > { %v4682_v42 = vpack.i.bf16 %v5485_v12, %v5476_v15  ;;  %v5493_v16 = vsel %vm745_vm4, 0.0, %v736_v39  ;;  %v761_v43 = vsel %vm745_vm4, %v736_v39, 0.0  ;;  %v822_v45 = vrot.slane %v5472_v35, 2 }
 0x255   : > { %4663 = vrot.lane.b32.xlu0 %v4662_v37, %s5098_s13  ;;  %v5500_v44 = vsel %vm777_vm5, %v795_v11, %v796_v38  ;;  %v823_v46 = vrot.slane %v760_v36, 2  ;;  %v846_v47 = vrot.slane %v5493_v16, 2  ;;  %v5506_v53 = vsel %vm777_vm5, %v798_v9, %v799_v32  ;;  %4121 = vmatpush3.bf16.msra.mxu1 %v4858_v58  ;;  %v5573_v37 = vld [vmem:[%s5550_s30 + $0x20] sm:$0xff] }
 0x256   : > { %4683 = vrot.lane.b32.xlu1 %v4682_v42, %s5098_s13  ;;  %v847_v33 = vrot.slane %v761_v43, 2  ;;  %v835_v39 = vrot.slane %v5493_v16, 1  ;;  %v836_v54 = vrot.slane %v761_v43, 1  ;;  %v4677_v55 = vpack.i.bf16 %v5506_v53, %v5500_v44  ;;  %4456 = vmatprep.subr.bf16.mxu1 %v5543_v19 }
 0x257   : > { %v5512_v56 = vsel %vm801_vm6, %v822_v45, %v823_v46  ;;  %v778_v57 = vrot.slane %v6569_v1, 1  ;;  %v780_v62 = vrot.slane %v5434_v6, 1  ;;  %v781_v63 = vrot.slane %v5437_v7, 1  ;;  %v5583_v45 = vld [vmem:[%s5550_s30 + $0x30] sm:$0xff] }
 0x258   : > { %v5516_v59 = vsel %vm801_vm6, %v846_v47, %v847_v33  ;;  %v5519_v60 = vsel %vm777_vm5, %v835_v39, %v836_v54  ;;  %v4697_v5 = vpack.i.bf16 %v5410_v48, %v5434_v6  ;;  %v4707_v7 = vpack.i.bf16 %v5454_v25, %v5403_v20 }
 0x259   : > { %4678 = vrot.lane.b32.xlu0 %v4677_v55, %s5098_s13  ;;  %v4692_v61 = vpack.i.bf16 %v5516_v59, %v5512_v56  ;;  %v4687_v2 = vpack.i.bf16 %v778_v57, %v5519_v60  ;;  %v782_v3 = vsel %vm777_vm5, %v780_v62, %v781_v63  ;;  %v4702_v14 = vpack.i.bf16 %v5400_v17, %v5413_v49  ;;  %v3934_v63 = vld [vmem:[%s6548_s3 + $0x40] sm:$0xff] }
 0x25a   : > { %v4712_v18 = vpack.i.bf16 %v5493_v16, %v5472_v35  ;;  %v1508_v26 = vsel %vm516_vm1, %v5553_v21, 0.0  ;;  %v1509_v27 = vsel %vm516_vm1, %v5556_v24, 0.0  ;;  %v1511_v34 = vsel %vm516_vm1, %v5563_v29, 0.0 }
 0x25b   : > { %4693 = vrot.lane.b32.xlu1 %v4692_v61, %s5098_s13  ;;  %v1510_v30 = vadd.f32 %v1509_v27, %v1508_v26  ;;  %v1513_v11 = vsel %vm516_vm1, %v5568_v13, 0.0  ;;  %v1515_v9 = vsel %vm516_vm1, %v5573_v37, 0.0  ;;  %v1517_v32 = vsel %vm516_vm1, %v5578_v41, 0.0 }
 0x25c   : > { %v1519_v58 = vsel %vm516_vm1, %v5583_v45, 0.0 }
 0x25d   : > { %4688 = vrot.lane.b32.xlu0 %v4687_v2, %s5098_s13  ;;  %v1512_v36 = vadd.f32 %v1511_v34, %v1510_v30  ;;  %v3935_v2 = vld [vmem:[%s6548_s3 + $0x48] sm:$0xff] }
 0x25e   : > { %v4565_v34 = vpack.c.bf16 %v3935_v2, %v3934_v63  ;;  %v5641_v2 = vrot.slane %v6569_v1, 2 }
 0x25f   : > { %852 = vrot.lane.b32.xlu1 %v782_v3, %s5098_s13  ;;  %v1514_v38 = vadd.f32 %v1513_v11, %v1512_v36 }
 0x261   : > { %4698 = vrot.lane.b32.xlu0 %v4697_v5, %s5098_s13  ;;  %v1516_v42 = vadd.f32 %v1515_v9, %v1514_v38  ;;  %v5600_v5 = vld [vmem:[%s5550_s30 + $0x38] sm:$0xff]  ;;  %v3936_v9 = vld [vmem:[%s6548_s3 + $0x50] sm:$0xff] }
 0x262   : > { %v1521_v36 = vsel %vm516_vm1, %v5600_v5, 0.0 }
 0x263   : > { %4708 = vrot.lane.b32.xlu1 %v4707_v7, %s5098_s13  ;;  %v1518_v54 = vadd.f32 %v1517_v32, %v1516_v42 }
 0x265   : > { %4703 = vrot.lane.b32.xlu0 %v4702_v14, %s5098_s13  ;;  %v1520_v26 = vadd.f32 %v1519_v58, %v1518_v54 }
 0x269   : > { %4713 = vrot.lane.b32.xlu0 %v4712_v18, %s5098_s13 }
 0x2bf   : > { %v4669_v40 = vpop.permute.xlu1 %4668 }
 0x2c0   : > { %v4671_v33 = vunpack.i.h.bf16 %v4669_v40  ;;  %v4670_v39 = vunpack.i.l.bf16 %v4669_v40 }
 0x2c2   : > { %v930_v18 = vsel %vm516_vm1, %v5403_v20, %v4671_v33  ;;  %v3938_v33 = vld [vmem:[%s6548_s3 + $0x60] sm:$0xff] }
 0x2c3   : > { %v4659_v43 = vpop.permute.xlu0 %4658 }
 0x2c4   : > { %v4661_v46 = vunpack.i.h.bf16 %v4659_v43  ;;  %v4660_v47 = vunpack.i.l.bf16 %v4659_v43  ;;  %v4674_v52 = vpop.permute.xlu1 %4673  ;;  %v1522_v43 = vadd.f32 %v1521_v36, %v1520_v26 }
 0x2c5   : > { %v4676_v20 = vunpack.i.h.bf16 %v4674_v52  ;;  %v4675_v40 = vunpack.i.l.bf16 %v4674_v52  ;;  %v3939_v52 = vld [vmem:[%s6548_s3 + $0x68] sm:$0xff] }
 0x2c6   : > { %v927_v55 = vsel %vm516_vm1, %v5410_v48, %v4660_v47  ;;  %v928_v57 = vsel %vm516_vm1, %v5413_v49, %v4661_v46  ;;  %v929_v49 = vsel %vm516_vm1, %v5400_v17, %v4670_v39  ;;  %v3937_v17 = vld [vmem:[%s6548_s3 + $0x58] sm:$0xff]  ;;  %v4571_v63 = vpack.c.bf16 %v3939_v52, %v3938_v33 }
 0x2c7   : > { %v4664_v61 = vpop.permute.xlu0 %4663  ;;  %v5591_v62 = vpack.c.bf16 %v928_v57, %v927_v55  ;;  %v5620_v42 = vpack.c.bf16 %v930_v18, %v929_v49  ;;  %v4568_v46 = vpack.c.bf16 %v3937_v17, %v3936_v9  ;;  %v943_v39 = vsel %vm516_vm1, %v5440_v8, %v4675_v40 }
 0x2c8   : > { %v4666_v48 = vunpack.i.h.bf16 %v4664_v61  ;;  %v4665_v7 = vunpack.i.l.bf16 %v4664_v61  ;;  %v5602_v14 = vpop.permute.xlu1 %4683  ;;  %v944_v54 = vsel %vm516_vm1, %v5416_v50, %v4676_v20  ;;  %v1523_v61 = vrot.slane %v1522_v43, 4  ;;  %v3940_v50 = vld [vmem:[%s6548_s3 + $0x70] sm:$0xff] }
 0x2c9   : > { %1364 = vmatprep.mubr.bf16.mxu0 %v5591_v62  ;;  %v956_v8 = vpack.c.bf16 %v944_v54, %v943_v39 }
 0x2ca   : > { %v942_v27 = vsel %vm516_vm1, %v5430_v4, %v4666_v48  ;;  %v941_v30 = vsel %vm516_vm1, %v782_v3, %v4665_v7  ;;  %v4685_v48 = vunpack.i.l.bf16 %v5602_v14  ;;  %v1524_v36 = vadd.f32 %v1523_v61, %v1522_v43 }
 0x2cb   : > { %v952_v11 = vpack.c.bf16 %v942_v27, %v941_v30  ;;  %v4679_v38 = vpop.permute.xlu0 %4678 }
 0x2cc   : > { %v4681_v4 = vunpack.i.h.bf16 %v4679_v38  ;;  %v4680_v3 = vunpack.i.l.bf16 %v4679_v38  ;;  %v1525_v52 = vrot.slane %v1524_v36, 2 }
 0x2cd   : > { %1365 = vmatmul.mubr.bf16.vlgmr.msra.gmra.mrb[4].mxu0 %v952_v11  ;;  %v5622_v32 = vpop.permute.xlu1 %4693 }
 0x2ce   : > { %4566 = vmatpush3.bf16.msra.mxu0 %v4565_v34  ;;  %1372 = vmatprep.mubr.bf16.mxu0 %v5620_v42  ;;  %v931_v57 = vsel %vm516_vm1, %v5454_v25, %v4680_v3  ;;  %v932_v58 = vsel %vm516_vm1, %v5472_v35, %v4681_v4  ;;  %v3941_v25 = vld [vmem:[%s6548_s3 + $0x78] sm:$0xff]  ;;  %v4686_v35 = vunpack.i.h.bf16 %v5602_v14  ;;  %v945_v4 = vsel %vm516_vm1, %v5419_v51, %v4685_v48  ;;  %v4861_v48 = vld [vmem:[#allocation2 + $0x110] sm:$0xff]  }
 0x2cf   : > { %v4689_v47 = vpop.permute.xlu0 %4688  ;;  %4567 = vmatprep.subr.bf16.mxu0 %v6571_v0  ;;  %v5652_v26 = vpack.c.bf16 %v932_v58, %v931_v57  ;;  %v4574_v9 = vpack.c.bf16 %v3941_v25, %v3940_v50  ;;  %v4696_v58 = vunpack.i.h.bf16 %v5622_v32  ;;  %v4695_v61 = vunpack.i.l.bf16 %v5622_v32 }
 0x2d0   : > { %v4690_v30 = vunpack.i.l.bf16 %v4689_v47  ;;  %v5661_v11 = vunpack.i.h.bf16 %v4689_v47  ;;  %v4860_v47 = vld [vmem:[#allocation2 + $0x108] sm:$0xff]  }
 0x2d1   : > { %v853_v55 = vpop.permute.xlu1 %852  ;;  %v947_v32 = vsel %vm516_vm1, %v5506_v53, %v4695_v61  ;;  %v948_v25 = vsel %vm516_vm1, %v5519_v60, %v4696_v58 }
 0x2d2   : > { %4569 = vmatpush3.bf16.msra.mxu0 %v4568_v46  ;;  %v926_v34 = vsel %vm516_vm1, %v5434_v6, %v853_v55  ;;  %v946_v46 = vsel %vm516_vm1, %v5500_v44, %v4686_v35  ;;  %v949_v33 = vsel %vm516_vm1, %v5493_v16, %v4690_v30  ;;  %v4862_v35 = vld [vmem:[#allocation2 + $0x118] sm:$0xff]   ;;  %v4933_v6 = vld [vmem:[#allocation2 + $0x350] sm:$0xff]   ;;  %v4935_v16 = vld [vmem:[%s6555_s10 + $0x40] sm:$0xff]  }
 0x2d3   : > { %v4699_v7 = vpop.permute.xlu0 %4698  ;;  %4570 = vmatprep.subr.bf16.mxu0 %v6571_v0  ;;  %v960_v44 = vpack.c.bf16 %v946_v46, %v945_v4 }
 0x2d4   : > { %v4701_v49 = vunpack.i.h.bf16 %v4699_v7  ;;  %v4700_v18 = vunpack.i.l.bf16 %v4699_v7  ;;  %v1526_v7 = vadd.f32 %v1525_v52, %v1524_v36 }
 0x2d5   : > { %1373 = vmatmul.mubr.bf16.gmra.mrb[8].mxu0 %v956_v8  ;;  %v4709_v20 = vpop.permute.xlu1 %4708 }
 0x2d6   : > { %1380 = vmatprep.mubr.bf16.mxu0 %v5652_v26  ;;  %v933_v14 = vsel %vm516_vm1, %v5641_v2, %v4700_v18  ;;  %v934_v38 = vsel %vm516_vm1, %v5460_v28, %v4701_v49  ;;  %4572 = vmatpush3.bf16.msra.mxu0 %v4571_v63  ;;  %v3922_v28 = vpack.c.bf16 %v926_v34, %v5661_v11  ;;  %v4711_v39 = vunpack.i.h.bf16 %v4709_v20 }
 0x2d7   : > { %v4704_v17 = vpop.permute.xlu0 %4703  ;;  %v951_v40 = vpack.c.bf16 %v934_v38, %v933_v14  ;;  %4573 = vmatprep.subr.bf16.mxu0 %v6571_v0  ;;  %v4710_v54 = vunpack.i.l.bf16 %v4709_v20  ;;  %v3926_v63 = vpack.c.bf16 %v5661_v11, %v949_v33  ;;  %v1527_v18 = vrot.slane %v1526_v7, 1 }
 0x2d8   : > { %v4706_v3 = vunpack.i.h.bf16 %v4704_v17  ;;  %v4705_v43 = vunpack.i.l.bf16 %v4704_v17  ;;  %v964_v34 = vpack.c.bf16 %v948_v25, %v947_v32  ;;  %v962_v17 = vpack.c.bf16 %v5512_v56, %v5485_v12 }
 0x2d9   : > { %1299 = vmatprep.mubr.bf16.mxu1 %v951_v40  ;;  %v937_v8 = vsel %vm516_vm1, %v5450_v22, %v4710_v54  ;;  %v1528_v36 = vadd.f32 %v1527_v18, %v1526_v7 }
 0x2da   : > { %3923 = vmatmul.mubr.msk.bf16.vlgmr.msra.gmra.mrb[4].mxu1 %vm5671_vm9, %v3922_v28  ;;  %v935_v51 = vsel %vm516_vm1, %v5466_v31, %v4705_v43  ;;  %v936_v55 = vsel %vm516_vm1, %v5443_v10, %v4706_v3  ;;  %4575 = vmatpush3.bf16.msra.mxu0 %v4574_v9  ;;  %v958_v9 = vpack.c.bf16 %v5476_v15, %v5450_v22 }
 0x2db   : > { %v955_v57 = vpack.c.bf16 %v936_v55, %v935_v51  ;;  %4457 = vmatpush3.bf16.msra.mxu1 %v5543_v19  ;;  %4491 = vmatprep.subr.mxu0 %v6569_v1  ;;  %v938_v19 = vsel %vm516_vm1, %v5476_v15, %v4711_v39  ;;  %v4714_v50 = vpop.permute.xlu0 %4713  ;;  %v1529_v38 = vmul.f32 0.015625, %v1528_v36 }
 0x2dc   : > { %4458 = vmatprep.subr.bf16.mxu1 %v4860_v47  ;;  %v959_v49 = vpack.c.bf16 %v938_v19, %v937_v8  ;;  %v4716_v27 = vunpack.i.h.bf16 %v4714_v50  ;;  %v4715_v30 = vunpack.i.l.bf16 %v4714_v50 }
 0x2dd   : > { %1307 = vmatprep.mubr.bf16.mxu1 %v955_v57  ;;  %1381 = vmatmul.mubr.bf16.gmra.mrb[12].mxu0 %v960_v44 }
 0x2de   : > { %3927 = vmatprep.mubr.msk.bf16.mxu0 %vm5692_vm10, %v3926_v63  ;;  %v939_v53 = vsel %vm516_vm1, %v5485_v12, %v4715_v30  ;;  %v940_v60 = vsel %vm516_vm1, %v5512_v56, %v4716_v27 }
 0x2df   : > { %4459 = vmatpush3.bf16.msra.mxu1 %v4860_v47  ;;  %v963_v14 = vpack.c.bf16 %v940_v60, %v939_v53 }
 0x2e0   : > { %4460 = vmatprep.subr.bf16.mxu1 %v4861_v48 }
 0x2e2   : > { %1308 = vmatmul.mubr.bf16.gmra.mrb[8].mxu1 %v5591_v62  ;;  %v954_v62 = vpack.c.bf16 %v5443_v10, %v5466_v31  ;;  %v3944_v10 = vld [vmem:[%s6550_s5 + $0x4] sm:$0xf] }
 0x2e3   : > { %1315 = vmatprep.mubr.bf16.mxu1 %v959_v49  ;;  %4461 = vmatpush3.bf16.msra.mxu1 %v4861_v48 }
 0x2e4   : > { %4462 = vmatprep.subr.bf16.mxu1 %v4862_v35 }
 0x2e5   : > { %1389 = vmatmul.mubr.bf16.gmra.mrb[16].mxu0 %v964_v34 }
 0x2e6   : > { %4488 = vmatprep.mubr.msk.f32.mxu0 %vm5096_vm0, %v6569_v1 }
 0x2e7   : > { %4463 = vmatpush3.bf16.msra.mxu1 %v4862_v35 }
 0x2ea   : > { %1316 = vmatmul.mubr.bf16.gmra.mrb[12].mxu1 %v5620_v42  ;;  %v966_v42 = vpack.c.bf16 %v5641_v2, %v5516_v59 }
 0x2eb   : > { %1323 = vmatprep.mubr.bf16.mxu1 %v963_v14  ;;  %v3942_v14 = vld [vmem:[%s6549_s4 + $0x1] sm:$0x1] }
 0x2ed   : > { %4489 = vmatmul.mubr.msk.f32.vlgmr.msra.gmra.mrb[2].mxu0 %vm516_vm1, %v1529_v38 }
 0x2ee   : > { %4493 = vmatprep.mubr.msk.f32.mxu0 %vm5096_vm0, %v6569_v1  ;;  %4492 = vmatpush3.msk.msra.mxu0 %vm629_vm2, %v3944_v10 }
 0x2f2   : > { %1324 = vmatmul.mubr.bf16.gmra.mrb[16].mxu1 %v5652_v26 }
 0x2f3   : > { %4464 = vmatprep.mubr.msk.bf16.mxu1 %vm516_vm1, %v954_v62 }
 0x2fa   : > { %4465 = vmatmul.mubr.msk.bf16.vlgmr.msra.gmra.mrb[20].mxu1 %vm516_vm1, %v958_v9 }
 0x2fb   : > { %4468 = vmatprep.mubr.msk.bf16.mxu1 %vm516_vm1, %v962_v17 }
 0x302   : > { %4469 = vmatmul.mubr.msk.bf16.gmra.mrb[24].mxu1 %vm516_vm1, %v966_v42 }
 0x3a0   : > { %v4162_v31 = vpop.f32.mrb[4].mxu0 }
 0x3a1   : > { %v4163_v22 = vpop.f32.mrb[5].mxu0 }
 0x3a2   : > { %v4164_v15 = vadd.f32 %v4163_v22, %v4162_v31  ;;  %v4165_v26 = vpop.f32.mrb[6].mxu0 }
 0x3a3   : > { %v4166_v12 = vpop.f32.mrb[7].mxu0 }
 0x3a4   : > { %v4167_v56 = vadd.f32 %v4166_v12, %v4165_v26 }
 0x3a8   : > { %v4168_v20 = vpop.f32.mrb[8].mxu0 }
 0x3a9   : > { %v4169_v40 = vpop.f32.mrb[9].mxu0 }
 0x3aa   : > { %v4170_v4 = vadd.f32 %v4169_v40, %v4168_v20  ;;  %v4171_v28 = vpop.f32.mrb[10].mxu0 }
 0x3ab   : > { %v4172_v3 = vpop.f32.mrb[11].mxu0 }
 0x3ac   : > { %v4173_v59 = vadd.f32 %v4172_v3, %v4171_v28 }
 0x3ad   : > { %v4122_v43 = vpop.f32.mrb[4].mxu1 }
 0x3ae   : > { %v4123_v46 = vpop.f32.mrb[5].mxu1 }
 0x3af   : > { %v4124_v47 = vadd.f32 %v4123_v46, %v4122_v43  ;;  %v4125_v33 = vpop.f32.mrb[6].mxu1  ;;  %v5746_v46 = vld [vmem:[%s6553_s8] ss:$0 sm:$0xff] }
 0x3b0   : > { %v4126_v52 = vpop.f32.mrb[7].mxu1  ;;  %v4174_v39 = vpop.f32.mrb[12].mxu0 }
 0x3b1   : > { %v4127_v54 = vadd.f32 %v4126_v52, %v4125_v33  ;;  %v4175_v51 = vpop.f32.mrb[13].mxu0  ;;  %v1367_v55 = vadd.f32 %v4164_v15, %v4124_v47  ;;  %v5751_v52 = vld [vmem:[%s6554_s9] ss:$0 sm:$0xff] }
 0x3b2   : > { %v4176_v57 = vadd.f32 %v4175_v51, %v4174_v39  ;;  %v4177_v44 = vpop.f32.mrb[14].mxu0 }
 0x3b3   : > { %v4178_v58 = vpop.f32.mrb[15].mxu0  ;;  %v1370_v61 = vadd.f32 %v4167_v56, %v4127_v54 }
 0x3b4   : > { %v4179_v63 = vadd.f32 %v4178_v58, %v4177_v44 }
 0x3b5   : > { %v4128_v48 = vpop.f32.mrb[8].mxu1 }
 0x3b6   : > { %v4129_v7 = vpop.f32.mrb[9].mxu1 }
 0x3b7   : > { %v4130_v8 = vadd.f32 %v4129_v7, %v4128_v48  ;;  %v4131_v19 = vpop.f32.mrb[10].mxu1 }
 0x3b8   : > { %v4132_v50 = vpop.f32.mrb[11].mxu1  ;;  %v4180_v32 = vpop.f32.mrb[16].mxu0 }
 0x3b9   : > { %v4133_v25 = vadd.f32 %v4132_v50, %v4131_v19  ;;  %v4181_v35 = vpop.f32.mrb[17].mxu0  ;;  %v1375_v49 = vadd.f32 %v4170_v4, %v4130_v8 }
 0x3ba   : > { %v4182_v18 = vadd.f32 %v4181_v35, %v4180_v32  ;;  %v4183_v27 = vpop.f32.mrb[18].mxu0 }
 0x3bb   : > { %v4184_v30 = vpop.f32.mrb[19].mxu0  ;;  %v1378_v34 = vadd.f32 %v4173_v59, %v4133_v25 }
 0x3bc   : > { %v4185_v36 = vadd.f32 %v4184_v30, %v4183_v27 }
 0x3bd   : > { %v4134_v53 = vpop.f32.mrb[12].mxu1 }
 0x3be   : > { %v4135_v60 = vpop.f32.mrb[13].mxu1 }
 0x3bf   : > { %v4136_v38 = vadd.f32 %v4135_v60, %v4134_v53  ;;  %v4137_v62 = vpop.f32.mrb[14].mxu1 }
 0x3c0   : > { %v4138_v9 = vpop.f32.mrb[15].mxu1  ;;  %v1610_v17 = vpop.f32.mrb[2].mxu0 }
 0x3c1   : > { %v4139_v42 = vadd.f32 %v4138_v9, %v4137_v62  ;;  %v1611_v10 = vadd.f32 %v3942_v14, %v1610_v17  ;;  %v4490_v31 = vpop.f32.mrb[3].mxu0  ;;  %v1383_v22 = vadd.f32 %v4176_v57, %v4136_v38  ;;  %v4863_v14 = vld [vmem:[#allocation2 + $0x1e0] sm:$0xff]   ;;  %v4865_v62 = vld [vmem:[#allocation2 + $0x1e8] sm:$0xff]  }
 0x3c2   : > { %v4864_v38 = vld [vmem:[#allocation2 + $0x1a0] sm:$0xff]   ;;  %4245 = vmatprep.subr.bf16.mxu1 %v4863_v14  ;;  %v4866_v9 = vld [vmem:[#allocation2 + $0x1a8] sm:$0xff]  }
 0x3c3   : > { %v1614_v15 = vmax.f32 %v1611_v10, 0.0  ;;  %v1386_v26 = vadd.f32 %v4179_v63, %v4139_v42  ;;  %4246 = vmatpush3.bf16.msra.mxu1 %v4864_v38  ;;  %v4872_v17 = vld [vmem:[#allocation2 + $0x160] sm:$0xff]   ;;  %v4867_v10 = vld [vmem:[#allocation2 + $0x1f0] sm:$0xff]   ;;  %v4876_v31 = vld [vmem:[#allocation2 + $0x168] sm:$0xff]  }
 0x3c4   : > { %v4874_v42 = vld [vmem:[#allocation2 + $0x120] sm:$0xff]   ;;  %4247 = vmatprep.subr.bf16.mxu1 %v4865_v62  ;;  %4205 = vmatprep.subr.bf16.mxu0 %v4872_v17  ;;  %v4884_v38 = vld [vmem:[#allocation2 + $0x178] sm:$0xff]  }
 0x3c5   : > { %v4140_v12 = vpop.f32.mrb[16].mxu1  ;;  %4494 = vmatmul.mubr.msk.f32.vlgmr.msra.gmra.mrb[20].mxu0 %vm625_vm3, %v1614_v15  ;;  %v4868_v15 = vld [vmem:[#allocation2 + $0x1b0] sm:$0xff]   ;;  %v4885_v62 = vld [vmem:[#allocation2 + $0x1d8] sm:$0xff]  }
 0x3c6   : > { %v4141_v56 = vpop.f32.mrb[17].mxu1  ;;  %4206 = vmatpush3.bf16.msra.mxu0 %v4874_v42 }
 0x3c7   : > { %v4142_v20 = vadd.f32 %v4141_v56, %v4140_v12  ;;  %v4143_v40 = vpop.f32.mrb[18].mxu1  ;;  %4248 = vmatpush3.bf16.msra.mxu1 %v4866_v9  ;;  %4207 = vmatprep.subr.bf16.mxu0 %v4876_v31  ;;  %v4869_v12 = vld [vmem:[#allocation2 + $0x1f8] sm:$0xff]   ;;  %v4882_v56 = vld [vmem:[#allocation2 + $0x130] sm:$0xff]  }
 0x3c8   : > { %v4144_v4 = vpop.f32.mrb[19].mxu1  ;;  %4249 = vmatprep.subr.bf16.mxu1 %v4867_v10  ;;  %v4886_v9 = vld [vmem:[#allocation2 + $0x138] sm:$0xff]   ;;  %v4887_v10 = vld [vmem:[#allocation2 + $0x180] sm:$0xff]  }
 0x3c9   : > { %v4145_v28 = vadd.f32 %v4144_v4, %v4143_v40  ;;  %v1391_v3 = vadd.f32 %v4182_v18, %v4142_v20  ;;  %v4870_v20 = vld [vmem:[#allocation2 + $0x1b8] sm:$0xff]   ;;  %v4871_v40 = vld [vmem:[#allocation2 + $0x200] sm:$0xff]  }
 0x3ca   : > { %v4873_v4 = vld [vmem:[#allocation2 + $0x1c0] sm:$0xff]  }
 0x3cb   : > { %v1394_v59 = vadd.f32 %v4185_v36, %v4145_v28  ;;  %4250 = vmatpush3.bf16.msra.mxu1 %v4868_v15  ;;  %v4875_v28 = vld [vmem:[#allocation2 + $0x208] sm:$0xff]  }
 0x3cc   : > { %4251 = vmatprep.subr.bf16.mxu1 %v4869_v12  ;;  %v4888_v12 = vld [vmem:[#allocation2 + $0x140] sm:$0xff]  }
 0x3cd   : > { %v4466_v43 = vpop.f32.mrb[20].mxu1 }
 0x3ce   : > { %v1440_v47 = vadd.f32 %v4466_v43, %v1375_v49  ;;  %v1431_v33 = vpop.f32.mrb[21].mxu1  ;;  %v4881_v43 = vld [vmem:[#allocation2 + $0x1d0] sm:$0xff]  }
 0x3cf   : > { %v5753_v39 = vadd.f32 %v1431_v33, %v1367_v55  ;;  %v4467_v54 = vpop.f32.mrb[22].mxu1  ;;  %4252 = vmatpush3.bf16.msra.mxu1 %v4870_v20 }
 0x3d0   : > { %v1471_v51 = vmul.f32 %v5746_v46, %v1440_v47  ;;  %v1443_v57 = vadd.f32 %v4467_v54, %v1378_v34  ;;  %v1434_v44 = vpop.f32.mrb[23].mxu1  ;;  %4253 = vmatprep.subr.bf16.mxu1 %v4871_v40  ;;  %v3945_v47 = vld [vmem:[%s6551_s6 + $0x1] sm:$0x1] }
 0x3d1   : > { %v5756_v58 = vadd.f32 %v1434_v44, %v1370_v61 }
 0x3d2   : > { %v5759_v63 = vadd.f32 %v5751_v52, %v1471_v51  ;;  %v1472_v48 = vmul.f32 %v5746_v46, %v1443_v57 }
 0x3d3   : > { %4254 = vmatpush3.bf16.msra.mxu1 %v4873_v4 }
 0x3d4   : > { %v5763_v7 = vadd.f32 %v5751_v52, %v1472_v48  ;;  %4255 = vmatprep.subr.bf16.mxu1 %v4875_v28 }
 0x3d5   : > { %v4470_v8 = vpop.f32.mrb[24].mxu1 }
 0x3d6   : > { %v1456_v19 = vadd.f32 %v4470_v8, %v1391_v3  ;;  %v1447_v50 = vpop.f32.mrb[25].mxu1  ;;  %v4877_v3 = vld [vmem:[#allocation2 + $0x1c8] sm:$0xff]  }
 0x3d7   : > { %v1448_v55 = vadd.f32 %v1447_v50, %v1383_v22  ;;  %v4471_v32 = vpop.f32.mrb[26].mxu1  ;;  %v4878_v22 = vld [vmem:[#allocation2 + $0x128] sm:$0xff]   ;;  %4256 = vmatpush3.bf16.msra.mxu1 %v4877_v3 }
 0x3d8   : > { %v1475_v25 = vmul.f32 %v5746_v46, %v1456_v19  ;;  %v1459_v35 = vadd.f32 %v4471_v32, %v1394_v59  ;;  %v1450_v49 = vpop.f32.mrb[27].mxu1  ;;  %4208 = vmatpush3.bf16.msra.mxu0 %v4878_v22  ;;  %v4879_v59 = vld [vmem:[#allocation2 + $0x210] sm:$0xff]  }
 0x3d9   : > { %v1473_v61 = vmul.f32 %v5746_v46, %v1448_v55  ;;  %v1451_v18 = vadd.f32 %v1450_v49, %v1386_v26  ;;  %v4880_v26 = vld [vmem:[#allocation2 + $0x170] sm:$0xff]   ;;  %4257 = vmatprep.subr.bf16.mxu1 %v4879_v59 }
 0x3da   : > { %v5768_v27 = vadd.f32 %v5751_v52, %v1475_v25  ;;  %v1476_v30 = vmul.f32 %v5746_v46, %v1459_v35  ;;  %4209 = vmatprep.subr.bf16.mxu0 %v4880_v26 }
 0x3db   : > { %v5772_v34 = vadd.f32 %v5751_v52, %v1473_v61  ;;  %v1474_v36 = vmul.f32 %v5746_v46, %v1451_v18  ;;  %4258 = vmatpush3.bf16.msra.mxu1 %v4881_v43 }
 0x3dc   : > { %v5776_v53 = vadd.f32 %v5751_v52, %v1476_v30  ;;  %4210 = vmatpush3.bf16.msra.mxu0 %v4882_v56 }
 0x3dd   : > { %v5779_v60 = vadd.f32 %v5751_v52, %v1474_v36  ;;  %4211 = vmatprep.subr.bf16.mxu0 %v4884_v38 }
 0x3e0   : > { %4212 = vmatpush3.bf16.msra.mxu0 %v4886_v9 }
 0x3e1   : > { %4213 = vmatprep.subr.bf16.mxu0 %v4887_v10 }
 0x3e4   : > { %4214 = vmatpush3.bf16.msra.mxu0 %v4888_v12 }
 0x498   : > { %v1691_v33 = vpop.f32.mrb[20].mxu0 }
 0x499   : > { %v1692_v54 = vadd.f32 %v3945_v47, %v1691_v33  ;;  %v4495_v51 = vpop.f32.mrb[21].mxu0 }
 0x49b   : > { %v3948_v57 = vmul.f32 -1.442695, %v1692_v54 }
 0x49d   : > { %4955 = vpow2.f32 %v3948_v57  ;;  %v4889_v57 = vld [vmem:[#allocation2 + $0x188] sm:$0xff]  }
 0x49e   : > { %4215 = vmatprep.subr.bf16.mxu0 %v4889_v57 }
 0x4a7   : > { %v4956_v44 = vpop.eup %4955 }
 0x4a8   : > { %v1698_v48 = vadd.f32 1.0, %v4956_v44 }
 0x4aa   : > { %4957 = vrcp.f32 %v1698_v48 }
 0x4b4   : > { %v4958_v8 = vpop.eup %4957 }
 0x4b5   : > { %v1704_v19 = vrot.slane %v4958_v8, %v5379_v23 }
 0x4b7   : > { %v1706_v50 = vmul.f32 %v1704_v19, %v5556_v24  ;;  %v1707_v55 = vmul.f32 %v1704_v19, %v5563_v29  ;;  %v1705_v32 = vmul.f32 %v1704_v19, %v5553_v21  ;;  %v1708_v25 = vmul.f32 %v1704_v19, %v5568_v13  ;;  %v4883_v29 = vld [vmem:[#allocation2 + $0x218] sm:$0xff]  }
 0x4b8   : > { %v1709_v35 = vmul.f32 %v1704_v19, %v5573_v37  ;;  %v5791_v49 = vmul.f32 %v1704_v19, %v5578_v41  ;;  %v5794_v61 = vmul.f32 %v1704_v19, %v5583_v45  ;;  %v5797_v18 = vmul.f32 %v1704_v19, %v5600_v5  ;;  %4259 = vmatprep.subr.bf16.mxu1 %v4883_v29 }
 0x4b9   : > { %v1722_v30 = vrot.slane %v1706_v50, 7  ;;  %v1723_v36 = vrot.slane %v1707_v55, 7  ;;  %v1721_v24 = vrot.slane %v1705_v32, 7  ;;  %v1724_v14 = vrot.slane %v1708_v25, 7  ;;  %4260 = vmatpush3.bf16.msra.mxu1 %v4885_v62  ;;  %v4890_v50 = vld [vmem:[#allocation2 + $0x148] sm:$0xff]  }
 0x4ba   : > { %v1725_v21 = vrot.slane %v1709_v35, 7  ;;  %v1726_v13 = vrot.slane %v5791_v49, 7  ;;  %v1727_v37 = vrot.slane %v5794_v61, 7  ;;  %v1728_v41 = vrot.slane %v5797_v18, 7  ;;  %4576 = vmatprep.subr.bf16.mxu1 %v6571_v0  ;;  %4216 = vmatpush3.bf16.msra.mxu0 %v4890_v50  ;;  %v4893_v50 = vld [vmem:[#allocation2 + $0x198] sm:$0xff]  }
 0x4bb   : > { %v5803_v45 = vsel %vm745_vm4, 0.0, %v1722_v30  ;;  %v5806_v5 = vsel %vm745_vm4, 0.0, %v1723_v36  ;;  %v1746_v17 = vsel %vm745_vm4, %v1722_v30, 0.0  ;;  %v1747_v42 = vsel %vm745_vm4, %v1723_v36, 0.0 }
 0x4bc   : > { %v1770_v31 = vrot.slane %v5803_v45, 1  ;;  %v1771_v22 = vrot.slane %v1746_v17, 1  ;;  %v1773_v15 = vrot.slane %v5806_v5, 1  ;;  %v1774_v26 = vrot.slane %v1747_v42, 1 }
 0x4bd   : > { %v5813_v56 = vsel %vm745_vm4, 0.0, %v1721_v24  ;;  %v5816_v20 = vsel %vm745_vm4, %v1721_v24, 0.0  ;;  %v1791_v40 = vrot.slane %v5803_v45, 2  ;;  %v1792_v4 = vrot.slane %v1746_v17, 2 }
 0x4be   : > { %v5821_v28 = vsel %vm777_vm5, %v1770_v31, %v1771_v22  ;;  %v5824_v3 = vsel %vm777_vm5, %v1773_v15, %v1774_v26  ;;  %v1788_v59 = vrot.slane %v5813_v56, 2  ;;  %v1789_v43 = vrot.slane %v5816_v20, 2  ;;  %v4891_v15 = vld [vmem:[#allocation2 + $0x190] sm:$0xff]  }
 0x4bf   : > { %v4717_v47 = vpack.i.bf16 %v5824_v3, %v5821_v28  ;;  %v5831_v33 = vsel %vm801_vm6, %v1791_v40, %v1792_v4  ;;  %v5834_v54 = vsel %vm745_vm4, 0.0, %v1724_v14  ;;  %v5837_v51 = vsel %vm745_vm4, 0.0, %v1725_v21  ;;  %4217 = vmatprep.subr.bf16.mxu0 %v4891_v15 }
 0x4c0   : > { %v5840_v44 = vsel %vm801_vm6, %v1788_v59, %v1789_v43  ;;  %v1748_v48 = vsel %vm745_vm4, %v1724_v14, 0.0  ;;  %v1749_v8 = vsel %vm745_vm4, %v1725_v21, 0.0  ;;  %v1776_v19 = vrot.slane %v5834_v54, 1  ;;  %v4892_v59 = vld [vmem:[#allocation2 + $0x150] sm:$0xff]  }
 0x4c1   : > { %4718 = vrot.lane.b32.xlu1 %v4717_v47, %s5098_s13  ;;  %v4722_v55 = vpack.i.bf16 %v5831_v33, %v5840_v44  ;;  %v1777_v32 = vrot.slane %v1748_v48, 1  ;;  %v1779_v25 = vrot.slane %v5837_v51, 1  ;;  %v1780_v35 = vrot.slane %v1749_v8, 1  ;;  %4218 = vmatpush3.bf16.msra.mxu0 %v4892_v59  ;;  %v5950_v59 = vld [vmem:[%s506_s17 + $0x8] sm:$0xff] }
 0x4c2   : > { %v1794_v49 = vrot.slane %v5806_v5, 2  ;;  %v1795_v61 = vrot.slane %v1747_v42, 2  ;;  %v1797_v30 = vrot.slane %v5834_v54, 2  ;;  %v1798_v36 = vrot.slane %v1748_v48, 2  ;;  %4219 = vmatprep.subr.bf16.mxu0 %v4893_v50 }
 0x4c3   : > { %4723 = vrot.lane.b32.xlu0 %v4722_v55, %s5098_s13  ;;  %v5853_v24 = vsel %vm777_vm5, %v1776_v19, %v1777_v32  ;;  %v5856_v14 = vsel %vm777_vm5, %v1779_v25, %v1780_v35  ;;  %v5859_v29 = vsel %vm745_vm4, 0.0, %v1726_v13  ;;  %v5862_v38 = vsel %vm745_vm4, 0.0, %v1727_v37  ;;  %v4894_v55 = vld [vmem:[#allocation2 + $0x158] sm:$0xff]  }
 0x4c4   : > { %v4727_v21 = vpack.i.bf16 %v5856_v14, %v5853_v24  ;;  %v5867_v62 = vsel %vm801_vm6, %v1794_v49, %v1795_v61  ;;  %v5870_v9 = vsel %vm801_vm6, %v1797_v30, %v1798_v36  ;;  %v1750_v17 = vsel %vm745_vm4, %v1726_v13, 0.0 }
 0x4c5   : > { %v4732_v42 = vpack.i.bf16 %v5870_v9, %v5867_v62  ;;  %v1751_v10 = vsel %vm745_vm4, %v1727_v37, 0.0  ;;  %v1782_v31 = vrot.slane %v5859_v29, 1  ;;  %v1783_v22 = vrot.slane %v1750_v17, 1  ;;  %4220 = vmatpush3.bf16.msra.mxu0 %v4894_v55  ;;  %v5960_v55 = vld [vmem:[%s506_s17 + $0x18] sm:$0xff] }
 0x4c6   : > { %4728 = vrot.lane.b32.xlu1 %v4727_v21, %s5098_s13  ;;  %v1785_v26 = vrot.slane %v5862_v38, 1  ;;  %v1786_v12 = vrot.slane %v1751_v10, 1  ;;  %v1800_v40 = vrot.slane %v5837_v51, 2  ;;  %v1801_v4 = vrot.slane %v1749_v8, 2  ;;  %6599 = vst [vmem:[#allocation17_spill] sm:$0xff] %v5960_v55 }
 0x4c7   : > { %4733 = vrot.lane.b32.xlu0 %v4732_v42, %s5098_s13  ;;  %v5882_v13 = vsel %vm777_vm5, %v1782_v31, %v1783_v22  ;;  %v1803_v37 = vrot.slane %v5859_v29, 2  ;;  %v1804_v43 = vrot.slane %v1750_v17, 2  ;;  %v5888_v47 = vsel %vm745_vm4, 0.0, %v1728_v41 }
 0x4c8   : > { %v5891_v57 = vsel %vm777_vm5, %v1785_v26, %v1786_v12  ;;  %v5894_v48 = vsel %vm801_vm6, %v1800_v40, %v1801_v4  ;;  %v1752_v8 = vsel %vm745_vm4, %v1728_v41, 0.0  ;;  %v1806_v19 = vrot.slane %v5862_v38, 2  ;;  %v5941_v40 = vld [vmem:[#allocation2 + $0x220] sm:$0xff]  }
 0x4c9   : > { %v4737_v32 = vpack.i.bf16 %v5891_v57, %v5882_v13  ;;  %v5903_v25 = vsel %vm801_vm6, %v1803_v37, %v1804_v43  ;;  %v1807_v35 = vrot.slane %v1751_v10, 2  ;;  %v1818_v61 = vrot.slane %v5888_v47, 1  ;;  %4496 = vmatprep.subr.bf16.mxu0 %v5941_v40  ;;  %v5948_v4 = vld [vmem:[%s506_s17] sm:$0xff] }
 0x4ca   : > { %v4742_v49 = vpack.i.bf16 %v5903_v25, %v5894_v48  ;;  %v1819_v18 = vrot.slane %v1752_v8, 1  ;;  %v1829_v30 = vrot.slane %v5888_v47, 2  ;;  %v1830_v36 = vrot.slane %v1752_v8, 2  ;;  %v5956_v8 = vld [vmem:[%s506_s17 + $0x10] sm:$0xff] }
 0x4cb   : > { %4738 = vrot.lane.b32.xlu1 %v4737_v32, %s5098_s13  ;;  %v5910_v41 = vsel %vm801_vm6, %v1806_v19, %v1807_v35  ;;  %v1767_v10 = vrot.slane %v5813_v56, 1  ;;  %v1768_v31 = vrot.slane %v5816_v20, 1  ;;  %v4752_v22 = vpack.i.bf16 %v5803_v45, %v5813_v56 }
 0x4cc   : > { %4743 = vrot.lane.b32.xlu0 %v4742_v49, %s5098_s13  ;;  %v5915_v21 = vsel %vm777_vm5, %v1818_v61, %v1819_v18  ;;  %v5921_v42 = vsel %vm801_vm6, %v1829_v30, %v1830_v36  ;;  %v4757_v26 = vpack.i.bf16 %v5834_v54, %v5806_v5  ;;  %v4762_v12 = vpack.i.bf16 %v5859_v29, %v5837_v51  ;;  %v5964_v49 = vld [vmem:[%s506_s17 + $0x20] sm:$0xff]  ;;  %v5968_v30 = vld [vmem:[%s506_s17 + $0x28] sm:$0xff] }
 0x4cd   : > { %v4747_v17 = vpack.i.bf16 %v5910_v41, %v5915_v21  ;;  %v1769_v15 = vsel %vm777_vm5, %v1767_v10, %v1768_v31  ;;  %v4767_v20 = vpack.i.bf16 %v5888_v47, %v5862_v38  ;;  %v2490_v37 = vsel %vm516_vm1, %v5948_v4, 0.0  ;;  %6600 = vst [vmem:[#allocation18_spill] sm:$0xff] %v5964_v49  ;;  %6601 = vst [vmem:[#allocation19_spill] sm:$0xff] %v5968_v30  ;;  %v5972_v10 = vld [vmem:[%s506_s17 + $0x30] sm:$0xff] }
 0x4ce   : > { %v2491_v43 = vsel %vm516_vm1, %v5950_v59, 0.0  ;;  %v2493_v50 = vsel %vm516_vm1, %v5956_v8, 0.0  ;;  %v2495_v35 = vsel %vm516_vm1, %v5960_v55, 0.0  ;;  %v2497_v18 = vsel %vm516_vm1, %v5964_v49, 0.0  ;;  %6602 = vst [vmem:[#allocation20_spill] sm:$0xff] %v5972_v10 }
 0x4cf   : > { %4748 = vrot.lane.b32.xlu1 %v4747_v17, %s5098_s13  ;;  %v2492_v19 = vadd.f32 %v2491_v43, %v2490_v37  ;;  %v2499_v17 = vsel %vm516_vm1, %v5968_v30, 0.0  ;;  %v4001_v43 = vld [vmem:[%s6548_s3 + $0x80] sm:$0xff] }
 0x4d0   : > { %1892 = vrot.lane.b32.xlu0 %v5921_v42, %s5098_s13 }
 0x4d1   : > { %v2494_v32 = vadd.f32 %v2493_v50, %v2492_v19  ;;  %v4002_v19 = vld [vmem:[%s6548_s3 + $0x88] sm:$0xff]  ;;  %v5982_v50 = vld [vmem:[%s506_s17 + $0x38] sm:$0xff]  ;;  %s5019_s17 = scalar_lea.vmem %s6496_s20, 1024 }
 0x4d2   : > { %v2503_v30 = vsel %vm516_vm1, %v5982_v50, 0.0  ;;  %p5020_p12 = scmp.ne.s32.totalorder %s6496_s20, %s5019_s17  ;;  %p5027_p7 = scmp.lt.s32.totalorder %s5025_s15, %s5019_s17 }
 0x4d3   : > { %4753 = vrot.lane.b32.xlu1 %v4752_v22, %s5098_s13  ;;  %v2496_v61 = vadd.f32 %v2495_v35, %v2494_v32 }
 0x4d4   : > { %1833 = vrot.lane.b32.xlu0 %v1769_v15, %s5098_s13  ;;  %p5021_p2 = pnand %p5020_p12, %p6610_p1  ;;  %p5028_p8 = por %p5027_p7, %p5026_p4 }
 0x4d5   : > { %v2498_v36 = vadd.f32 %v2497_v18, %v2496_v61 }
 0x4d6   : > { %p5022_p3 = pneg %p5021_p2 }
 0x4d7   : > { %4758 = vrot.lane.b32.xlu1 %v4757_v26, %s5098_s13  ;;  %v2500_v22 = vadd.f32 %v2499_v17, %v2498_v36 }
 0x4d8   : > { %4763 = vrot.lane.b32.xlu0 %v4762_v12, %s5098_s13  ;;  %p5029_p11 = pnand %p5028_p8, %p5022_p3 }
 0x4db   : > { %4768 = vrot.lane.b32.xlu1 %v4767_v20, %s5098_s13  ;;  %v2501_v20 = vsel %vm516_vm1, %v5972_v10, 0.0  ;;  %v4577_v10 = vpack.c.bf16 %v4002_v19, %v4001_v43  ;;  %v6603_v19 = vmov 0.0|0.0  }
 0x4dc   : > { %v2502_v17 = vadd.f32 %v2501_v20, %v2500_v22 }
 0x533   : > { %v4719_v31 = vpop.permute.xlu1 %4718 }
 0x534   : > { %v4721_v26 = vunpack.i.h.bf16 %v4719_v31  ;;  %v4720_v12 = vunpack.i.l.bf16 %v4719_v31 }
 0x535   : > { %v4724_v37 = vpop.permute.xlu0 %4723 }
 0x536   : > { %v4726_v32 = vunpack.i.h.bf16 %v4724_v37  ;;  %v4725_v35 = vunpack.i.l.bf16 %v4724_v37  ;;  %v1906_v61 = vsel %vm516_vm1, %v5803_v45, %v4720_v12  ;;  %v1907_v18 = vsel %vm516_vm1, %v5806_v5, %v4721_v26  ;;  %v4003_v5 = vld [vmem:[%s6548_s3 + $0x90] sm:$0xff] }
 0x537   : > { %v5988_v36 = vpack.c.bf16 %v1907_v18, %v1906_v61 }
 0x538   : > { %v1921_v31 = vsel %vm516_vm1, %v5821_v28, %v4726_v32  ;;  %v1920_v1 = vsel %vm516_vm1, %v1769_v15, %v4725_v35  ;;  %v4729_v0 = vpop.permute.xlu1 %4728  ;;  %v4004_v28 = vld [vmem:[%s6548_s3 + $0x98] sm:$0xff]  ;;  %v4005_v32 = vld [vmem:[%s6548_s3 + $0xa0] sm:$0xff]  ;;  %v4006_v35 = vld [vmem:[%s6548_s3 + $0xa8] sm:$0xff] }
 0x539   : > { %v1931_v37 = vpack.c.bf16 %v1921_v31, %v1920_v1  ;;  %v4731_v49 = vunpack.i.h.bf16 %v4729_v0  ;;  %v4730_v55 = vunpack.i.l.bf16 %v4729_v0  ;;  %v4734_v45 = vpop.permute.xlu0 %4733  ;;  %2344 = vmatprep.mubr.bf16.mxu1 %v5988_v36  ;;  %v2504_v1 = vadd.f32 %v2503_v30, %v2502_v17 }
 0x53a   : > { %v4736_v15 = vunpack.i.h.bf16 %v4734_v45  ;;  %v4735_v22 = vunpack.i.l.bf16 %v4734_v45  ;;  %v4580_v20 = vpack.c.bf16 %v4004_v28, %v4003_v5  ;;  %v4583_v17 = vpack.c.bf16 %v4006_v35, %v4005_v32 }
 0x53b   : > { %2345 = vmatmul.mubr.bf16.vlgmr.msra.gmra.mrb[28].mxu1 %v1931_v37  ;;  %v1908_v26 = vsel %vm516_vm1, %v5834_v54, %v4730_v55  ;;  %v1909_v0 = vsel %vm516_vm1, %v5837_v51, %v4731_v49  ;;  %v2505_v30 = vrot.slane %v2504_v1, 4 }
 0x53c   : > { %4578 = vmatpush3.bf16.msra.mxu1 %v4577_v10  ;;  %v6006_v12 = vpack.c.bf16 %v1909_v0, %v1908_v26  ;;  %v1922_v51 = vsel %vm516_vm1, %v5824_v3, %v4735_v22  ;;  %v1923_v49 = vsel %vm516_vm1, %v5853_v24, %v4736_v15  ;;  %v4007_v3 = vld [vmem:[%s6548_s3 + $0xb0] sm:$0xff]  ;;  %v4008_v24 = vld [vmem:[%s6548_s3 + $0xb8] sm:$0xff] }
 0x53d   : > { %v4739_v43 = vpop.permute.xlu1 %4738  ;;  %4579 = vmatprep.subr.bf16.mxu1 %v6603_v19  ;;  %v1935_v37 = vpack.c.bf16 %v1923_v49, %v1922_v51  ;;  %v4586_v22 = vpack.c.bf16 %v4008_v24, %v4007_v3 }
 0x53e   : > { %v4741_v54 = vunpack.i.h.bf16 %v4739_v43  ;;  %v4740_v55 = vunpack.i.l.bf16 %v4739_v43  ;;  %v4744_v61 = vpop.permute.xlu0 %4743  ;;  %2352 = vmatprep.mubr.bf16.mxu1 %v6006_v12 }
 0x53f   : > { %v4746_v45 = vunpack.i.h.bf16 %v4744_v61  ;;  %v4745_v5 = vunpack.i.l.bf16 %v4744_v61 }
 0x540   : > { %4581 = vmatpush3.bf16.msra.mxu1 %v4580_v20  ;;  %v1910_v10 = vsel %vm516_vm1, %v5859_v29, %v4740_v55  ;;  %v1911_v18 = vsel %vm516_vm1, %v5862_v38, %v4741_v54  ;;  %v2506_v38 = vadd.f32 %v2505_v30, %v2504_v1 }
 0x541   : > { %v4749_v31 = vpop.permute.xlu1 %4748  ;;  %4582 = vmatprep.subr.bf16.mxu1 %v6603_v19  ;;  %v6031_v29 = vpack.c.bf16 %v1911_v18, %v1910_v10  ;;  %v1924_v32 = vsel %vm516_vm1, %v5856_v14, %v4745_v5  ;;  %v1925_v35 = vsel %vm516_vm1, %v5882_v13, %v4746_v45  ;;  %v6604_v10 = vmov 0.0  }
 0x542   : > { %v1893_v28 = vpop.permute.xlu0 %1892  ;;  %v4750_v15 = vunpack.i.l.bf16 %v4749_v31  ;;  %v2507_v55 = vrot.slane %v2506_v38, 2  ;;  %v4751_v51 = vunpack.i.h.bf16 %v4749_v31  ;;  %v1939_v30 = vpack.c.bf16 %v1925_v35, %v1924_v32 }
 0x543   : > { %2353 = vmatmul.mubr.bf16.gmra.mrb[32].mxu1 %v1935_v37  ;;  %v4896_v37 = vld [vmem:[#allocation2 + $0x228] sm:$0xff]  }
 0x544   : > { %2360 = vmatprep.mubr.bf16.mxu1 %v6031_v29  ;;  %4584 = vmatpush3.bf16.msra.mxu1 %v4583_v17  ;;  %v1928_v54 = vsel %vm516_vm1, %v5888_v47, %v4750_v15  ;;  %v2508_v3 = vadd.f32 %v2507_v55, %v2506_v38  ;;  %v1926_v15 = vsel %vm516_vm1, %v5891_v57, %v4751_v51  ;;  %v4897_v38 = vld [vmem:[#allocation2 + $0x230] sm:$0xff]  }
 0x545   : > { %v4754_v26 = vpop.permute.xlu1 %4753  ;;  %4585 = vmatprep.subr.bf16.mxu1 %v6603_v19  ;;  %v3991_v13 = vpack.c.bf16 %v5661_v11, %v1928_v54  ;;  %v1941_v51 = vpack.c.bf16 %v5910_v41, %v5903_v25 }
 0x546   : > { %v4756_v0 = vunpack.i.h.bf16 %v4754_v26  ;;  %v4755_v20 = vunpack.i.l.bf16 %v4754_v26  ;;  %v1834_v43 = vpop.permute.xlu0 %1833  ;;  %v1927_v26 = vsel %vm516_vm1, %v5915_v21, %v1893_v28 }
 0x547   : > { %v1905_v1 = vsel %vm516_vm1, %v5813_v56, %v1834_v43  ;;  %v1943_v43 = vpack.c.bf16 %v1927_v26, %v1926_v15 }
 0x548   : > { %v1912_v61 = vsel %vm516_vm1, %v5641_v2, %v4755_v20  ;;  %v1913_v19 = vsel %vm516_vm1, %v5840_v44, %v4756_v0  ;;  %4587 = vmatpush3.bf16.msra.mxu1 %v4586_v22  ;;  %v3987_v47 = vpack.c.bf16 %v1905_v1, %v5661_v11  ;;  %v2509_v22 = vrot.slane %v2508_v3, 1 }
 0x549   : > { %v4759_v49 = vpop.permute.xlu1 %4758  ;;  %v1930_v14 = vpack.c.bf16 %v1913_v19, %v1912_v61  ;;  %4531 = vmatprep.subr.mxu1 %v6604_v10  ;;  %v1937_v19 = vpack.c.bf16 %v5894_v48, %v5870_v9 }
 0x54a   : > { %v4761_v18 = vunpack.i.h.bf16 %v4759_v49  ;;  %v4760_v56 = vunpack.i.l.bf16 %v4759_v49  ;;  %v4764_v17 = vpop.permute.xlu0 %4763  ;;  %v2510_v35 = vadd.f32 %v2509_v22, %v2508_v3 }
 0x54b   : > { %2279 = vmatprep.mubr.bf16.mxu0 %v1930_v14  ;;  %2361 = vmatmul.mubr.bf16.gmra.mrb[36].mxu1 %v1939_v30  ;;  %v4766_v24 = vunpack.i.h.bf16 %v4764_v17  ;;  %v4765_v44 = vunpack.i.l.bf16 %v4764_v17 }
 0x54c   : > { %3988 = vmatmul.mubr.msk.bf16.vlgmr.msra.gmra.mrb[24].mxu0 %vm5671_vm9, %v3987_v47  ;;  %3992 = vmatprep.mubr.msk.bf16.mxu1 %vm5692_vm10, %v3991_v13  ;;  %v1914_v31 = vsel %vm516_vm1, %v5831_v33, %v4760_v56  ;;  %v1915_v45 = vsel %vm516_vm1, %v5867_v62, %v4761_v18  ;;  %v2511_v21 = vmul.f32 0.015625, %v2510_v35 }
 0x54d   : > { %v1934_v5 = vpack.c.bf16 %v1915_v45, %v1914_v31  ;;  %4497 = vmatpush3.bf16.msra.mxu0 %v5941_v40  ;;  %v1916_v0 = vsel %vm516_vm1, %v5870_v9, %v4765_v44  ;;  %v1917_v20 = vsel %vm516_vm1, %v5894_v48, %v4766_v24  ;;  %v4769_v32 = vpop.permute.xlu1 %4768  ;;  %v4898_v40 = vld [vmem:[#allocation2 + $0x238] sm:$0xff]  }
 0x54e   : > { %4498 = vmatprep.subr.bf16.mxu0 %v4896_v37  ;;  %v1938_v57 = vpack.c.bf16 %v1917_v20, %v1916_v0  ;;  %v4771_v54 = vunpack.i.h.bf16 %v4769_v32  ;;  %v4770_v1 = vunpack.i.l.bf16 %v4769_v32 }
 0x54f   : > { %2287 = vmatprep.mubr.bf16.mxu0 %v1934_v5 }
 0x550   : > { %v1918_v28 = vsel %vm516_vm1, %v5903_v25, %v4770_v1  ;;  %v1919_v55 = vsel %vm516_vm1, %v5910_v41, %v4771_v54 }
 0x551   : > { %4499 = vmatpush3.bf16.msra.mxu0 %v4896_v37  ;;  %v1942_v61 = vpack.c.bf16 %v1919_v55, %v1918_v28 }
 0x552   : > { %4500 = vmatprep.subr.bf16.mxu0 %v4897_v38 }
 0x553   : > { %2369 = vmatmul.mubr.bf16.gmra.mrb[40].mxu1 %v1943_v43 }
 0x554   : > { %2288 = vmatmul.mubr.bf16.gmra.mrb[28].mxu0 %v5988_v36  ;;  %4528 = vmatprep.mubr.msk.f32.mxu1 %vm5096_vm0, %v6604_v10  ;;  %v1933_v36 = vpack.c.bf16 %v5867_v62, %v5831_v33  ;;  %v4011_v33 = vld [vmem:[%s6550_s5 + $0x8] sm:$0xf] }
 0x555   : > { %2295 = vmatprep.mubr.bf16.mxu0 %v1938_v57  ;;  %4501 = vmatpush3.bf16.msra.mxu0 %v4897_v38 }
 0x556   : > { %4502 = vmatprep.subr.bf16.mxu0 %v4898_v40 }
 0x559   : > { %4503 = vmatpush3.bf16.msra.mxu0 %v4898_v40 }
 0x55b   : > { %4529 = vmatmul.mubr.msk.f32.vlgmr.msra.gmra.mrb[2].mxu1 %vm516_vm1, %v2511_v21 }
 0x55c   : > { %2296 = vmatmul.mubr.bf16.gmra.mrb[32].mxu0 %v6006_v12  ;;  %4533 = vmatprep.mubr.msk.f32.mxu1 %vm5096_vm0, %v6604_v10  ;;  %v1945_v12 = vpack.c.bf16 %v5641_v2, %v5921_v42 }
 0x55d   : > { %2303 = vmatprep.mubr.bf16.mxu0 %v1942_v61  ;;  %4532 = vmatpush3.msk.msra.mxu1 %vm629_vm2, %v4011_v33  ;;  %v4009_v61 = vld [vmem:[%s6549_s4 + $0x2] sm:$0x1] }
 0x564   : > { %2304 = vmatmul.mubr.bf16.gmra.mrb[36].mxu0 %v6031_v29 }
 0x565   : > { %4504 = vmatprep.mubr.msk.bf16.mxu0 %vm516_vm1, %v1933_v36 }
 0x56c   : > { %4505 = vmatmul.mubr.msk.bf16.vlgmr.msra.gmra.mrb[40].mxu0 %vm516_vm1, %v1937_v19 }
 0x56d   : > { %4508 = vmatprep.mubr.msk.bf16.mxu0 %vm516_vm1, %v1941_v51 }
 0x574   : > { %4509 = vmatmul.mubr.msk.bf16.gmra.mrb[44].mxu0 %vm516_vm1, %v1945_v12 }
 0x60e   : > { %v4261_v62 = vpop.f32.mrb[28].mxu1 }
 0x60f   : > { %v4262_v9 = vpop.f32.mrb[29].mxu1 }
 0x610   : > { %v4263_v48 = vadd.f32 %v4262_v9, %v4261_v62  ;;  %v4264_v29 = vpop.f32.mrb[30].mxu1 }
 0x611   : > { %v4265_v25 = vpop.f32.mrb[31].mxu1 }
 0x612   : > { %v4266_v41 = vadd.f32 %v4265_v25, %v4264_v29 }
 0x616   : > { %v4267_v49 = vpop.f32.mrb[32].mxu1 }
 0x617   : > { %v4268_v14 = vpop.f32.mrb[33].mxu1 }
 0x618   : > { %v4269_v30 = vadd.f32 %v4268_v14, %v4267_v49  ;;  %v4270_v10 = vpop.f32.mrb[34].mxu1 }
 0x619   : > { %v4271_v13 = vpop.f32.mrb[35].mxu1 }
 0x61a   : > { %v4272_v42 = vadd.f32 %v4271_v13, %v4270_v10 }
 0x61e   : > { %v4273_v47 = vpop.f32.mrb[36].mxu1 }
 0x61f   : > { %v4221_v18 = vpop.f32.mrb[24].mxu0  ;;  %v4274_v56 = vpop.f32.mrb[37].mxu1 }
 0x620   : > { %v4222_v17 = vpop.f32.mrb[25].mxu0  ;;  %v4275_v37 = vadd.f32 %v4274_v56, %v4273_v47  ;;  %v4276_v3 = vpop.f32.mrb[38].mxu1 }
 0x621   : > { %v4223_v24 = vadd.f32 %v4222_v17, %v4221_v18  ;;  %v4224_v44 = vpop.f32.mrb[26].mxu0  ;;  %v4277_v31 = vpop.f32.mrb[39].mxu1 }
 0x622   : > { %v4225_v45 = vpop.f32.mrb[27].mxu0  ;;  %v4278_v5 = vadd.f32 %v4277_v31, %v4276_v3  ;;  %v1469_v3 = vmul.f32 %v5746_v46, %v5753_v39 }
 0x623   : > { %v4226_v15 = vadd.f32 %v4225_v45, %v4224_v44  ;;  %v2347_v38 = vadd.f32 %v4263_v48, %v4223_v24  ;;  %v3998_v44 = vld [vmem:[%s6553_s8 + $0x1] ss:$0 sm:$0xff] }
 0x624   : > { %v1484_v39 = vadd.f32 %v5751_v52, %v1469_v3 }
 0x625   : > { %v2350_v22 = vadd.f32 %v4266_v41, %v4226_v15 }
 0x626   : > { %v4279_v26 = vpop.f32.mrb[40].mxu1 }
 0x627   : > { %v4227_v0 = vpop.f32.mrb[28].mxu0  ;;  %v4280_v20 = vpop.f32.mrb[41].mxu1 }
 0x628   : > { %v4228_v43 = vpop.f32.mrb[29].mxu0  ;;  %v4281_v32 = vadd.f32 %v4280_v20, %v4279_v26  ;;  %v4282_v40 = vpop.f32.mrb[42].mxu1 }
 0x629   : > { %v4229_v57 = vadd.f32 %v4228_v43, %v4227_v0  ;;  %v4230_v35 = vpop.f32.mrb[30].mxu0  ;;  %v4283_v54 = vpop.f32.mrb[43].mxu1 }
 0x62a   : > { %v4231_v1 = vpop.f32.mrb[31].mxu0  ;;  %v4284_v21 = vadd.f32 %v4283_v54, %v4282_v40 }
 0x62b   : > { %v4232_v28 = vadd.f32 %v4231_v1, %v4230_v35  ;;  %v2355_v55 = vadd.f32 %v4269_v30, %v4229_v57 }
 0x62d   : > { %v2358_v36 = vadd.f32 %v4272_v42, %v4232_v28 }
 0x62e   : > { %v2592_v19 = vpop.f32.mrb[2].mxu1 }
 0x62f   : > { %v4233_v51 = vpop.f32.mrb[32].mxu0  ;;  %v2593_v12 = vadd.f32 %v4009_v61, %v2592_v19  ;;  %v4530_v33 = vpop.f32.mrb[3].mxu1  ;;  %v6117_v19 = vmax.f32 %v5763_v7, 0.0 }
 0x630   : > { %v4234_v62 = vpop.f32.mrb[33].mxu0 }
 0x631   : > { %v2596_v9 = vmax.f32 %v2593_v12, 0.0  ;;  %v4235_v48 = vadd.f32 %v4234_v62, %v4233_v51  ;;  %v4236_v29 = vpop.f32.mrb[34].mxu0 }
 0x632   : > { %v4237_v25 = vpop.f32.mrb[35].mxu0 }
 0x633   : > { %v4238_v41 = vadd.f32 %v4237_v25, %v4236_v29  ;;  %4534 = vmatmul.mubr.msk.f32.vlgmr.msra.gmra.mrb[44].mxu1 %vm625_vm3, %v2596_v9  ;;  %v2363_v49 = vadd.f32 %v4275_v37, %v4235_v48  ;;  %v1470_v37 = vmul.f32 %v5746_v46, %v5756_v58  ;;  %v6112_v46 = vmax.f32 %v5759_v63, 0.0 }
 0x635   : > { %v2366_v14 = vadd.f32 %v4278_v5, %v4238_v41  ;;  %v4000_v5 = vld [vmem:[%s6554_s9 + $0x1] ss:$0 sm:$0xff]  ;;  %v1485_v54 = vadd.f32 %v5751_v52, %v1470_v37 }
 0x637   : > { %v4239_v30 = vpop.f32.mrb[36].mxu0  ;;  %v6120_v33 = vmax.f32 %v1485_v54, 0.0 }
 0x638   : > { %v4240_v10 = vpop.f32.mrb[37].mxu0 }
 0x639   : > { %v4241_v13 = vadd.f32 %v4240_v10, %v4239_v30  ;;  %v4242_v47 = vpop.f32.mrb[38].mxu0 }
 0x63a   : > { %v4243_v18 = vpop.f32.mrb[39].mxu0 }
 0x63b   : > { %v4244_v42 = vadd.f32 %v4243_v18, %v4242_v47  ;;  %v2371_v56 = vadd.f32 %v4281_v32, %v4241_v13 }
 0x63d   : > { %v2374_v17 = vadd.f32 %v4284_v21, %v4244_v42 }
 0x63f   : > { %v4506_v24 = vpop.f32.mrb[40].mxu0 }
 0x640   : > { %v2420_v31 = vadd.f32 %v4506_v24, %v2355_v55  ;;  %v2411_v45 = vpop.f32.mrb[41].mxu0 }
 0x641   : > { %v2412_v15 = vadd.f32 %v2411_v45, %v2347_v38  ;;  %v4507_v26 = vpop.f32.mrb[42].mxu0  ;;  %v6114_v38 = vmax.f32 %v1484_v39, 0.0  ;;  %v6152_v39 = vmax.f32 %v5779_v60, 0.0 }
 0x642   : > { %v2452_v0 = vmul.f32 %v3998_v44, %v2420_v31  ;;  %v2423_v20 = vadd.f32 %v4507_v26, %v2358_v36  ;;  %v2414_v43 = vpop.f32.mrb[43].mxu0  ;;  %v6138_v31 = vmax.f32 %v5768_v27, 0.0 }
 0x643   : > { %v2450_v32 = vmul.f32 %v3998_v44, %v2412_v15  ;;  %v2415_v40 = vadd.f32 %v2414_v43, %v2350_v22  ;;  %v6143_v15 = vmax.f32 %v5772_v34, 0.0 }
 0x644   : > { %v2468_v57 = vadd.f32 %v4000_v5, %v2452_v0  ;;  %v2453_v35 = vmul.f32 %v3998_v44, %v2423_v20  ;;  %v6148_v20 = vmax.f32 %v5776_v53, 0.0 }
 0x645   : > { %v2466_v1 = vadd.f32 %v4000_v5, %v2450_v32  ;;  %v2451_v21 = vmul.f32 %v3998_v44, %v2415_v40 }
 0x646   : > { %v2476_v58 = vmax.f32 %v2468_v57, 0.0  ;;  %v2469_v28 = vadd.f32 %v4000_v5, %v2453_v35 }
 0x647   : > { %v2474_v55 = vmax.f32 %v2466_v1, 0.0  ;;  %v2467_v61 = vadd.f32 %v4000_v5, %v2451_v21  ;;  %v4510_v36 = vpop.f32.mrb[44].mxu0  ;;  %v4899_v21 = vld [vmem:[#allocation2 + $0x280] sm:$0xff]  }
 0x648   : > { %v3466_v22 = vmul.f32 %v2476_v58, %v6112_v46  ;;  %v2477_v51 = vmax.f32 %v2469_v28, 0.0  ;;  %v2436_v12 = vadd.f32 %v4510_v36, %v2371_v56  ;;  %v2427_v52 = vpop.f32.mrb[45].mxu0  ;;  %v4900_v58 = vld [vmem:[#allocation2 + $0x240] sm:$0xff]   ;;  %v4901_v28 = vld [vmem:[#allocation2 + $0x288] sm:$0xff]   ;;  %4304 = vmatprep.subr.bf16.mxu0 %v4899_v21 }
 0x649   : > { %v3464_v63 = vmul.f32 %v2474_v55, %v6114_v38  ;;  %v2475_v62 = vmax.f32 %v2467_v61, 0.0  ;;  %v2428_v9 = vadd.f32 %v2427_v52, %v2363_v49  ;;  %v4511_v48 = vpop.f32.mrb[46].mxu0  ;;  %4305 = vmatpush3.bf16.msra.mxu0 %v4900_v58  ;;  %v4902_v55 = vld [vmem:[#allocation2 + $0x248] sm:$0xff]   ;;  %v4908_v61 = vld [vmem:[#allocation2 + $0x300] sm:$0xff]   ;;  %v4904_v52 = vld [vmem:[#allocation2 + $0x250] sm:$0xff]  }
 0x64a   : > { %v3467_v29 = vmul.f32 %v2477_v51, %v6117_v19  ;;  %v2456_v25 = vmul.f32 %v3998_v44, %v2436_v12  ;;  %v2439_v41 = vadd.f32 %v4511_v48, %v2374_v17  ;;  %v2430_v30 = vpop.f32.mrb[47].mxu0  ;;  %v6125_v7 = vadd.f32 %v3466_v22, %v6112_v46  ;;  %v4910_v36 = vld [vmem:[#allocation2 + $0x2c0] sm:$0xff]   ;;  %4306 = vmatprep.subr.bf16.mxu0 %v4901_v28  ;;  %v4903_v22 = vld [vmem:[#allocation2 + $0x290] sm:$0xff]   ;;  %v4912_v51 = vld [vmem:[#allocation2 + $0x308] sm:$0xff]  }
 0x64b   : > { %v3465_v10 = vmul.f32 %v2475_v62, %v6120_v33  ;;  %v2454_v13 = vmul.f32 %v3998_v44, %v2428_v9  ;;  %v2431_v47 = vadd.f32 %v2430_v30, %v2366_v14  ;;  %v6132_v24 = vadd.f32 %v3464_v63, %v6114_v38  ;;  %4344 = vmatprep.subr.bf16.mxu1 %v4908_v61  ;;  %v4914_v12 = vld [vmem:[#allocation2 + $0x2c8] sm:$0xff]   ;;  %v4916_v63 = vld [vmem:[#allocation2 + $0x310] sm:$0xff]   ;;  %v4905_v62 = vld [vmem:[#allocation2 + $0x298] sm:$0xff]  }
 0x64c   : > { %v2472_v18 = vadd.f32 %v4000_v5, %v2456_v25  ;;  %v2457_v42 = vmul.f32 %v3998_v44, %v2439_v41  ;;  %v6129_v56 = vadd.f32 %v3467_v29, %v6117_v19  ;;  %4345 = vmatpush3.bf16.msra.mxu1 %v4910_v36  ;;  %v4918_v9 = vld [vmem:[#allocation2 + $0x2d0] sm:$0xff]   ;;  %v4906_v48 = vld [vmem:[#allocation2 + $0x258] sm:$0xff]   ;;  %v4907_v29 = vld [vmem:[#allocation2 + $0x2a0] sm:$0xff]  }
 0x64d   : > { %v2470_v3 = vadd.f32 %v4000_v5, %v2454_v13  ;;  %v2455_v49 = vmul.f32 %v3998_v44, %v2431_v47  ;;  %v6135_v17 = vadd.f32 %v3465_v10, %v6120_v33  ;;  %4307 = vmatpush3.bf16.msra.mxu0 %v4902_v55  ;;  %4346 = vmatprep.subr.bf16.mxu1 %v4912_v51  ;;  %v4909_v25 = vld [vmem:[#allocation2 + $0x260] sm:$0xff]   ;;  %v4911_v41 = vld [vmem:[#allocation2 + $0x2a8] sm:$0xff]   ;;  %v4915_v10 = vld [vmem:[#allocation2 + $0x2b0] sm:$0xff]  }
 0x64e   : > { %v2480_v45 = vmax.f32 %v2472_v18, 0.0  ;;  %v2473_v37 = vadd.f32 %v4000_v5, %v2457_v42  ;;  %v3499_v14 = vpack.c.bf16 %v6129_v56, %v6125_v7  ;;  %4308 = vmatprep.subr.bf16.mxu0 %v4903_v22  ;;  %v4913_v30 = vld [vmem:[#allocation2 + $0x268] sm:$0xff]   ;;  %v4917_v13 = vld [vmem:[#allocation2 + $0x270] sm:$0xff]   ;;  %v4012_v47 = vld [vmem:[%s6551_s6 + $0x2] sm:$0x1] }
 0x64f   : > { %v2478_v26 = vmax.f32 %v2470_v3, 0.0  ;;  %v2471_v0 = vadd.f32 %v4000_v5, %v2455_v49  ;;  %v3497_v44 = vpack.c.bf16 %v6135_v17, %v6132_v24  ;;  %v6605_v58 = vld [vmem:[#allocation17_spill] sm:$0xff]  ;;  %v6606_v22 = vld [vmem:[#allocation18_spill] sm:$0xff] }
 0x650   : > { %v3470_v43 = vmul.f32 %v2480_v45, %v6138_v31  ;;  %v2481_v27 = vmax.f32 %v2473_v37, 0.0  ;;  %4347 = vmatpush3.bf16.msra.mxu1 %v4914_v12  ;;  %v4923_v55 = vld [vmem:[#allocation2 + $0x320] sm:$0xff]   ;;  %v6607_v12 = vld [vmem:[#allocation19_spill] sm:$0xff] }
 0x651   : > { %v3468_v32 = vmul.f32 %v2478_v26, %v6143_v15  ;;  %v2479_v40 = vmax.f32 %v2471_v0, 0.0  ;;  %4309 = vmatpush3.bf16.msra.mxu0 %v4904_v52  ;;  %4348 = vmatprep.subr.bf16.mxu1 %v4916_v63  ;;  %v4919_v26 = vld [vmem:[#allocation2 + $0x2b8] sm:$0xff]   ;;  %v6181_v61 = vld [vmem:[#allocation2 + $0x340] sm:$0xff]   ;;  %v4939_v24 = vld [vmem:[%s6555_s10 + $0x50] sm:$0xff]  }
 0x652   : > { %v3471_v34 = vmul.f32 %v2481_v27, %v6148_v20  ;;  %v6157_v57 = vadd.f32 %v3470_v43, %v6138_v31  ;;  %4310 = vmatprep.subr.bf16.mxu0 %v4905_v62  ;;  %v4920_v0 = vld [vmem:[#allocation2 + $0x318] sm:$0xff]   ;;  %v4925_v36 = vld [vmem:[#allocation2 + $0x2e0] sm:$0xff]   ;;  %v4940_v17 = vld [vmem:[%s6555_s10 + $0x10] sm:$0xff]  }
 0x653   : > { %v3469_v5 = vmul.f32 %v2479_v40, %v6152_v39  ;;  %v6161_v35 = vadd.f32 %v3468_v32, %v6143_v15  ;;  %v4921_v43 = vld [vmem:[#allocation2 + $0x278] sm:$0xff]  }
 0x654   : > { %v6164_v53 = vadd.f32 %v3471_v34, %v6148_v20  ;;  %4349 = vmatpush3.bf16.msra.mxu1 %v4918_v9  ;;  %v4922_v32 = vld [vmem:[#allocation2 + $0x2d8] sm:$0xff]  }
 0x655   : > { %v6167_v54 = vadd.f32 %v3469_v5, %v6152_v39  ;;  %4311 = vmatpush3.bf16.msra.mxu0 %v4906_v48  ;;  %4350 = vmatprep.subr.bf16.mxu1 %v4920_v0  ;;  %v6608_v52 = vld [vmem:[#allocation20_spill] sm:$0xff] }
 0x656   : > { %v3503_v60 = vpack.c.bf16 %v6164_v53, %v6157_v57  ;;  %4312 = vmatprep.subr.bf16.mxu0 %v4907_v29 }
 0x657   : > { %v3501_v1 = vpack.c.bf16 %v6167_v54, %v6161_v35 }
 0x658   : > { %4351 = vmatpush3.bf16.msra.mxu1 %v4922_v32 }
 0x659   : > { %4313 = vmatpush3.bf16.msra.mxu0 %v4909_v25  ;;  %4352 = vmatprep.subr.bf16.mxu1 %v4923_v55 }
 0x65a   : > { %4314 = vmatprep.subr.bf16.mxu0 %v4911_v41 }
 0x65c   : > { %4353 = vmatpush3.bf16.msra.mxu1 %v4925_v36 }
 0x65d   : > { %4315 = vmatpush3.bf16.msra.mxu0 %v4913_v30 }
 0x65e   : > { %4316 = vmatprep.subr.bf16.mxu0 %v4915_v10 }
 0x661   : > { %4317 = vmatpush3.bf16.msra.mxu0 %v4917_v13  ;;  %v4926_v13 = vld [vmem:[#allocation2 + $0x328] sm:$0xff]  }
 0x662   : > { %4318 = vmatprep.subr.bf16.mxu0 %v4919_v26  ;;  %4354 = vmatprep.subr.bf16.mxu1 %v4926_v13 }
 0x665   : > { %4319 = vmatpush3.bf16.msra.mxu0 %v4921_v43 }
 0x666   : > { %4536 = vmatprep.subr.bf16.mxu0 %v6181_v61 }
 0x706   : > { %v2673_v18 = vpop.f32.mrb[44].mxu1 }
 0x707   : > { %v2674_v42 = vadd.f32 %v4012_v47, %v2673_v18  ;;  %v4535_v3 = vpop.f32.mrb[45].mxu1  ;;  %v4927_v47 = vld [vmem:[#allocation2 + $0x2e8] sm:$0xff]  }
 0x708   : > { %4355 = vmatpush3.bf16.msra.mxu1 %v4927_v47 }
 0x709   : > { %v4015_v49 = vmul.f32 -1.442695, %v2674_v42 }
 0x70b   : > { %4959 = vpow2.f32 %v4015_v49 }
 0x715   : > { %v4960_v45 = vpop.eup %4959 }
 0x716   : > { %v2680_v37 = vadd.f32 1.0, %v4960_v45 }
 0x718   : > { %4961 = vrcp.f32 %v2680_v37 }
 0x722   : > { %v4962_v27 = vpop.eup %4961 }
 0x723   : > { %v2686_v40 = vrot.slane %v4962_v27, %v5379_v23 }
 0x725   : > { %v2687_v34 = vmul.f32 %v2686_v40, %v5948_v4  ;;  %v2688_v5 = vmul.f32 %v2686_v40, %v5950_v59  ;;  %v2689_v21 = vmul.f32 %v2686_v40, %v5956_v8  ;;  %v2690_v28 = vmul.f32 %v2686_v40, %v6605_v58  ;;  %v4928_v58 = vld [vmem:[#allocation2 + $0x330] sm:$0xff]  }
 0x726   : > { %v2691_v51 = vmul.f32 %v2686_v40, %v6606_v22  ;;  %v2692_v23 = vmul.f32 %v2686_v40, %v6607_v12  ;;  %v2693_v63 = vmul.f32 %v2686_v40, %v6608_v52  ;;  %v6188_v29 = vmul.f32 %v2686_v40, %v5982_v50  ;;  %4356 = vmatprep.subr.bf16.mxu1 %v4928_v58 }
 0x727   : > { %v2703_v62 = vrot.slane %v2687_v34, 7  ;;  %v2704_v9 = vrot.slane %v2688_v5, 7  ;;  %v2705_v48 = vrot.slane %v2689_v21, 7  ;;  %v2706_v4 = vrot.slane %v2690_v28, 7 }
 0x728   : > { %v2707_v59 = vrot.slane %v2691_v51, 7  ;;  %v2708_v8 = vrot.slane %v2692_v23, 7  ;;  %v2709_v3 = vrot.slane %v2693_v63, 7  ;;  %v2710_v32 = vrot.slane %v6188_v29, 7  ;;  %v4930_v51 = vld [vmem:[#allocation2 + $0x2f0] sm:$0xff]  }
 0x729   : > { %v6191_v25 = vsel %vm745_vm4, 0.0, %v2703_v62  ;;  %v6194_v41 = vsel %vm745_vm4, 0.0, %v2704_v9  ;;  %v6197_v30 = vsel %vm745_vm4, %v2703_v62, 0.0  ;;  %v6200_v10 = vsel %vm745_vm4, 0.0, %v2705_v48  ;;  %4357 = vmatpush3.bf16.msra.mxu1 %v4930_v51 }
 0x72a   : > { %v4772_v18 = vpack.i.bf16 %v6194_v41, %v6191_v25  ;;  %v2749_v50 = vrot.slane %v6191_v25, 1  ;;  %v2750_v42 = vrot.slane %v6197_v30, 1  ;;  %v6207_v49 = vsel %vm745_vm4, 0.0, %v2706_v4 }
 0x72b   : > { %v2728_v45 = vsel %vm745_vm4, %v2704_v9, 0.0  ;;  %v6211_v37 = vsel %vm745_vm4, %v2705_v48, 0.0  ;;  %v2752_v26 = vrot.slane %v6194_v41, 1  ;;  %v2755_v27 = vrot.slane %v6200_v10, 1 }
 0x72c   : > { %4773 = vrot.lane.b32.xlu0 %v4772_v18, %s5098_s13  ;;  %v6216_v0 = vsel %vm777_vm5, %v2749_v50, %v2750_v42  ;;  %v2753_v43 = vrot.slane %v2728_v45, 1  ;;  %v4777_v40 = vpack.i.bf16 %v6207_v49, %v6200_v10  ;;  %v2756_v34 = vrot.slane %v6211_v37, 1  ;;  %v4931_v42 = vld [vmem:[#allocation2 + $0x338] sm:$0xff]  }
 0x72d   : > { %2815 = vrot.lane.b32.xlu1 %v6216_v0, %s5098_s13  ;;  %v6226_v5 = vsel %vm745_vm4, 0.0, %v2707_v59  ;;  %v2730_v21 = vsel %vm745_vm4, %v2706_v4, 0.0  ;;  %v6233_v55 = vsel %vm745_vm4, 0.0, %v2708_v8  ;;  %v2731_v36 = vsel %vm745_vm4, %v2707_v59, 0.0  ;;  %4358 = vmatprep.subr.bf16.mxu1 %v4931_v42 }
 0x72e   : > { %v6230_v28 = vsel %vm777_vm5, %v2752_v26, %v2753_v43  ;;  %v2758_v22 = vrot.slane %v6207_v49, 1  ;;  %v6238_v12 = vsel %vm777_vm5, %v2755_v27, %v2756_v34  ;;  %v2759_v23 = vrot.slane %v2730_v21, 1  ;;  %v4932_v26 = vld [vmem:[#allocation2 + $0x2f8] sm:$0xff]  }
 0x72f   : > { %v2761_v52 = vrot.slane %v6226_v5, 1  ;;  %v2762_v63 = vrot.slane %v2731_v36, 1  ;;  %v2771_v62 = vrot.slane %v6197_v30, 2  ;;  %v4782_v9 = vpack.i.bf16 %v6238_v12, %v6230_v28  ;;  %4359 = vmatpush3.bf16.msra.mxu1 %v4932_v26 }
 0x730   : > { %4778 = vrot.lane.b32.xlu0 %v4777_v40, %s5098_s13  ;;  %v6246_v48 = vsel %vm745_vm4, 0.0, %v2709_v3  ;;  %v2732_v4 = vsel %vm745_vm4, %v2708_v8, 0.0  ;;  %v4787_v59 = vpack.i.bf16 %v6233_v55, %v6226_v5  ;;  %v6252_v29 = vsel %vm777_vm5, %v2758_v22, %v2759_v23  ;;  %4392 = vmatprep.subr.bf16.mxu1 %v4935_v16 }
 0x731   : > { %v6255_v13 = vsel %vm777_vm5, %v2761_v52, %v2762_v63  ;;  %v2733_v30 = vsel %vm745_vm4, %v2709_v3, 0.0  ;;  %4783 = vrot.lane.b32.xlu1 %v4782_v9, %s5098_s13  ;;  %v6260_v47 = vsel %vm745_vm4, 0.0, %v2710_v32  ;;  %v2764_v18 = vrot.slane %v6233_v55, 1 }
 0x732   : > { %v2765_v8 = vrot.slane %v2732_v4, 1  ;;  %v2767_v50 = vrot.slane %v6246_v48, 1  ;;  %v2768_v43 = vrot.slane %v2733_v30, 1  ;;  %v2770_v27 = vrot.slane %v6191_v25, 2 }
 0x733   : > { %v2773_v40 = vrot.slane %v6194_v41, 2  ;;  %v2774_v34 = vrot.slane %v2728_v45, 2  ;;  %v4792_v3 = vpack.i.bf16 %v6255_v13, %v6252_v29  ;;  %v2776_v58 = vrot.slane %v6200_v10, 2 }
 0x734   : > { %4788 = vrot.lane.b32.xlu0 %v4787_v59, %s5098_s13  ;;  %v2777_v22 = vrot.slane %v6211_v37, 2  ;;  %v2779_v51 = vrot.slane %v6207_v49, 2  ;;  %v6273_v23 = vsel %vm777_vm5, %v2764_v18, %v2765_v8  ;;  %v6276_v52 = vsel %vm777_vm5, %v2767_v50, %v2768_v43 }
 0x735   : > { %v2780_v63 = vrot.slane %v2730_v21, 2  ;;  %4793 = vrot.lane.b32.xlu1 %v4792_v3, %s5098_s13  ;;  %v4797_v45 = vpack.i.bf16 %v6260_v47, %v6246_v48  ;;  %v2772_v9 = vsel %vm801_vm6, %v2770_v27, %v2771_v62  ;;  %v6283_v37 = vsel %vm801_vm6, %v2773_v40, %v2774_v34 }
 0x736   : > { %v2782_v59 = vrot.slane %v6226_v5, 2  ;;  %v2783_v42 = vrot.slane %v2731_v36, 2  ;;  %v2785_v18 = vrot.slane %v6233_v55, 2  ;;  %v2786_v8 = vrot.slane %v2732_v4, 2 }
 0x737   : > { %v4802_v21 = vpack.i.bf16 %v6276_v52, %v6273_v23  ;;  %v6291_v50 = vsel %vm801_vm6, %v2776_v58, %v2777_v22  ;;  %v6294_v26 = vsel %vm801_vm6, %v2779_v51, %v2780_v63  ;;  %v2734_v62 = vsel %vm745_vm4, %v2710_v32, 0.0 }
 0x738   : > { %4798 = vrot.lane.b32.xlu0 %v4797_v45, %s5098_s13  ;;  %v2788_v43 = vrot.slane %v6246_v48, 2  ;;  %v2789_v27 = vrot.slane %v2733_v30, 2  ;;  %v2800_v36 = vrot.slane %v6260_v47, 1  ;;  %v2801_v40 = vrot.slane %v2734_v62, 1 }
 0x739   : > { %4803 = vrot.lane.b32.xlu1 %v4802_v21, %s5098_s13  ;;  %v4807_v4 = vpack.i.bf16 %v6283_v37, %v2772_v9  ;;  %v6302_v34 = vsel %vm801_vm6, %v2782_v59, %v2783_v42  ;;  %v6305_v3 = vsel %vm801_vm6, %v2785_v18, %v2786_v8  ;;  %v4812_v32 = vpack.i.bf16 %v6294_v26, %v6291_v50 }
 0x73a   : > { %v6311_v30 = vsel %vm801_vm6, %v2788_v43, %v2789_v27  ;;  %v6314_v58 = vsel %vm777_vm5, %v2800_v36, %v2801_v40  ;;  %v4817_v22 = vpack.i.bf16 %v6305_v3, %v6302_v34  ;;  %v2811_v51 = vrot.slane %v6260_v47, 2 }
 0x73b   : > { %v2812_v63 = vrot.slane %v2734_v62, 2  ;;  %v4822_v45 = vpack.i.bf16 %v6311_v30, %v6314_v58 }
 0x73c   : > { %4808 = vrot.lane.b32.xlu0 %v4807_v4, %s5098_s13 }
 0x73d   : > { %4813 = vrot.lane.b32.xlu1 %v4812_v32, %s5098_s13  ;;  %v6325_v59 = vsel %vm801_vm6, %v2811_v51, %v2812_v63  ;;  %v4929_v51 = vld [vmem:[#allocation2 + $0x348] sm:$0xff]  }
 0x740   : > { %4818 = vrot.lane.b32.xlu0 %v4817_v22, %s5098_s13 }
 0x741   : > { %4823 = vrot.lane.b32.xlu1 %v4822_v45, %s5098_s13 }
 0x744   : > { %2874 = vrot.lane.b32.xlu0 %v6325_v59, %s5098_s13  ;;  %s6609_s13 = sld [smem:[#allocation21_spill]] }
 0x74a   : > { %s6494_s14 = scalar_lea.hbm %s6609_s13, %s4094_s28 }
 0x79e   : > { %v4774_v42 = vpop.permute.xlu0 %4773 }
 0x79f   : > { %v4776_v18 = vunpack.i.h.bf16 %v4774_v42  ;;  %v4775_v8 = vunpack.i.l.bf16 %v4774_v42  ;;  %v2816_v21 = vpop.permute.xlu1 %2815 }
 0x7a0   : > { %v2887_v62 = vsel %vm516_vm1, %v6191_v25, %v2816_v21 }
 0x7a1   : > { %v2894_v43 = vsel %vm516_vm1, %v5641_v2, %v4775_v8  ;;  %v2895_v27 = vsel %vm516_vm1, %v2772_v9, %v4776_v18  ;;  %v4054_v4 = vpack.c.bf16 %v2887_v62, %v5661_v11 }
 0x7a2   : > { %v4779_v36 = vpop.permute.xlu0 %4778  ;;  %v2912_v40 = vpack.c.bf16 %v2895_v27, %v2894_v43 }
 0x7a3   : > { %v4781_v32 = vunpack.i.h.bf16 %v4779_v36  ;;  %v4780_v22 = vunpack.i.l.bf16 %v4779_v36  ;;  %v4784_v63 = vpop.permute.xlu1 %4783 }
 0x7a4   : > { %3261 = vmatprep.mubr.bf16.mxu0 %v2912_v40  ;;  %v4786_v45 = vunpack.i.h.bf16 %v4784_v63  ;;  %v4785_v42 = vunpack.i.l.bf16 %v4784_v63 }
 0x7a5   : > { %4055 = vmatmul.mubr.msk.bf16.vlgmr.msra.gmra.mrb[48].mxu0 %vm5671_vm9, %v4054_v4  ;;  %v2896_v25 = vsel %vm516_vm1, %v6283_v37, %v4780_v22  ;;  %v2897_v9 = vsel %vm516_vm1, %v6291_v50, %v4781_v32  ;;  %v4934_v22 = vld [vmem:[#allocation2 + $0x358] sm:$0xff]  }
 0x7a6   : > { %4537 = vmatpush3.bf16.msra.mxu0 %v6181_v61  ;;  %v4789_v18 = vpop.permute.xlu0 %4788  ;;  %v2916_v8 = vpack.c.bf16 %v2897_v9, %v2896_v25  ;;  %v2888_v43 = vsel %vm516_vm1, %v6194_v41, %v4785_v42  ;;  %v2889_v27 = vsel %vm516_vm1, %v6200_v10, %v4786_v45 }
 0x7a7   : > { %v4791_v21 = vunpack.i.h.bf16 %v4789_v18  ;;  %v4790_v62 = vunpack.i.l.bf16 %v4789_v18  ;;  %4538 = vmatprep.subr.bf16.mxu0 %v4929_v51  ;;  %v4794_v36 = vpop.permute.xlu1 %4793  ;;  %v2914_v40 = vpack.c.bf16 %v2889_v27, %v2888_v43 }
 0x7a8   : > { %3269 = vmatprep.mubr.bf16.mxu0 %v2916_v8  ;;  %v4796_v41 = vunpack.i.h.bf16 %v4794_v36  ;;  %v4795_v63 = vunpack.i.l.bf16 %v4794_v36 }
 0x7a9   : > { %v2898_v4 = vsel %vm516_vm1, %v6294_v26, %v4790_v62  ;;  %v2899_v61 = vsel %vm516_vm1, %v6302_v34, %v4791_v21  ;;  %3326 = vmatprep.mubr.bf16.mxu1 %v2914_v40 }
 0x7aa   : > { %v4799_v32 = vpop.permute.xlu0 %4798  ;;  %4539 = vmatpush3.bf16.msra.mxu0 %v4929_v51  ;;  %v2920_v10 = vpack.c.bf16 %v2899_v61, %v2898_v4  ;;  %v2890_v21 = vsel %vm516_vm1, %v6207_v49, %v4795_v63  ;;  %v2891_v51 = vsel %vm516_vm1, %v6226_v5, %v4796_v41 }
 0x7ab   : > { %4540 = vmatprep.subr.bf16.mxu0 %v4933_v6  ;;  %v4804_v42 = vpop.permute.xlu1 %4803  ;;  %v4801_v45 = vunpack.i.h.bf16 %v4799_v32  ;;  %v4800_v25 = vunpack.i.l.bf16 %v4799_v32  ;;  %v2918_v49 = vpack.c.bf16 %v2891_v51, %v2890_v21  ;;  %v2919_v21 = vpack.c.bf16 %v6302_v34, %v6294_v26  ;;  %v4938_v26 = vld [vmem:[%s6555_s10 + $0x8] sm:$0xff]   ;;  %v4942_v34 = vld [vmem:[%s6555_s10 + $0x18] sm:$0xff]  }
 0x7ac   : > { %v4806_v32 = vunpack.i.h.bf16 %v4804_v42  ;;  %v4805_v63 = vunpack.i.l.bf16 %v4804_v42 }
 0x7ad   : > { %3270 = vmatmul.mubr.bf16.gmra.mrb[52].mxu0 %v2914_v40  ;;  %v2900_v36 = vsel %vm516_vm1, %v6305_v3, %v4800_v25 }
 0x7ae   : > { %v4809_v9 = vpop.permute.xlu0 %4808  ;;  %3277 = vmatprep.mubr.bf16.mxu0 %v2920_v10  ;;  %4541 = vmatpush3.bf16.msra.mxu0 %v4933_v6  ;;  %v2901_v6 = vsel %vm516_vm1, %v6311_v30, %v4801_v45  ;;  %v2893_v10 = vsel %vm516_vm1, %v6246_v48, %v4806_v32 }
 0x7af   : > { %v4811_v18 = vunpack.i.h.bf16 %v4809_v9  ;;  %v4810_v8 = vunpack.i.l.bf16 %v4809_v9  ;;  %4542 = vmatprep.subr.bf16.mxu0 %v4934_v22  ;;  %v4814_v62 = vpop.permute.xlu1 %4813  ;;  %v2924_v5 = vpack.c.bf16 %v2901_v6, %v2900_v36  ;;  %v4948_v36 = vld [vmem:[%s6555_s10 + $0x30] sm:$0xff]   ;;  %v4949_v6 = vld [vmem:[%s6555_s10 + $0x78] sm:$0xff]  }
 0x7b0   : > { %v4816_v4 = vunpack.i.h.bf16 %v4814_v62  ;;  %v4815_v61 = vunpack.i.l.bf16 %v4814_v62 }
 0x7b1   : > { %v2903_v43 = vsel %vm516_vm1, %v6230_v28, %v4811_v18  ;;  %v2902_v27 = vsel %vm516_vm1, %v6216_v0, %v4810_v8 }
 0x7b2   : > { %v2913_v40 = vpack.c.bf16 %v2903_v43, %v2902_v27  ;;  %4543 = vmatpush3.bf16.msra.mxu0 %v4934_v22  ;;  %v2904_v0 = vsel %vm516_vm1, %v6238_v12, %v4815_v61  ;;  %v2905_v28 = vsel %vm516_vm1, %v6252_v29, %v4816_v4  ;;  %v4819_v41 = vpop.permute.xlu0 %4818  ;;  %v2892_v22 = vsel %vm516_vm1, %v6233_v55, %v4805_v63  ;;  %v4947_v27 = vld [vmem:[%s6555_s10 + $0x70] sm:$0xff]  }
 0x7b3   : > { %v4824_v45 = vpop.permute.xlu1 %4823  ;;  %v2917_v42 = vpack.c.bf16 %v2905_v28, %v2904_v0  ;;  %v4821_v25 = vunpack.i.h.bf16 %v4819_v41  ;;  %v4820_v9 = vunpack.i.l.bf16 %v4819_v41  ;;  %v2922_v18 = vpack.c.bf16 %v2893_v10, %v2892_v22 }
 0x7b4   : > { %3327 = vmatmul.mubr.bf16.vlgmr.msra.gmra.mrb[48].mxu1 %v2913_v40  ;;  %v4825_v8 = vunpack.i.l.bf16 %v4824_v45  ;;  %v2915_v12 = vpack.c.bf16 %v6291_v50, %v6283_v37  ;;  %v4826_v51 = vunpack.i.h.bf16 %v4824_v45  ;;  %v2923_v43 = vpack.c.bf16 %v6311_v30, %v6305_v3  ;;  %v4943_v3 = vld [vmem:[%s6555_s10 + $0x60] sm:$0xff]   ;;  %v4950_v40 = vld [vmem:[%s6555_s10 + $0x38] sm:$0xff]  }
 0x7b5   : > { %3278 = vmatmul.mubr.bf16.gmra.mrb[56].mxu0 %v2918_v49  ;;  %3334 = vmatprep.mubr.bf16.mxu1 %v2918_v49  ;;  %v2906_v55 = vsel %vm516_vm1, %v6255_v13, %v4820_v9  ;;  %v2907_v48 = vsel %vm516_vm1, %v6273_v23, %v4821_v25  ;;  %v4944_v30 = vld [vmem:[%s6555_s10 + $0x20] sm:$0xff]  }
 0x7b6   : > { %3285 = vmatprep.mubr.bf16.mxu0 %v2924_v5  ;;  %v2910_v29 = vsel %vm516_vm1, %v6260_v47, %v4825_v8  ;;  %v2921_v62 = vpack.c.bf16 %v2907_v48, %v2906_v55  ;;  %v2875_v50 = vpop.permute.xlu0 %2874  ;;  %v2908_v13 = vsel %vm516_vm1, %v6276_v52, %v4826_v51  ;;  %v4936_v52 = vld [vmem:[%s6555_s10] sm:$0xff]  }
 0x7b7   : > { %v4058_v37 = vpack.c.bf16 %v5661_v11, %v2910_v29  ;;  %v2909_v47 = vsel %vm516_vm1, %v6314_v58, %v2875_v50  ;;  %v2927_v11 = vpack.c.bf16 %v5641_v2, %v6325_v59  ;;  %v4937_v2 = vld [vmem:[%s6555_s10 + $0x48] sm:$0xff]   ;;  %4393 = vmatpush3.bf16.msra.mxu1 %v4936_v52 }
 0x7b8   : > { %v2925_v23 = vpack.c.bf16 %v2909_v47, %v2908_v13  ;;  %4394 = vmatprep.subr.bf16.mxu1 %v4937_v2  ;;  %v4945_v58 = vld [vmem:[%s6555_s10 + $0x68] sm:$0xff]  }
 0x7b9   : > { %v4946_v59 = vld [vmem:[%s6555_s10 + $0x28] sm:$0xff]  }
 0x7bb   : > { %4395 = vmatpush3.bf16.msra.mxu1 %v4938_v26 }
 0x7bc   : > { %3335 = vmatmul.mubr.bf16.gmra.mrb[52].mxu1 %v2917_v42  ;;  %4396 = vmatprep.subr.bf16.mxu1 %v4939_v24 }
 0x7bd   : > { %3286 = vmatmul.mubr.bf16.gmra.mrb[60].mxu0 %v2922_v18  ;;  %3342 = vmatprep.mubr.bf16.mxu1 %v2922_v18 }
 0x7be   : > { %4544 = vmatprep.mubr.msk.bf16.mxu0 %vm516_vm1, %v2915_v12 }
 0x7bf   : > { %4397 = vmatpush3.bf16.msra.mxu1 %v4940_v17 }
 0x7c4   : > { %3343 = vmatmul.mubr.bf16.gmra.mrb[56].mxu1 %v2921_v62 }
 0x7c5   : > { %4059 = vmatprep.mubr.msk.bf16.mxu1 %vm5692_vm10, %v4058_v37  ;;  %4545 = vmatmul.mubr.msk.bf16.vlgmr.msra.gmra.mrb[64].mxu0 %vm516_vm1, %v2919_v21 }
 0x7c6   : > { %4548 = vmatprep.mubr.msk.bf16.mxu0 %vm516_vm1, %v2923_v43 }
 0x7cc   : > { %3351 = vmatmul.mubr.bf16.gmra.mrb[60].mxu1 %v2925_v23 }
 0x7cd   : > { %4549 = vmatmul.mubr.msk.bf16.gmra.mrb[68].mxu0 %vm516_vm1, %v2927_v11  ;;  %3664 = vmatprep.mubr.bf16.mxu1 %v3497_v44  ;;  %v4941_v44 = vld [vmem:[%s6555_s10 + $0x58] sm:$0xff]  }
 0x7ce   : > { %4398 = vmatprep.subr.bf16.mxu1 %v4941_v44 }
 0x7cf   : > { %4399 = vmatpush3.bf16.msra.mxu1 %v4942_v34 }
 0x7d0   : > { %4400 = vmatprep.subr.bf16.mxu1 %v4943_v3 }
 0x7d3   : > { %4401 = vmatpush3.bf16.msra.mxu1 %v4944_v30 }
 0x7d4   : > { %4402 = vmatprep.subr.bf16.mxu1 %v4945_v58 }
 0x7d7   : > { %4403 = vmatpush3.bf16.msra.mxu1 %v4946_v59 }
 0x7d8   : > { %4404 = vmatprep.subr.bf16.mxu1 %v4947_v27  ;;  %v4065_v27 = vld [vmem:[%s6553_s8 + $0x2] ss:$0 sm:$0xff] }
 0x7db   : > { %4405 = vmatpush3.bf16.msra.mxu1 %v4948_v36 }
 0x7dc   : > { %4406 = vmatprep.subr.bf16.mxu1 %v4949_v6 }
 0x7df   : > { %4407 = vmatpush3.bf16.msra.mxu1 %v4950_v40 }
 0x878   : > { %v4320_v4 = vpop.f32.mrb[48].mxu0 }
 0x879   : > { %v4321_v61 = vpop.f32.mrb[49].mxu0 }
 0x87a   : > { %v4322_v49 = vadd.f32 %v4321_v61, %v4320_v4  ;;  %v4323_v32 = vpop.f32.mrb[50].mxu0  ;;  %v4067_v61 = vld [vmem:[%s6554_s9 + $0x2] ss:$0 sm:$0xff] }
 0x87b   : > { %v4324_v63 = vpop.f32.mrb[51].mxu0 }
 0x87c   : > { %v4325_v5 = vadd.f32 %v4324_v63, %v4323_v32 }
 0x880   : > { %v4326_v0 = vpop.f32.mrb[52].mxu0 }
 0x881   : > { %v4327_v28 = vpop.f32.mrb[53].mxu0 }
 0x882   : > { %v4328_v41 = vadd.f32 %v4327_v28, %v4326_v0  ;;  %v4329_v22 = vpop.f32.mrb[54].mxu0 }
 0x883   : > { %v4330_v10 = vpop.f32.mrb[55].mxu0 }
 0x884   : > { %v4331_v45 = vadd.f32 %v4330_v10, %v4329_v22 }
 0x887   : > { %v4360_v42 = vpop.f32.mrb[48].mxu1 }
 0x888   : > { %v4332_v25 = vpop.f32.mrb[56].mxu0  ;;  %v4361_v9 = vpop.f32.mrb[49].mxu1 }
 0x889   : > { %v4362_v18 = vadd.f32 %v4361_v9, %v4360_v42  ;;  %v4333_v8 = vpop.f32.mrb[57].mxu0  ;;  %v4363_v12 = vpop.f32.mrb[50].mxu1 }
 0x88a   : > { %v4334_v55 = vadd.f32 %v4333_v8, %v4332_v25  ;;  %v4335_v48 = vpop.f32.mrb[58].mxu0  ;;  %v4364_v29 = vpop.f32.mrb[51].mxu1 }
 0x88b   : > { %v4365_v62 = vadd.f32 %v4364_v29, %v4363_v12  ;;  %v4336_v21 = vpop.f32.mrb[59].mxu0  ;;  %v3329_v51 = vadd.f32 %v4362_v18, %v4322_v49 }
 0x88c   : > { %v4337_v37 = vadd.f32 %v4336_v21, %v4335_v48 }
 0x88d   : > { %v3332_v50 = vadd.f32 %v4365_v62, %v4325_v5 }
 0x88f   : > { %v4366_v43 = vpop.f32.mrb[52].mxu1 }
 0x890   : > { %v4338_v13 = vpop.f32.mrb[60].mxu0  ;;  %v4367_v47 = vpop.f32.mrb[53].mxu1 }
 0x891   : > { %v4368_v23 = vadd.f32 %v4367_v47, %v4366_v43  ;;  %v4339_v11 = vpop.f32.mrb[61].mxu0  ;;  %v4369_v16 = vpop.f32.mrb[54].mxu1 }
 0x892   : > { %v4340_v52 = vadd.f32 %v4339_v11, %v4338_v13  ;;  %v4341_v2 = vpop.f32.mrb[62].mxu0  ;;  %v4370_v26 = vpop.f32.mrb[55].mxu1 }
 0x893   : > { %v4371_v24 = vadd.f32 %v4370_v26, %v4369_v16  ;;  %v4342_v17 = vpop.f32.mrb[63].mxu0  ;;  %v3337_v44 = vadd.f32 %v4368_v23, %v4328_v41 }
 0x894   : > { %v4343_v34 = vadd.f32 %v4342_v17, %v4341_v2 }
 0x895   : > { %v3340_v3 = vadd.f32 %v4371_v24, %v4331_v45 }
 0x897   : > { %v4372_v30 = vpop.f32.mrb[56].mxu1 }
 0x898   : > { %v4373_v58 = vpop.f32.mrb[57].mxu1  ;;  %v4546_v59 = vpop.f32.mrb[64].mxu0 }
 0x899   : > { %v4374_v36 = vadd.f32 %v4373_v58, %v4372_v30  ;;  %v3402_v6 = vadd.f32 %v4546_v59, %v3337_v44  ;;  %v4375_v40 = vpop.f32.mrb[58].mxu1  ;;  %v3393_v4 = vpop.f32.mrb[65].mxu0 }
 0x89a   : > { %v3394_v49 = vadd.f32 %v3393_v4, %v3329_v51  ;;  %v4376_v32 = vpop.f32.mrb[59].mxu1  ;;  %v4547_v63 = vpop.f32.mrb[66].mxu0 }
 0x89b   : > { %v3434_v5 = vmul.f32 %v4065_v27, %v3402_v6  ;;  %v4377_v0 = vadd.f32 %v4376_v32, %v4375_v40  ;;  %v3405_v28 = vadd.f32 %v4547_v63, %v3340_v3  ;;  %v3396_v41 = vpop.f32.mrb[67].mxu0  ;;  %v3345_v22 = vadd.f32 %v4374_v36, %v4334_v55 }
 0x89c   : > { %v3432_v10 = vmul.f32 %v4065_v27, %v3394_v49  ;;  %v3397_v45 = vadd.f32 %v3396_v41, %v3332_v50 }
 0x89d   : > { %v3450_v42 = vadd.f32 %v4067_v61, %v3434_v5  ;;  %v3435_v25 = vmul.f32 %v4065_v27, %v3405_v28  ;;  %v3348_v9 = vadd.f32 %v4377_v0, %v4337_v37 }
 0x89e   : > { %v3448_v18 = vadd.f32 %v4067_v61, %v3432_v10  ;;  %v3433_v8 = vmul.f32 %v4065_v27, %v3397_v45 }
 0x89f   : > { %v3458_v12 = vmax.f32 %v3450_v42, 0.0  ;;  %v3451_v48 = vadd.f32 %v4067_v61, %v3435_v25  ;;  %v4378_v29 = vpop.f32.mrb[60].mxu1 }
 0x8a0   : > { %v3456_v62 = vmax.f32 %v3448_v18, 0.0  ;;  %v3449_v21 = vadd.f32 %v4067_v61, %v3433_v8  ;;  %v4379_v51 = vpop.f32.mrb[61].mxu1  ;;  %v4550_v43 = vpop.f32.mrb[68].mxu0 }
 0x8a1   : > { %v3482_v13 = vmul.f32 %v3458_v12, %v6112_v46  ;;  %v3459_v47 = vmax.f32 %v3451_v48, 0.0  ;;  %v4380_v23 = vadd.f32 %v4379_v51, %v4378_v29  ;;  %v4381_v11 = vpop.f32.mrb[62].mxu1  ;;  %v3409_v55 = vpop.f32.mrb[69].mxu0 }
 0x8a2   : > { %v3480_v50 = vmul.f32 %v3456_v62, %v6114_v38  ;;  %v3457_v16 = vmax.f32 %v3449_v21, 0.0  ;;  %v3410_v2 = vadd.f32 %v3409_v55, %v3345_v22  ;;  %v4382_v37 = vpop.f32.mrb[63].mxu1  ;;  %v4551_v26 = vpop.f32.mrb[70].mxu0 }
 0x8a3   : > { %v3483_v24 = vmul.f32 %v3459_v47, %v6117_v19  ;;  %v3353_v17 = vadd.f32 %v4380_v23, %v4340_v52  ;;  %v4383_v44 = vadd.f32 %v4382_v37, %v4381_v11  ;;  %v3412_v3 = vpop.f32.mrb[71].mxu0  ;;  %v3490_v30 = vadd.f32 %v3482_v13, %v3458_v12 }
 0x8a4   : > { %v3481_v58 = vmul.f32 %v3457_v16, %v6120_v33  ;;  %v3436_v59 = vmul.f32 %v4065_v27, %v3410_v2  ;;  %v3413_v46 = vadd.f32 %v3412_v3, %v3348_v9  ;;  %v3488_v4 = vadd.f32 %v3480_v50, %v3456_v62 }
 0x8a5   : > { %v3418_v36 = vadd.f32 %v4550_v43, %v3353_v17  ;;  %v3356_v6 = vadd.f32 %v4383_v44, %v4343_v34  ;;  %v3491_v40 = vadd.f32 %v3483_v24, %v3459_v47 }
 0x8a6   : > { %v3489_v49 = vadd.f32 %v3481_v58, %v3457_v16  ;;  %v3452_v38 = vadd.f32 %v4067_v61, %v3436_v59  ;;  %v3437_v32 = vmul.f32 %v4065_v27, %v3413_v46 }
 0x8a7   : > { %v3438_v63 = vmul.f32 %v4065_v27, %v3418_v36  ;;  %v3421_v5 = vadd.f32 %v4551_v26, %v3356_v6  ;;  %v3498_v0 = vpack.c.bf16 %v3491_v40, %v3490_v30 }
 0x8a8   : > { %v3496_v28 = vpack.c.bf16 %v3489_v49, %v3488_v4  ;;  %v3460_v19 = vmax.f32 %v3452_v38, 0.0  ;;  %v3453_v52 = vadd.f32 %v4067_v61, %v3437_v32 }
 0x8a9   : > { %v3454_v41 = vadd.f32 %v4067_v61, %v3438_v63  ;;  %v3439_v22 = vmul.f32 %v4065_v27, %v3421_v5 }
 0x8aa   : > { %v3484_v10 = vmul.f32 %v3460_v19, %v6143_v15  ;;  %v3461_v33 = vmax.f32 %v3453_v52, 0.0  ;;  %3665 = vmatmul.mubr.bf16.vlgmr.msra.gmra.mrb[64].mxu1 %v3496_v28 }
 0x8ab   : > { %v3462_v45 = vmax.f32 %v3454_v41, 0.0  ;;  %v3455_v42 = vadd.f32 %v4067_v61, %v3439_v22  ;;  %3672 = vmatprep.mubr.bf16.mxu1 %v3499_v14  ;;  %v4084_v14 = vld [vmem:[%s6556_s11] ss:$0 sm:$0xff] }
 0x8ac   : > { %v3485_v34 = vmul.f32 %v3461_v33, %v6152_v39  ;;  %v3492_v25 = vadd.f32 %v3484_v10, %v3460_v19  ;;  %v4085_v61 = vld [vmem:[#allocation5] ss:$0 sm:$0xff] }
 0x8ad   : > { %v3486_v9 = vmul.f32 %v3462_v45, %v6138_v31  ;;  %v3463_v18 = vmax.f32 %v3455_v42, 0.0 }
 0x8ae   : > { %v3493_v8 = vadd.f32 %v3485_v34, %v3461_v33 }
 0x8af   : > { %v3487_v27 = vmul.f32 %v3463_v18, %v6148_v20  ;;  %v3494_v12 = vadd.f32 %v3486_v9, %v3462_v45 }
 0x8b0   : > { %v3500_v15 = vpack.c.bf16 %v3493_v8, %v3492_v25 }
 0x8b1   : > { %v3495_v48 = vadd.f32 %v3487_v27, %v3463_v18 }
 0x8b2   : > { %3673 = vmatmul.mubr.bf16.gmra.mrb[68].mxu1 %v3498_v0 }
 0x8b3   : > { %3680 = vmatprep.mubr.bf16.mxu1 %v3501_v1  ;;  %v3502_v7 = vpack.c.bf16 %v3495_v48, %v3494_v12 }
 0x8ba   : > { %3681 = vmatmul.mubr.bf16.gmra.mrb[72].mxu1 %v3500_v15 }
 0x8bb   : > { %3688 = vmatprep.mubr.bf16.mxu1 %v3503_v60 }
 0x8c2   : > { %3689 = vmatmul.mubr.bf16.gmra.mrb[76].mxu1 %v3502_v7 }
 0x97d   : > { %v4408_v56 = vpop.f32.mrb[64].mxu1 }
 0x97e   : > { %v4409_v31 = vpop.f32.mrb[65].mxu1 }
 0x97f   : > { %v4410_v20 = vadd.f32 %v4409_v31, %v4408_v56  ;;  %v4411_v39 = vpop.f32.mrb[66].mxu1 }
 0x980   : > { %v4412_v29 = vpop.f32.mrb[67].mxu1 }
 0x981   : > { %v3704_v35 = vmul.f32 %v4410_v20, %v4084_v14  ;;  %v4413_v54 = vadd.f32 %v4412_v29, %v4411_v39 }
 0x983   : > { %v3719_v1 = vadd.f32 %v4085_v61, %v3704_v35  ;;  %v3705_v62 = vmul.f32 %v4413_v54, %v4084_v14 }
 0x985   : > { %v3727_v57 = vmax.f32 %v3719_v1, 0.0  ;;  %v3720_v53 = vadd.f32 %v4085_v61, %v3705_v62  ;;  %v4414_v60 = vpop.f32.mrb[68].mxu1 }
 0x986   : > { %v4415_v21 = vpop.f32.mrb[69].mxu1 }
 0x987   : > { %3735 = vst.msk [vmem:[%s6475_s25] sm:$0xff] %vm516_vm1, %v3727_v57  ;;  %v3728_v51 = vmax.f32 %v3720_v53, 0.0  ;;  %v4416_v43 = vadd.f32 %v4415_v21, %v4414_v60  ;;  %v4417_v13 = vpop.f32.mrb[70].mxu1 }
 0x988   : > { %v4418_v47 = vpop.f32.mrb[71].mxu1 }
 0x989   : > { %3736 = vst.msk [vmem:[%s6475_s25 + $0x8] sm:$0xff] %vm516_vm1, %v3728_v51  ;;  %v3706_v23 = vmul.f32 %v4416_v43, %v4084_v14  ;;  %v4419_v11 = vadd.f32 %v4418_v47, %v4417_v13 }
 0x98b   : > { %v3721_v55 = vadd.f32 %v4085_v61, %v3706_v23  ;;  %v3707_v50 = vmul.f32 %v4419_v11, %v4084_v14 }
 0x98d   : > { %v3729_v16 = vmax.f32 %v3721_v55, 0.0  ;;  %v3722_v2 = vadd.f32 %v4085_v61, %v3707_v50  ;;  %v4420_v37 = vpop.f32.mrb[72].mxu1 }
 0x98e   : > { %v4421_v26 = vpop.f32.mrb[73].mxu1 }
 0x98f   : > { %3737 = vst.msk [vmem:[%s6475_s25 + $0x10] sm:$0xff] %vm516_vm1, %v3729_v16  ;;  %v3730_v24 = vmax.f32 %v3722_v2, 0.0  ;;  %v4422_v17 = vadd.f32 %v4421_v26, %v4420_v37  ;;  %v4423_v44 = vpop.f32.mrb[74].mxu1 }
 0x990   : > { %v4424_v3 = vpop.f32.mrb[75].mxu1 }
 0x991   : > { %3738 = vst.msk [vmem:[%s6475_s25 + $0x18] sm:$0xff] %vm516_vm1, %v3730_v24  ;;  %v3708_v30 = vmul.f32 %v4422_v17, %v4084_v14  ;;  %v4425_v58 = vadd.f32 %v4424_v3, %v4423_v44 }
 0x993   : > { %v3723_v59 = vadd.f32 %v4085_v61, %v3708_v30  ;;  %v3709_v46 = vmul.f32 %v4425_v58, %v4084_v14 }
 0x995   : > { %v3731_v36 = vmax.f32 %v3723_v59, 0.0  ;;  %v3724_v6 = vadd.f32 %v4085_v61, %v3709_v46  ;;  %v4426_v40 = vpop.f32.mrb[76].mxu1 }
 0x996   : > { %v4427_v4 = vpop.f32.mrb[77].mxu1 }
 0x997   : > { %3739 = vst.msk [vmem:[%s6475_s25 + $0x20] sm:$0xff] %vm516_vm1, %v3731_v36  ;;  %v3732_v49 = vmax.f32 %v3724_v6, 0.0  ;;  %v4428_v38 = vadd.f32 %v4427_v4, %v4426_v40  ;;  %v4429_v32 = vpop.f32.mrb[78].mxu1 }
 0x998   : > { %v4430_v63 = vpop.f32.mrb[79].mxu1 }
 0x999   : > { %3740 = vst.msk [vmem:[%s6475_s25 + $0x28] sm:$0xff] %vm516_vm1, %v3732_v49  ;;  %v3710_v5 = vmul.f32 %v4428_v38, %v4084_v14  ;;  %v4431_v0 = vadd.f32 %v4430_v63, %v4429_v32 }
 0x99b   : > { %v3725_v28 = vadd.f32 %v4085_v61, %v3710_v5  ;;  %v3711_v19 = vmul.f32 %v4431_v0, %v4084_v14 }
 0x99d   : > { %v3733_v52 = vmax.f32 %v3725_v28, 0.0  ;;  %v3726_v41 = vadd.f32 %v4085_v61, %v3711_v19 }
 0x99f   : > { %3741 = vst.msk [vmem:[%s6475_s25 + $0x30] sm:$0xff] %vm516_vm1, %v3733_v52  ;;  %v3734_v22 = vmax.f32 %v3726_v41, 0.0 }
 0x9a1   : > { %3742 = vst.msk [vmem:[%s6475_s25 + $0x38] sm:$0xff] %vm516_vm1, %v3734_v22 }
 0x9a2   : > { %5032 = shalt.err (!%p5029_p11)
}
 0x9a3   : > { %s5033_s16 = scalar_lea.hbm %s6494_s14, 1024  ;;  %s5037_s22 = scalar_lea.hbm %s6609_s13, 2048 }
 0x9a4   : > { %p5034_p13 = scmp.ne.s32.totalorder %s6494_s14, %s5033_s16  ;;  %p5038_p6 = scmp.lt.u32.totalorder %s6494_s14, %s6609_s13 }
 0x9a5   : > { %p5039_p9 = scmp.lt.u32.totalorder %s5037_s22, %s5033_s16  ;;  %p5041_p12 = scmp.lt.u32.totalorder %s5033_s16, %s6494_s14 }
 0x9a6   : > { %p5035_p0 = pnand %p5034_p13, %p6610_p1 }
 0x9a7   : > { %p5040_p10 = por %p5039_p9, %p5038_p6 }
 0x9a8   : > { %p5036_p5 = pneg %p5035_p0 }
 0x9a9   : > { %p5042_p2 = por %p5041_p12, %p5040_p10 }
 0x9ab   : > { %p5043_p3 = pnand %p5042_p2, %p5036_p5 }
 0x9ad   : > { %5046 = shalt.err (!%p5043_p3)
}
 0x9ae   : > { %s5101_s30 = smov 128   ;;  %s5102_s27 = smov 8  }
 0x9af   : > { %4596 = dma.vmem_to_hbm [thread:$0]  (%p6610_p1), %s6496_s20, 1024, %s6494_s14, %s6504_s29, %s5101_s30, %s5101_s30, %s5102_s27  }
 0x9b0 PF: > { %s6611_s17 = sld [smem:[#allocation13_spill]]  ;;  %s6612_s23 = sld [smem:[#allocation11_spill]] }
 0x9b1   : > { %s6613_s19 = sld [smem:[#allocation16_spill]] }
 0x9b6   : > { %p4613_p4 = scmp.ge.s32.totalorder %s6611_s17, 2  ;;  %s3772_s15 = sand.u32 1, %s6612_s23  }
 0x9b7   : > { %p6614_p7 = scmp.ne.s32.totalorder %s6613_s19, 0  ;;  %s3773_s16 = scalar_lea.sflag [#allocation4], %s3772_s15 }
 0x9b9   : > { %p4606_p8 = pnand %p4613_p4, %p6614_p7 }
 0x9bb   : > { %5072 = dma.done.wait (!%p4606_p8), %s3773_s16, 1024  }
 0x9bc   : > { %5074 = vsyncadd (!%p4606_p8), %s3773_s16, 4294966272  ;;  %s6615_s28 = sld [smem:[#allocation14_spill]]  ;;  %s6616_s21 = sld [smem:[#allocation12_spill]] }
 0x9bd   : > { %s6617_s27 = sld [smem:[#allocation15_spill]]  ;;  %s6618_s25 = smov %s5081_s26 }
 0x9c2   : > { %p25_p11 = scmp.ge.s32.totalorder %s6615_s28, 4   ;;  %s6619_s26 = smov %s6616_s21 }
 0x9c4   :  { %27 = sbr.rel (!%p25_p11) target bundleno = 7 (0x7), region = 136 }
 0x9cb   :  { %3778 = vsyncpa [#allocation3], 1 }
 0x9cc   :  { %3780 = vsyncpa [#allocation3 + $0x1], 1 }
 0x9cd   :  { %3781 = vsyncpa [#allocation6], 1 }
 0x9ce   :  { %3782 = vsyncpa [#allocation4], 1 }
 0x9cf   :  { %3784 = vsyncpa [#allocation4 + $0x1], 1 }

</bundles_post_ra>
